<compile_context>
chip_gen: v5e
topology: v5e:2x2
jax: 0.10.0
libtpu: 0.0.40
codegen_flags: <defaults>
</compile_context>

<pallas_src>
import math
import functools

import jax
import jax.numpy as jnp
from jax.experimental import pallas as pl
from jax.experimental.pallas import tpu as pltpu

F16_MIN = float(jnp.finfo(jnp.float16).min)   # torch.finfo(torch.float16).min
LN_EPS = 1e-5                                 # nn.LayerNorm default eps

_WEIGHT_KEYS = ("wqkv", "bqkv", "wo", "bo", "g1", "b1",
                "w1", "bf1", "w2", "bf2", "g2", "b2")


def _gelu_tanh(x):
    # tanh-form GELU (EUP tanh). Differs from the exact erf GELU used by F.gelu
    # by <~1e-3 abs; covered by the validation tolerance below.
    c = math.sqrt(2.0 / math.pi)
    return 0.5 * x * (1.0 + jnp.tanh(c * (x + 0.044715 * x * x * x)))


def _layer_norm(a, gamma, beta, eps):
    mu = jnp.mean(a, axis=-1, keepdims=True)
    var = jnp.mean(jnp.square(a - mu), axis=-1, keepdims=True)
    return (a - mu) * jax.lax.rsqrt(var + eps) * gamma + beta


def _transformer_block_kernel(
    x_ref, valid_ref,
    wqkv_ref, bqkv_ref, wo_ref, bo_ref,
    g1_ref, b1_ref,
    w1_ref, bf1_ref, w2_ref, bf2_ref,
    g2_ref, b2_ref,
    o_ref,
    q_sc, k_sc, v_sc,
    *, num_heads: int, q_tile: int, reshape_heads: bool,
):
    bf16 = jnp.bfloat16
    S, D = x_ref.shape[1], x_ref.shape[2]
    H = num_heads
    Dh = D // H
    qi = pl.program_id(1)

    if reshape_heads:
        def head_split(t):                       # (S, D) -> (H, S, Dh)
            return jnp.transpose(t.reshape(S, H, Dh), (1, 0, 2))

        def head_merge(t):                       # (H, TQ, Dh) -> (TQ, D)
            return jnp.transpose(t, (1, 0, 2)).reshape(q_tile, D)
    else:
        # Compatibility fallback (older Mosaic reshape restrictions).
        def head_split(t):
            return jnp.stack([t[:, h * Dh:(h + 1) * Dh] for h in range(H)], axis=0)

        def head_merge(t):
            return jnp.concatenate([t[h] for h in range(H)], axis=-1)

    # ---- per-batch fused QKV projection, cached across query tiles ----------
    @pl.when(qi == 0)
    def _():
        xb = x_ref[0].astype(bf16)                                   # (S, D)
        qkv = jnp.dot(xb, wqkv_ref[...],
                      preferred_element_type=jnp.float32)            # (S, 3D) f32
        qkv = qkv + bqkv_ref[...]
        qkv_b = qkv.astype(bf16)                                     # single f32->bf16 cast
        # 1/sqrt(Dh) is already folded into the Q weights/bias (host side).
        q_sc[...] = head_split(qkv_b[:, :D])
        k_sc[...] = head_split(qkv_b[:, D:2 * D])
        v_sc[...] = head_split(qkv_b[:, 2 * D:])

    # ---- attention for this query tile, full key extent (exact softmax) -----
    q_start = qi * q_tile
    if q_tile % 8 == 0:
        q_start = pl.multiple_of(q_start, 8)

    q = q_sc[:, pl.ds(q_start, q_tile), :]                           # (H, TQ, Dh) bf16
    k = k_sc[...]                                                    # (H, S, Dh)  bf16
    v = v_sc[...]                                                    # (H, S, Dh)  bf16

    s = jnp.einsum('hqd,hkd->hqk', q, k,
                   preferred_element_type=jnp.float32)               # (H, TQ, S) f32
    keep = valid_ref[0] != 0                                         # (1, S) bool (key padding)
    s = jnp.where(keep[None], s, F16_MIN)   # scores.masked_fill_(~mask, f16.min)
    s = s - jnp.max(s, axis=-1, keepdims=True)                       # softmax(dim=-1)
    e = jnp.exp(s)
    p = e * pl.reciprocal(jnp.sum(e, axis=-1, keepdims=True), approx=True)

    ctx = jnp.einsum('hqk,hkd->hqd', p.astype(bf16), v,
                     preferred_element_type=jnp.float32)             # (H, TQ, Dh) f32
    ctx = head_merge(ctx.astype(bf16))                               # (TQ, D) bf16
    attn = jnp.dot(ctx, wo_ref[...],
                   preferred_element_type=jnp.float32) + bo_ref[...] # (TQ, D) f32

    # ---- residual + LayerNorm 1 (dropout = identity) ------------------------
    x_tile = x_ref[0, pl.ds(q_start, q_tile), :]                     # (TQ, D) f32
    h1 = _layer_norm(x_tile + attn, g1_ref[...], b1_ref[...], LN_EPS)

    # ---- position-wise feed-forward ------------------------------------------
    f = jnp.dot(h1.astype(bf16), w1_ref[...],
                preferred_element_type=jnp.float32) + bf1_ref[...]   # (TQ, 4D)
    f = _gelu_tanh(f)
    f = jnp.dot(f.astype(bf16), w2_ref[...],
                preferred_element_type=jnp.float32) + bf2_ref[...]   # (TQ, D)

    # Module computes ln2(h + drop(h)) = ln2(2f) at inference; by LayerNorm
    # scale invariance ln2(2f, eps) == LayerNorm(f, eps/4) EXACTLY.
    o_ref[0] = _layer_norm(f, g2_ref[...], b2_ref[...], LN_EPS * 0.25)


def prepare_params(params, num_heads):
    """One-time parameter preparation (hoisted out of the per-call path):
    QKV fusion, 1/sqrt(Dh) folding into Q, bf16 weight casts, bias reshapes."""
    D = params["wq"].shape[0]
    Dh = D // num_heads
    scale = 1.0 / math.sqrt(Dh)
    f32, bf16 = jnp.float32, jnp.bfloat16
    return {
        "wqkv": jnp.concatenate([params["wq"] * scale, params["wk"], params["wv"]],
                                axis=1).astype(bf16),                 # (D, 3D)
        "bqkv": jnp.concatenate([params["bq"] * scale, params["bk"], params["bv"]],
                                axis=0).reshape(1, 3 * D).astype(f32),
        "wo": params["wo"].astype(bf16),                              # (D, D)
        "bo": params["bo"].reshape(1, D).astype(f32),
        "g1": params["g1"].reshape(1, D).astype(f32),
        "b1": params["b1"].reshape(1, D).astype(f32),
        "w1": params["w1"].astype(bf16),                              # (D, 4D)
        "bf1": params["bf1"].reshape(1, -1).astype(f32),
        "w2": params["w2"].astype(bf16),                              # (4D, D)
        "bf2": params["bf2"].reshape(1, D).astype(f32),
        "g2": params["g2"].reshape(1, D).astype(f32),
        "b2": params["b2"].reshape(1, D).astype(f32),
    }


def _vmem_limit_bytes():
    """Generation-aware VMEM limit (leave ~15% headroom for compiler scratch)."""
    try:
        cap = pltpu.get_tpu_info().vmem_capacity_bytes
        return int(cap * 0.85)
    except Exception:
        return None   # fall back to the compiler's default scoped limit


def _pick_q_tile(S, vmem_limit):
    """Query-tile size: larger tiles on 128 MiB parts, 128 on v7x (64 MiB/TC)."""
    big_vmem = vmem_limit is not None and vmem_limit >= 96 * (1 << 20)
    max_tq = 256 if big_vmem else 128
    if S <= max_tq:
        return S
    for tq in range(max_tq, 7, -8):
        if S % tq == 0:
            return tq
    # TODO(synk): pad/mask ragged query tiles; fall back to a single full-S tile.
    return S


def _const_index_map(ndim):
    def index_map(b, qi):
        return (0,) * ndim
    return index_map


def transformer_block(x, key_valid, prep, num_heads):
    """x: (B, S, D) f32; key_valid: (B, S) bool/int (1 = valid key position).

    BERT4Rec builds its (B,1,S,S) attention mask by repeating a per-key padding
    mask along the query axis, so the kernel takes the (B, S) validity vector
    directly (S^2 -> S mask bytes).
    """
    B, S, D = x.shape
    assert D % num_heads == 0
    Dh = D // num_heads
    assert key_valid.shape == (B, S)

    vmem_limit = _vmem_limit_bytes()
    q_tile = _pick_q_tile(S, vmem_limit)
    n_q = S // q_tile

    valid = jnp.asarray(key_valid).reshape(B, 1, S).astype(jnp.int8)
    reps = [prep[k] for k in _WEIGHT_KEYS]

    def build(single_buffer_weights: bool, reshape_heads: bool):
        def rep_spec(a):
            idx = _const_index_map(a.ndim)
            if single_buffer_weights:
                # Constant block index across the whole grid -> one buffer is enough.
                return pl.BlockSpec(a.shape, idx, pipeline_mode=pl.Buffered(1))
            return pl.BlockSpec(a.shape, idx)

        in_specs = [
            pl.BlockSpec((1, S, D), lambda b, qi: (b, 0, 0)),    # x: full sequence per batch
            pl.BlockSpec((1, 1, S), lambda b, qi: (b, 0, 0)),    # key validity (int8)
        ] + [rep_spec(a) for a in reps]

        kernel = functools.partial(
            _transformer_block_kernel,
            num_heads=num_heads, q_tile=q_tile, reshape_heads=reshape_heads)

        return pl.pallas_call(
            kernel,
            grid=(B, n_q),
            in_specs=in_specs,
            out_specs=pl.BlockSpec((1, q_tile, D), lambda b, qi: (b, qi, 0)),
            out_shape=jax.ShapeDtypeStruct((B, S, D), jnp.float32),
            scratch_shapes=[
                pltpu.VMEM((num_heads, S, Dh), jnp.bfloat16),    # Q (head-major, scaled)
                pltpu.VMEM((num_heads, S, Dh), jnp.bfloat16),    # K
                pltpu.VMEM((num_heads, S, Dh), jnp.bfloat16),    # V
            ],
            compiler_params=pltpu.CompilerParams(
                # batch: parallel (megacore); query tiles: arbitrary because the
                # per-batch Q/K/V scratch cache is carried across the qi axis
                # (avoids n_q-fold redundant K/V projection work).
                dimension_semantics=("parallel", "arbitrary"),
                vmem_limit_bytes=vmem_limit,
            ),
        )

    # Preferred config first; compatibility fallbacks for Mosaic versions that
    # reject pipeline_mode=Buffered(1) or lane-dim reshape/transpose head splits.
    configs = (
        dict(single_buffer_weights=True, reshape_heads=True),
        dict(single_buffer_weights=True, reshape_heads=False),
        dict(single_buffer_weights=False, reshape_heads=True),
        dict(single_buffer_weights=False, reshape_heads=False),
    )
    errors = []
    for cfg in configs:
        try:
            return build(**cfg)(x, valid, *reps)
        except Exception as e:   # pragma: no cover - version-compat fallback
            errors.append(e)
    raise errors[-1]


def reference(x, mask, params, num_heads):
    """Pure-JAX f32 replica of the PyTorch forward (inference mode)."""
    B, S, D = x.shape
    Dh = D // num_heads
    hp = jax.lax.Precision.HIGHEST

    def lin(a, w, b):
        return jnp.dot(a, w, precision=hp) + b

    def split(t):
        return t.reshape(B, S, num_heads, Dh).transpose(0, 2, 1, 3)

    q = split(lin(x, params["wq"], params["bq"]))
    k = split(lin(x, params["wk"], params["bk"]))
    v = split(lin(x, params["wv"], params["bv"]))
    scores = jnp.einsum("bhqd,bhkd->bhqk", q, k, precision=hp) / math.sqrt(Dh)
    scores = jnp.where(mask, scores, F16_MIN)
    probs = jax.nn.softmax(scores, axis=-1)
    h = jnp.einsum("bhqk,bhkd->bhqd", probs, v, precision=hp)
    h = h.transpose(0, 2, 1, 3).reshape(B, S, D)
    attn = lin(h, params["wo"], params["bo"])

    def ln(a, g, b):
        mu = a.mean(-1, keepdims=True)
        var = ((a - mu) ** 2).mean(-1, keepdims=True)
        return (a - mu) / jnp.sqrt(var + LN_EPS) * g + b

    h1 = ln(x + attn, params["g1"], params["b1"])
    f = lin(h1, params["w1"], params["bf1"])
    f = jax.nn.gelu(f, approximate=False)
    f = lin(f, params["w2"], params["bf2"])
    return ln(f + f, params["g2"], params["b2"])


if __name__ == "__main__":
    B, S, D, H = 2, 8, 32, 4   # batch, seq, hidden, heads (head_dim = 8)
    # NOTE: toy shapes validate correctness only (far below the (8,128) vreg tile).
    key = jax.random.PRNGKey(0)
    keys = jax.random.split(key, 16)

    def w(k, shape, scale=0.05):
        return jax.random.normal(k, shape, jnp.float32) * scale

    params = {
        "wq": w(keys[0], (D, D)), "bq": w(keys[1], (D,)),
        "wk": w(keys[2], (D, D)), "bk": w(keys[3], (D,)),
        "wv": w(keys[4], (D, D)), "bv": w(keys[5], (D,)),
        "wo": w(keys[6], (D, D)), "bo": w(keys[7], (D,)),
        "g1": jnp.ones((D,), jnp.float32), "b1": jnp.zeros((D,), jnp.float32),
        "w1": w(keys[8], (D, 4 * D)), "bf1": w(keys[9], (4 * D,)),
        "w2": w(keys[10], (4 * D, D)), "bf2": w(keys[11], (D,)),
        "g2": 1.0 + w(keys[12], (D,)), "b2": w(keys[13], (D,)),
    }
    x = jax.random.normal(keys[14], (B, S, D), jnp.float32)

    # BERT4Rec-style key-padding mask: per-batch valid lengths.
    lengths = jnp.array([S, 5], dtype=jnp.int32)
    key_valid = jnp.arange(S, dtype=jnp.int32)[None, :] < lengths[:, None]  # (B, S) bool

    prep = prepare_params(params, H)           # one-time parameter prep (hoisted)
    out = transformer_block(x, key_valid, prep, H)
    out = jax.block_until_ready(out)

    # Reference consumes the dense (B,1,S,S) broadcast of the padding mask.
    mask_full = jnp.broadcast_to(key_valid[:, None, None, :], (B, 1, S, S))
    ref = reference(x, mask_full, params, H)

    assert out.shape == (B, S, D)
    err = float(jnp.max(jnp.abs(out - ref)))
    # Tolerance covers bf16 matmul operands, tanh vs erf GELU, approx reciprocal.
    assert jnp.allclose(out, ref, atol=3e-2, rtol=3e-2), err
    print("KERNEL_OK")
</pallas_src>

<mosaic_0001>
module attributes {stable_mosaic.version = 11 : i64} {
  func.func @_transformer_block_kernel(%arg0: i32, %arg1: i32, %arg2: memref<1x8x32xf32, #tpu.memory_space<vmem>>, %arg3: memref<1x1x8xi8, #tpu.memory_space<vmem>>, %arg4: memref<32x96xbf16, #tpu.memory_space<vmem>>, %arg5: memref<1x96xf32, #tpu.memory_space<vmem>>, %arg6: memref<32x32xbf16, #tpu.memory_space<vmem>>, %arg7: memref<1x32xf32, #tpu.memory_space<vmem>>, %arg8: memref<1x32xf32, #tpu.memory_space<vmem>>, %arg9: memref<1x32xf32, #tpu.memory_space<vmem>>, %arg10: memref<32x128xbf16, #tpu.memory_space<vmem>>, %arg11: memref<1x128xf32, #tpu.memory_space<vmem>>, %arg12: memref<128x32xbf16, #tpu.memory_space<vmem>>, %arg13: memref<1x32xf32, #tpu.memory_space<vmem>>, %arg14: memref<1x32xf32, #tpu.memory_space<vmem>>, %arg15: memref<1x32xf32, #tpu.memory_space<vmem>>, %arg16: memref<1x8x32xf32, #tpu.memory_space<vmem>>, %arg17: memref<4x8x8xbf16, #tpu.memory_space<vmem>>, %arg18: memref<4x8x8xbf16, #tpu.memory_space<vmem>>, %arg19: memref<4x8x8xbf16, #tpu.memory_space<vmem>>) attributes {dimension_semantics = [#tpu.dimension_semantics<parallel>, #tpu.dimension_semantics<arbitrary>], iteration_bounds = array<i64: 2, 1>, scalar_prefetch = 0 : i64, scratch_operands = 3 : i64, tpu.core_type = #tpu.core_type<tc>, window_params = [{transform_indices = @transform_0, window_bounds = array<i64: 1, 8, 32>}, {transform_indices = @transform_1, window_bounds = array<i64: 1, 1, 8>}, {pipeline_mode = #tpu.pipeline_mode<synchronous>, transform_indices = @transform_2, window_bounds = array<i64: 32, 96>}, {pipeline_mode = #tpu.pipeline_mode<synchronous>, transform_indices = @transform_3, window_bounds = array<i64: 1, 96>}, {pipeline_mode = #tpu.pipeline_mode<synchronous>, transform_indices = @transform_4, window_bounds = array<i64: 32, 32>}, {pipeline_mode = #tpu.pipeline_mode<synchronous>, transform_indices = @transform_5, window_bounds = array<i64: 1, 32>}, {pipeline_mode = #tpu.pipeline_mode<synchronous>, transform_indices = @transform_6, window_bounds = array<i64: 1, 32>}, {pipeline_mode = #tpu.pipeline_mode<synchronous>, transform_indices = @transform_7, window_bounds = array<i64: 1, 32>}, {pipeline_mode = #tpu.pipeline_mode<synchronous>, transform_indices = @transform_8, window_bounds = array<i64: 32, 128>}, {pipeline_mode = #tpu.pipeline_mode<synchronous>, transform_indices = @transform_9, window_bounds = array<i64: 1, 128>}, {pipeline_mode = #tpu.pipeline_mode<synchronous>, transform_indices = @transform_10, window_bounds = array<i64: 128, 32>}, {pipeline_mode = #tpu.pipeline_mode<synchronous>, transform_indices = @transform_11, window_bounds = array<i64: 1, 32>}, {pipeline_mode = #tpu.pipeline_mode<synchronous>, transform_indices = @transform_12, window_bounds = array<i64: 1, 32>}, {pipeline_mode = #tpu.pipeline_mode<synchronous>, transform_indices = @transform_13, window_bounds = array<i64: 1, 32>}, {transform_indices = @transform_14, window_bounds = array<i64: 1, 8, 32>}]} {
    %c0_i32 = arith.constant 0 : i32
    %0 = arith.cmpi eq, %arg1, %c0_i32 : i32
    %1 = arith.extui %0 : i1 to i32
    %c0_i32_0 = arith.constant 0 : i32
    %2 = arith.cmpi ne, %1, %c0_i32_0 : i32
    scf.if %2 {
      %c0_57 = arith.constant 0 : index
      %c0_58 = arith.constant 0 : index
      %c0_59 = arith.constant 0 : index
      %119 = vector.load %arg2[%c0_57, %c0_58, %c0_59] : memref<1x8x32xf32, #tpu.memory_space<vmem>>, vector<1x8x32xf32>
      %120 = vector.shape_cast %119 : vector<1x8x32xf32> to vector<8x32xf32>
      %121 = arith.truncf %120 : vector<8x32xf32> to vector<8x32xbf16>
      %c0_60 = arith.constant 0 : index
      %c0_61 = arith.constant 0 : index
      %122 = vector.load %arg4[%c0_60, %c0_61] : memref<32x96xbf16, #tpu.memory_space<vmem>>, vector<32x96xbf16>
      %cst_62 = arith.constant dense<0.000000e+00> : vector<8x96xf32>
      %123 = tpu.matmul %121, %122, %cst_62 {dimension_numbers = #tpu.dot_dimension_numbers<[1], [0], [0], [1], [0, 0, 1, 1], [], []>} : vector<8x32xbf16>, vector<32x96xbf16>, vector<8x96xf32> -> vector<8x96xf32>
      %c0_63 = arith.constant 0 : index
      %c0_64 = arith.constant 0 : index
      %124 = vector.load %arg5[%c0_63, %c0_64] : memref<1x96xf32, #tpu.memory_space<vmem>>, vector<1x96xf32>
      %125 = vector.broadcast %124 : vector<1x96xf32> to vector<8x96xf32>
      %126 = arith.addf %123, %125 : vector<8x96xf32>
      %127 = arith.truncf %126 : vector<8x96xf32> to vector<8x96xbf16>
      %128 = vector.extract_strided_slice %127 {offsets = [0, 0], sizes = [8, 32], strides = [1, 1]} : vector<8x96xbf16> to vector<8x32xbf16>
      %129 = vector.shape_cast %128 : vector<8x32xbf16> to vector<8x4x8xbf16>
      %130 = tpu.transpose %129, [1, 0, 2] : vector<8x4x8xbf16> -> vector<4x8x8xbf16>
      %c0_65 = arith.constant 0 : index
      %c0_66 = arith.constant 0 : index
      %c0_67 = arith.constant 0 : index
      %131 = vector.load %arg17[%c0_65, %c0_66, %c0_67] : memref<4x8x8xbf16, #tpu.memory_space<vmem>>, vector<4x8x8xbf16>
      tpu.vector_store %arg17[%c0_65, %c0_66, %c0_67], %130 {strides = array<i32>} : memref<4x8x8xbf16, #tpu.memory_space<vmem>>, vector<4x8x8xbf16>,
      %132 = vector.extract_strided_slice %127 {offsets = [0, 32], sizes = [8, 32], strides = [1, 1]} : vector<8x96xbf16> to vector<8x32xbf16>
      %133 = vector.shape_cast %132 : vector<8x32xbf16> to vector<8x4x8xbf16>
      %134 = tpu.transpose %133, [1, 0, 2] : vector<8x4x8xbf16> -> vector<4x8x8xbf16>
      %c0_68 = arith.constant 0 : index
      %c0_69 = arith.constant 0 : index
      %c0_70 = arith.constant 0 : index
      %135 = vector.load %arg18[%c0_68, %c0_69, %c0_70] : memref<4x8x8xbf16, #tpu.memory_space<vmem>>, vector<4x8x8xbf16>
      tpu.vector_store %arg18[%c0_68, %c0_69, %c0_70], %134 {strides = array<i32>} : memref<4x8x8xbf16, #tpu.memory_space<vmem>>, vector<4x8x8xbf16>,
      %136 = vector.extract_strided_slice %127 {offsets = [0, 64], sizes = [8, 32], strides = [1, 1]} : vector<8x96xbf16> to vector<8x32xbf16>
      %137 = vector.shape_cast %136 : vector<8x32xbf16> to vector<8x4x8xbf16>
      %138 = tpu.transpose %137, [1, 0, 2] : vector<8x4x8xbf16> -> vector<4x8x8xbf16>
      %c0_71 = arith.constant 0 : index
      %c0_72 = arith.constant 0 : index
      %c0_73 = arith.constant 0 : index
      %139 = vector.load %arg19[%c0_71, %c0_72, %c0_73] : memref<4x8x8xbf16, #tpu.memory_space<vmem>>, vector<4x8x8xbf16>
      tpu.vector_store %arg19[%c0_71, %c0_72, %c0_73], %138 {strides = array<i32>} : memref<4x8x8xbf16, #tpu.memory_space<vmem>>, vector<4x8x8xbf16>,
    } else {
    }
    %c8_i32 = arith.constant 8 : i32
    %3 = arith.muli %arg1, %c8_i32 : i32
    %4 = tpu.assume_multiple %3, 8 : i32
    %c0 = arith.constant 0 : index
    %5 = arith.index_cast %4 : i32 to index
    %c0_1 = arith.constant 0 : index
    %6 = vector.load %arg17[%c0, %5, %c0_1] : memref<4x8x8xbf16, #tpu.memory_space<vmem>>, vector<4x8x8xbf16>
    %c0_2 = arith.constant 0 : index
    %c0_3 = arith.constant 0 : index
    %c0_4 = arith.constant 0 : index
    %7 = vector.load %arg18[%c0_2, %c0_3, %c0_4] : memref<4x8x8xbf16, #tpu.memory_space<vmem>>, vector<4x8x8xbf16>
    %c0_5 = arith.constant 0 : index
    %c0_6 = arith.constant 0 : index
    %c0_7 = arith.constant 0 : index
    %8 = vector.load %arg19[%c0_5, %c0_6, %c0_7] : memref<4x8x8xbf16, #tpu.memory_space<vmem>>, vector<4x8x8xbf16>
    "tpu.trace_start"() <{level = 10 : i32, message = "hqd,hkd->hqk"}> : () -> ()
    %cst = arith.constant dense<0.000000e+00> : vector<4x8x8xf32>
    %9 = tpu.matmul %6, %7, %cst {dimension_numbers = #tpu.dot_dimension_numbers<[2], [2], [1], [1], [0, 0, 0, 1, 1, 1], [0], [0]>} : vector<4x8x8xbf16>, vector<4x8x8xbf16>, vector<4x8x8xf32> -> vector<4x8x8xf32>
    "tpu.trace_stop"() : () -> ()
    %c0_8 = arith.constant 0 : index
    %c0_9 = arith.constant 0 : index
    %c0_10 = arith.constant 0 : index
    %10 = vector.load %arg3[%c0_8, %c0_9, %c0_10] : memref<1x1x8xi8, #tpu.memory_space<vmem>>, vector<1x1x8xi8>
    %11 = vector.shape_cast %10 : vector<1x1x8xi8> to vector<1x8xi8>
    %c0_i8 = arith.constant 0 : i8
    %12 = vector.broadcast %c0_i8 : i8 to vector<1x8xi8>
    %13 = arith.cmpi ne, %11, %12 : vector<1x8xi8>
    %14 = vector.shape_cast %13 : vector<1x8xi1> to vector<1x1x8xi1>
    %cst_11 = arith.constant -6.550400e+04 : f32
    %15 = vector.shape_cast %14 : vector<1x1x8xi1> to vector<1x1x8xi1>
    %16 = vector.broadcast %15 : vector<1x1x8xi1> to vector<4x8x8xi1>
    %17 = vector.broadcast %cst_11 : f32 to vector<4x8x8xf32>
    %18 = arith.select %16, %9, %17 : vector<4x8x8xi1>, vector<4x8x8xf32>
    %cst_12 = arith.constant dense<0xFF800000> : vector<4x8xf32>
    %19 = vector.multi_reduction <maximumf>, %18, %cst_12 [2] : vector<4x8x8xf32> to vector<4x8xf32>
    %20 = vector.shape_cast %19 : vector<4x8xf32> to vector<4x8x1xf32>
    %21 = vector.broadcast %20 : vector<4x8x1xf32> to vector<4x8x8xf32>
    %22 = arith.subf %18, %21 : vector<4x8x8xf32>
    %23 = math.exp %22 : vector<4x8x8xf32>
    %cst_13 = arith.constant dense<0.000000e+00> : vector<4x8xf32>
    %24 = vector.multi_reduction <add>, %23, %cst_13 [2] : vector<4x8x8xf32> to vector<4x8xf32>
    %25 = vector.shape_cast %24 : vector<4x8xf32> to vector<4x8x1xf32>
    %26 = tpu.reciprocal %25 {approx = true} : vector<4x8x1xf32> -> vector<4x8x1xf32>
    %27 = vector.broadcast %26 : vector<4x8x1xf32> to vector<4x8x8xf32>
    %28 = arith.mulf %23, %27 : vector<4x8x8xf32>
    %29 = arith.truncf %28 : vector<4x8x8xf32> to vector<4x8x8xbf16>
    "tpu.trace_start"() <{level = 10 : i32, message = "hqk,hkd->hqd"}> : () -> ()
    %cst_14 = arith.constant dense<0.000000e+00> : vector<4x8x8xf32>
    %30 = tpu.matmul %29, %8, %cst_14 {dimension_numbers = #tpu.dot_dimension_numbers<[2], [1], [1], [2], [0, 0, 0, 1, 1, 2], [0], [0]>} : vector<4x8x8xbf16>, vector<4x8x8xbf16>, vector<4x8x8xf32> -> vector<4x8x8xf32>
    "tpu.trace_stop"() : () -> ()
    %31 = arith.truncf %30 : vector<4x8x8xf32> to vector<4x8x8xbf16>
    %32 = tpu.transpose %31, [1, 0, 2] : vector<4x8x8xbf16> -> vector<8x4x8xbf16>
    %33 = vector.shape_cast %32 : vector<8x4x8xbf16> to vector<8x32xbf16>
    %c0_15 = arith.constant 0 : index
    %c0_16 = arith.constant 0 : index
    %34 = vector.load %arg6[%c0_15, %c0_16] : memref<32x32xbf16, #tpu.memory_space<vmem>>, vector<32x32xbf16>
    %cst_17 = arith.constant dense<0.000000e+00> : vector<8x32xf32>
    %35 = tpu.matmul %33, %34, %cst_17 {dimension_numbers = #tpu.dot_dimension_numbers<[1], [0], [0], [1], [0, 0, 1, 1], [], []>} : vector<8x32xbf16>, vector<32x32xbf16>, vector<8x32xf32> -> vector<8x32xf32>
    %c0_18 = arith.constant 0 : index
    %c0_19 = arith.constant 0 : index
    %36 = vector.load %arg7[%c0_18, %c0_19] : memref<1x32xf32, #tpu.memory_space<vmem>>, vector<1x32xf32>
    %37 = vector.broadcast %36 : vector<1x32xf32> to vector<8x32xf32>
    %38 = arith.addf %35, %37 : vector<8x32xf32>
    %c0_20 = arith.constant 0 : index
    %39 = arith.index_cast %4 : i32 to index
    %c0_21 = arith.constant 0 : index
    %40 = vector.load %arg2[%c0_20, %39, %c0_21] : memref<1x8x32xf32, #tpu.memory_space<vmem>>, vector<1x8x32xf32>
    %41 = vector.shape_cast %40 : vector<1x8x32xf32> to vector<8x32xf32>
    %42 = arith.addf %41, %38 : vector<8x32xf32>
    %c0_22 = arith.constant 0 : index
    %c0_23 = arith.constant 0 : index
    %43 = vector.load %arg8[%c0_22, %c0_23] : memref<1x32xf32, #tpu.memory_space<vmem>>, vector<1x32xf32>
    %c0_24 = arith.constant 0 : index
    %c0_25 = arith.constant 0 : index
    %44 = vector.load %arg9[%c0_24, %c0_25] : memref<1x32xf32, #tpu.memory_space<vmem>>, vector<1x32xf32>
    %cst_26 = arith.constant dense<0.000000e+00> : vector<8xf32>
    %45 = vector.multi_reduction <add>, %42, %cst_26 [1] : vector<8x32xf32> to vector<8xf32>
    %46 = vector.shape_cast %45 : vector<8xf32> to vector<8x1xf32>
    %cst_27 = arith.constant 3.200000e+01 : f32
    %47 = vector.broadcast %cst_27 : f32 to vector<8x1xf32>
    %48 = arith.divf %46, %47 : vector<8x1xf32>
    %49 = vector.broadcast %48 : vector<8x1xf32> to vector<8x32xf32>
    %50 = arith.subf %42, %49 : vector<8x32xf32>
    %51 = arith.mulf %50, %50 : vector<8x32xf32>
    %cst_28 = arith.constant dense<0.000000e+00> : vector<8xf32>
    %52 = vector.multi_reduction <add>, %51, %cst_28 [1] : vector<8x32xf32> to vector<8xf32>
    %53 = vector.shape_cast %52 : vector<8xf32> to vector<8x1xf32>
    %cst_29 = arith.constant 3.200000e+01 : f32
    %54 = vector.broadcast %cst_29 : f32 to vector<8x1xf32>
    %55 = arith.divf %53, %54 : vector<8x1xf32>
    %56 = vector.broadcast %48 : vector<8x1xf32> to vector<8x32xf32>
    %57 = arith.subf %42, %56 : vector<8x32xf32>
    %cst_30 = arith.constant 9.99999974E-6 : f32
    %58 = vector.broadcast %cst_30 : f32 to vector<8x1xf32>
    %59 = arith.addf %55, %58 : vector<8x1xf32>
    %60 = math.rsqrt %59 : vector<8x1xf32>
    %61 = vector.broadcast %60 : vector<8x1xf32> to vector<8x32xf32>
    %62 = arith.mulf %57, %61 : vector<8x32xf32>
    %63 = vector.broadcast %43 : vector<1x32xf32> to vector<8x32xf32>
    %64 = arith.mulf %62, %63 : vector<8x32xf32>
    %65 = vector.broadcast %44 : vector<1x32xf32> to vector<8x32xf32>
    %66 = arith.addf %64, %65 : vector<8x32xf32>
    %67 = arith.truncf %66 : vector<8x32xf32> to vector<8x32xbf16>
    %c0_31 = arith.constant 0 : index
    %c0_32 = arith.constant 0 : index
    %68 = vector.load %arg10[%c0_31, %c0_32] : memref<32x128xbf16, #tpu.memory_space<vmem>>, vector<32x128xbf16>
    %cst_33 = arith.constant dense<0.000000e+00> : vector<8x128xf32>
    %69 = tpu.matmul %67, %68, %cst_33 {dimension_numbers = #tpu.dot_dimension_numbers<[1], [0], [0], [1], [0, 0, 1, 1], [], []>} : vector<8x32xbf16>, vector<32x128xbf16>, vector<8x128xf32> -> vector<8x128xf32>
    %c0_34 = arith.constant 0 : index
    %c0_35 = arith.constant 0 : index
    %70 = vector.load %arg11[%c0_34, %c0_35] : memref<1x128xf32, #tpu.memory_space<vmem>>, vector<1x128xf32>
    %71 = vector.broadcast %70 : vector<1x128xf32> to vector<8x128xf32>
    %72 = arith.addf %69, %71 : vector<8x128xf32>
    %cst_36 = arith.constant 5.000000e-01 : f32
    %73 = vector.broadcast %cst_36 : f32 to vector<8x128xf32>
    %74 = arith.mulf %73, %72 : vector<8x128xf32>
    %cst_37 = arith.constant 4.471500e-02 : f32
    %75 = vector.broadcast %cst_37 : f32 to vector<8x128xf32>
    %76 = arith.mulf %75, %72 : vector<8x128xf32>
    %77 = arith.mulf %76, %72 : vector<8x128xf32>
    %78 = arith.mulf %77, %72 : vector<8x128xf32>
    %79 = arith.addf %72, %78 : vector<8x128xf32>
    %cst_38 = arith.constant 0.797884583 : f32
    %80 = vector.broadcast %cst_38 : f32 to vector<8x128xf32>
    %81 = arith.mulf %80, %79 : vector<8x128xf32>
    %82 = math.tanh %81 : vector<8x128xf32>
    %cst_39 = arith.constant 1.000000e+00 : f32
    %83 = vector.broadcast %cst_39 : f32 to vector<8x128xf32>
    %84 = arith.addf %83, %82 : vector<8x128xf32>
    %85 = arith.mulf %74, %84 : vector<8x128xf32>
    %86 = arith.truncf %85 : vector<8x128xf32> to vector<8x128xbf16>
    %c0_40 = arith.constant 0 : index
    %c0_41 = arith.constant 0 : index
    %87 = vector.load %arg12[%c0_40, %c0_41] : memref<128x32xbf16, #tpu.memory_space<vmem>>, vector<128x32xbf16>
    %cst_42 = arith.constant dense<0.000000e+00> : vector<8x32xf32>
    %88 = tpu.matmul %86, %87, %cst_42 {dimension_numbers = #tpu.dot_dimension_numbers<[1], [0], [0], [1], [0, 0, 1, 1], [], []>} : vector<8x128xbf16>, vector<128x32xbf16>, vector<8x32xf32> -> vector<8x32xf32>
    %c0_43 = arith.constant 0 : index
    %c0_44 = arith.constant 0 : index
    %89 = vector.load %arg13[%c0_43, %c0_44] : memref<1x32xf32, #tpu.memory_space<vmem>>, vector<1x32xf32>
    %90 = vector.broadcast %89 : vector<1x32xf32> to vector<8x32xf32>
    %91 = arith.addf %88, %90 : vector<8x32xf32>
    %c0_45 = arith.constant 0 : index
    %c0_46 = arith.constant 0 : index
    %92 = vector.load %arg14[%c0_45, %c0_46] : memref<1x32xf32, #tpu.memory_space<vmem>>, vector<1x32xf32>
    %c0_47 = arith.constant 0 : index
    %c0_48 = arith.constant 0 : index
    %93 = vector.load %arg15[%c0_47, %c0_48] : memref<1x32xf32, #tpu.memory_space<vmem>>, vector<1x32xf32>
    %cst_49 = arith.constant dense<0.000000e+00> : vector<8xf32>
    %94 = vector.multi_reduction <add>, %91, %cst_49 [1] : vector<8x32xf32> to vector<8xf32>
    %95 = vector.shape_cast %94 : vector<8xf32> to vector<8x1xf32>
    %cst_50 = arith.constant 3.200000e+01 : f32
    %96 = vector.broadcast %cst_50 : f32 to vector<8x1xf32>
    %97 = arith.divf %95, %96 : vector<8x1xf32>
    %98 = vector.broadcast %97 : vector<8x1xf32> to vector<8x32xf32>
    %99 = arith.subf %91, %98 : vector<8x32xf32>
    %100 = arith.mulf %99, %99 : vector<8x32xf32>
    %cst_51 = arith.constant dense<0.000000e+00> : vector<8xf32>
    %101 = vector.multi_reduction <add>, %100, %cst_51 [1] : vector<8x32xf32> to vector<8xf32>
    %102 = vector.shape_cast %101 : vector<8xf32> to vector<8x1xf32>
    %cst_52 = arith.constant 3.200000e+01 : f32
    %103 = vector.broadcast %cst_52 : f32 to vector<8x1xf32>
    %104 = arith.divf %102, %103 : vector<8x1xf32>
    %105 = vector.broadcast %97 : vector<8x1xf32> to vector<8x32xf32>
    %106 = arith.subf %91, %105 : vector<8x32xf32>
    %cst_53 = arith.constant 2.500000e-06 : f32
    %107 = vector.broadcast %cst_53 : f32 to vector<8x1xf32>
    %108 = arith.addf %104, %107 : vector<8x1xf32>
    %109 = math.rsqrt %108 : vector<8x1xf32>
    %110 = vector.broadcast %109 : vector<8x1xf32> to vector<8x32xf32>
    %111 = arith.mulf %106, %110 : vector<8x32xf32>
    %112 = vector.broadcast %92 : vector<1x32xf32> to vector<8x32xf32>
    %113 = arith.mulf %111, %112 : vector<8x32xf32>
    %114 = vector.broadcast %93 : vector<1x32xf32> to vector<8x32xf32>
    %115 = arith.addf %113, %114 : vector<8x32xf32>
    %c0_54 = arith.constant 0 : index
    %c0_55 = arith.constant 0 : index
    %c0_56 = arith.constant 0 : index
    %116 = vector.load %arg16[%c0_54, %c0_55, %c0_56] : memref<1x8x32xf32, #tpu.memory_space<vmem>>, vector<1x8x32xf32>
    %117 = vector.shape_cast %116 : vector<1x8x32xf32> to vector<8x32xf32>
    %118 = vector.shape_cast %115 : vector<8x32xf32> to vector<1x8x32xf32>
    tpu.vector_store %arg16[%c0_54, %c0_55, %c0_56], %118 {strides = array<i32>} : memref<1x8x32xf32, #tpu.memory_space<vmem>>, vector<1x8x32xf32>,
    return
  }
  func.func @transform_0(%arg0: i32, %arg1: i32) -> (i32, i32, i32) {
    %c0_i32 = arith.constant 0 : i32
    %c0_i32_0 = arith.constant 0 : i32
    %c0_i32_1 = arith.constant 0 : i32
    return %arg0, %c0_i32, %c0_i32_0 : i32, i32, i32
  }
  func.func @transform_1(%arg0: i32, %arg1: i32) -> (i32, i32, i32) {
    %c0_i32 = arith.constant 0 : i32
    %c0_i32_0 = arith.constant 0 : i32
    %c0_i32_1 = arith.constant 0 : i32
    return %arg0, %c0_i32, %c0_i32_0 : i32, i32, i32
  }
  func.func @transform_2(%arg0: i32, %arg1: i32) -> (i32, i32) {
    %c0_i32 = arith.constant 0 : i32
    %c0_i32_0 = arith.constant 0 : i32
    %c0_i32_1 = arith.constant 0 : i32
    return %c0_i32, %c0_i32_0 : i32, i32
  }
  func.func @transform_3(%arg0: i32, %arg1: i32) -> (i32, i32) {
    %c0_i32 = arith.constant 0 : i32
    %c0_i32_0 = arith.constant 0 : i32
    %c0_i32_1 = arith.constant 0 : i32
    return %c0_i32, %c0_i32_0 : i32, i32
  }
  func.func @transform_4(%arg0: i32, %arg1: i32) -> (i32, i32) {
    %c0_i32 = arith.constant 0 : i32
    %c0_i32_0 = arith.constant 0 : i32
    %c0_i32_1 = arith.constant 0 : i32
    return %c0_i32, %c0_i32_0 : i32, i32
  }
  func.func @transform_5(%arg0: i32, %arg1: i32) -> (i32, i32) {
    %c0_i32 = arith.constant 0 : i32
    %c0_i32_0 = arith.constant 0 : i32
    %c0_i32_1 = arith.constant 0 : i32
    return %c0_i32, %c0_i32_0 : i32, i32
  }
  func.func @transform_6(%arg0: i32, %arg1: i32) -> (i32, i32) {
    %c0_i32 = arith.constant 0 : i32
    %c0_i32_0 = arith.constant 0 : i32
    %c0_i32_1 = arith.constant 0 : i32
    return %c0_i32, %c0_i32_0 : i32, i32
  }
  func.func @transform_7(%arg0: i32, %arg1: i32) -> (i32, i32) {
    %c0_i32 = arith.constant 0 : i32
    %c0_i32_0 = arith.constant 0 : i32
    %c0_i32_1 = arith.constant 0 : i32
    return %c0_i32, %c0_i32_0 : i32, i32
  }
  func.func @transform_8(%arg0: i32, %arg1: i32) -> (i32, i32) {
    %c0_i32 = arith.constant 0 : i32
    %c0_i32_0 = arith.constant 0 : i32
    %c0_i32_1 = arith.constant 0 : i32
    return %c0_i32, %c0_i32_0 : i32, i32
  }
  func.func @transform_9(%arg0: i32, %arg1: i32) -> (i32, i32) {
    %c0_i32 = arith.constant 0 : i32
    %c0_i32_0 = arith.constant 0 : i32
    %c0_i32_1 = arith.constant 0 : i32
    return %c0_i32, %c0_i32_0 : i32, i32
  }
  func.func @transform_10(%arg0: i32, %arg1: i32) -> (i32, i32) {
    %c0_i32 = arith.constant 0 : i32
    %c0_i32_0 = arith.constant 0 : i32
    %c0_i32_1 = arith.constant 0 : i32
    return %c0_i32, %c0_i32_0 : i32, i32
  }
  func.func @transform_11(%arg0: i32, %arg1: i32) -> (i32, i32) {
    %c0_i32 = arith.constant 0 : i32
    %c0_i32_0 = arith.constant 0 : i32
    %c0_i32_1 = arith.constant 0 : i32
    return %c0_i32, %c0_i32_0 : i32, i32
  }
  func.func @transform_12(%arg0: i32, %arg1: i32) -> (i32, i32) {
    %c0_i32 = arith.constant 0 : i32
    %c0_i32_0 = arith.constant 0 : i32
    %c0_i32_1 = arith.constant 0 : i32
    return %c0_i32, %c0_i32_0 : i32, i32
  }
  func.func @transform_13(%arg0: i32, %arg1: i32) -> (i32, i32) {
    %c0_i32 = arith.constant 0 : i32
    %c0_i32_0 = arith.constant 0 : i32
    %c0_i32_1 = arith.constant 0 : i32
    return %c0_i32, %c0_i32_0 : i32, i32
  }
  func.func @transform_14(%arg0: i32, %arg1: i32) -> (i32, i32, i32) {
    %c0_i32 = arith.constant 0 : i32
    %c0_i32_0 = arith.constant 0 : i32
    return %arg0, %arg1, %c0_i32 : i32, i32, i32
  }
}

module attributes {stable_mosaic.version = 11 : i64} {
  func.func @_transformer_block_kernel(%arg0: i32, %arg1: i32, %arg2: memref<1x8x32xf32, #tpu.memory_space<vmem>>, %arg3: memref<1x1x8xi8, #tpu.memory_space<vmem>>, %arg4: memref<32x96xbf16, #tpu.memory_space<vmem>>, %arg5: memref<1x96xf32, #tpu.memory_space<vmem>>, %arg6: memref<32x32xbf16, #tpu.memory_space<vmem>>, %arg7: memref<1x32xf32, #tpu.memory_space<vmem>>, %arg8: memref<1x32xf32, #tpu.memory_space<vmem>>, %arg9: memref<1x32xf32, #tpu.memory_space<vmem>>, %arg10: memref<32x128xbf16, #tpu.memory_space<vmem>>, %arg11: memref<1x128xf32, #tpu.memory_space<vmem>>, %arg12: memref<128x32xbf16, #tpu.memory_space<vmem>>, %arg13: memref<1x32xf32, #tpu.memory_space<vmem>>, %arg14: memref<1x32xf32, #tpu.memory_space<vmem>>, %arg15: memref<1x32xf32, #tpu.memory_space<vmem>>, %arg16: memref<1x8x32xf32, #tpu.memory_space<vmem>>, %arg17: memref<4x8x8xbf16, #tpu.memory_space<vmem>>, %arg18: memref<4x8x8xbf16, #tpu.memory_space<vmem>>, %arg19: memref<4x8x8xbf16, #tpu.memory_space<vmem>>) attributes {dimension_semantics = [#tpu.dimension_semantics<parallel>, #tpu.dimension_semantics<arbitrary>], iteration_bounds = array<i64: 2, 1>, scalar_prefetch = 0 : i64, scratch_operands = 3 : i64, tpu.core_type = #tpu.core_type<tc>, window_params = [{transform_indices = @transform_0, window_bounds = array<i64: 1, 8, 32>}, {transform_indices = @transform_1, window_bounds = array<i64: 1, 1, 8>}, {pipeline_mode = #tpu.pipeline_mode<synchronous>, transform_indices = @transform_2, window_bounds = array<i64: 32, 96>}, {pipeline_mode = #tpu.pipeline_mode<synchronous>, transform_indices = @transform_3, window_bounds = array<i64: 1, 96>}, {pipeline_mode = #tpu.pipeline_mode<synchronous>, transform_indices = @transform_4, window_bounds = array<i64: 32, 32>}, {pipeline_mode = #tpu.pipeline_mode<synchronous>, transform_indices = @transform_5, window_bounds = array<i64: 1, 32>}, {pipeline_mode = #tpu.pipeline_mode<synchronous>, transform_indices = @transform_6, window_bounds = array<i64: 1, 32>}, {pipeline_mode = #tpu.pipeline_mode<synchronous>, transform_indices = @transform_7, window_bounds = array<i64: 1, 32>}, {pipeline_mode = #tpu.pipeline_mode<synchronous>, transform_indices = @transform_8, window_bounds = array<i64: 32, 128>}, {pipeline_mode = #tpu.pipeline_mode<synchronous>, transform_indices = @transform_9, window_bounds = array<i64: 1, 128>}, {pipeline_mode = #tpu.pipeline_mode<synchronous>, transform_indices = @transform_10, window_bounds = array<i64: 128, 32>}, {pipeline_mode = #tpu.pipeline_mode<synchronous>, transform_indices = @transform_11, window_bounds = array<i64: 1, 32>}, {pipeline_mode = #tpu.pipeline_mode<synchronous>, transform_indices = @transform_12, window_bounds = array<i64: 1, 32>}, {pipeline_mode = #tpu.pipeline_mode<synchronous>, transform_indices = @transform_13, window_bounds = array<i64: 1, 32>}, {transform_indices = @transform_14, window_bounds = array<i64: 1, 8, 32>}]} {
    %c0_i32 = arith.constant 0 : i32
    %0 = arith.cmpi eq, %arg1, %c0_i32 : i32
    %1 = arith.extui %0 : i1 to i32
    %c0_i32_0 = arith.constant 0 : i32
    %2 = arith.cmpi ne, %1, %c0_i32_0 : i32
    scf.if %2 {
      %c0_57 = arith.constant 0 : index
      %c0_58 = arith.constant 0 : index
      %c0_59 = arith.constant 0 : index
      %126 = vector.load %arg2[%c0_57, %c0_58, %c0_59] : memref<1x8x32xf32, #tpu.memory_space<vmem>>, vector<1x8x32xf32>
      %127 = vector.shape_cast %126 : vector<1x8x32xf32> to vector<8x32xf32>
      %128 = arith.truncf %127 : vector<8x32xf32> to vector<8x32xbf16>
      %c0_60 = arith.constant 0 : index
      %c0_61 = arith.constant 0 : index
      %129 = vector.load %arg4[%c0_60, %c0_61] : memref<32x96xbf16, #tpu.memory_space<vmem>>, vector<32x96xbf16>
      %cst_62 = arith.constant dense<0.000000e+00> : vector<8x96xf32>
      %130 = tpu.matmul %128, %129, %cst_62 {dimension_numbers = #tpu.dot_dimension_numbers<[1], [0], [0], [1], [0, 0, 1, 1], [], []>} : vector<8x32xbf16>, vector<32x96xbf16>, vector<8x96xf32> -> vector<8x96xf32>
      %c0_63 = arith.constant 0 : index
      %c0_64 = arith.constant 0 : index
      %131 = vector.load %arg5[%c0_63, %c0_64] : memref<1x96xf32, #tpu.memory_space<vmem>>, vector<1x96xf32>
      %132 = vector.broadcast %131 : vector<1x96xf32> to vector<8x96xf32>
      %133 = arith.addf %130, %132 : vector<8x96xf32>
      %134 = arith.truncf %133 : vector<8x96xf32> to vector<8x96xbf16>
      %135 = vector.extract_strided_slice %134 {offsets = [0, 0], sizes = [8, 32], strides = [1, 1]} : vector<8x96xbf16> to vector<8x32xbf16>
      %136 = vector.extract_strided_slice %135 {offsets = [0, 0], sizes = [8, 8], strides = [1, 1]} : vector<8x32xbf16> to vector<8x8xbf16>
      %137 = vector.extract_strided_slice %135 {offsets = [0, 8], sizes = [8, 8], strides = [1, 1]} : vector<8x32xbf16> to vector<8x8xbf16>
      %138 = vector.extract_strided_slice %135 {offsets = [0, 16], sizes = [8, 8], strides = [1, 1]} : vector<8x32xbf16> to vector<8x8xbf16>
      %139 = vector.extract_strided_slice %135 {offsets = [0, 24], sizes = [8, 8], strides = [1, 1]} : vector<8x32xbf16> to vector<8x8xbf16>
      %140 = vector.shape_cast %136 : vector<8x8xbf16> to vector<1x8x8xbf16>
      %141 = vector.shape_cast %137 : vector<8x8xbf16> to vector<1x8x8xbf16>
      %142 = vector.shape_cast %138 : vector<8x8xbf16> to vector<1x8x8xbf16>
      %143 = vector.shape_cast %139 : vector<8x8xbf16> to vector<1x8x8xbf16>
      %144 = tpu.concatenate %140, %141, %142, %143 in 0 : vector<1x8x8xbf16>, vector<1x8x8xbf16>, vector<1x8x8xbf16>, vector<1x8x8xbf16> -> vector<4x8x8xbf16>
      %c0_65 = arith.constant 0 : index
      %c0_66 = arith.constant 0 : index
      %c0_67 = arith.constant 0 : index
      %145 = vector.load %arg17[%c0_65, %c0_66, %c0_67] : memref<4x8x8xbf16, #tpu.memory_space<vmem>>, vector<4x8x8xbf16>
      tpu.vector_store %arg17[%c0_65, %c0_66, %c0_67], %144 {strides = array<i32>} : memref<4x8x8xbf16, #tpu.memory_space<vmem>>, vector<4x8x8xbf16>,
      %146 = vector.extract_strided_slice %134 {offsets = [0, 32], sizes = [8, 32], strides = [1, 1]} : vector<8x96xbf16> to vector<8x32xbf16>
      %147 = vector.extract_strided_slice %146 {offsets = [0, 0], sizes = [8, 8], strides = [1, 1]} : vector<8x32xbf16> to vector<8x8xbf16>
      %148 = vector.extract_strided_slice %146 {offsets = [0, 8], sizes = [8, 8], strides = [1, 1]} : vector<8x32xbf16> to vector<8x8xbf16>
      %149 = vector.extract_strided_slice %146 {offsets = [0, 16], sizes = [8, 8], strides = [1, 1]} : vector<8x32xbf16> to vector<8x8xbf16>
      %150 = vector.extract_strided_slice %146 {offsets = [0, 24], sizes = [8, 8], strides = [1, 1]} : vector<8x32xbf16> to vector<8x8xbf16>
      %151 = vector.shape_cast %147 : vector<8x8xbf16> to vector<1x8x8xbf16>
      %152 = vector.shape_cast %148 : vector<8x8xbf16> to vector<1x8x8xbf16>
      %153 = vector.shape_cast %149 : vector<8x8xbf16> to vector<1x8x8xbf16>
      %154 = vector.shape_cast %150 : vector<8x8xbf16> to vector<1x8x8xbf16>
      %155 = tpu.concatenate %151, %152, %153, %154 in 0 : vector<1x8x8xbf16>, vector<1x8x8xbf16>, vector<1x8x8xbf16>, vector<1x8x8xbf16> -> vector<4x8x8xbf16>
      %c0_68 = arith.constant 0 : index
      %c0_69 = arith.constant 0 : index
      %c0_70 = arith.constant 0 : index
      %156 = vector.load %arg18[%c0_68, %c0_69, %c0_70] : memref<4x8x8xbf16, #tpu.memory_space<vmem>>, vector<4x8x8xbf16>
      tpu.vector_store %arg18[%c0_68, %c0_69, %c0_70], %155 {strides = array<i32>} : memref<4x8x8xbf16, #tpu.memory_space<vmem>>, vector<4x8x8xbf16>,
      %157 = vector.extract_strided_slice %134 {offsets = [0, 64], sizes = [8, 32], strides = [1, 1]} : vector<8x96xbf16> to vector<8x32xbf16>
      %158 = vector.extract_strided_slice %157 {offsets = [0, 0], sizes = [8, 8], strides = [1, 1]} : vector<8x32xbf16> to vector<8x8xbf16>
      %159 = vector.extract_strided_slice %157 {offsets = [0, 8], sizes = [8, 8], strides = [1, 1]} : vector<8x32xbf16> to vector<8x8xbf16>
      %160 = vector.extract_strided_slice %157 {offsets = [0, 16], sizes = [8, 8], strides = [1, 1]} : vector<8x32xbf16> to vector<8x8xbf16>
      %161 = vector.extract_strided_slice %157 {offsets = [0, 24], sizes = [8, 8], strides = [1, 1]} : vector<8x32xbf16> to vector<8x8xbf16>
      %162 = vector.shape_cast %158 : vector<8x8xbf16> to vector<1x8x8xbf16>
      %163 = vector.shape_cast %159 : vector<8x8xbf16> to vector<1x8x8xbf16>
      %164 = vector.shape_cast %160 : vector<8x8xbf16> to vector<1x8x8xbf16>
      %165 = vector.shape_cast %161 : vector<8x8xbf16> to vector<1x8x8xbf16>
      %166 = tpu.concatenate %162, %163, %164, %165 in 0 : vector<1x8x8xbf16>, vector<1x8x8xbf16>, vector<1x8x8xbf16>, vector<1x8x8xbf16> -> vector<4x8x8xbf16>
      %c0_71 = arith.constant 0 : index
      %c0_72 = arith.constant 0 : index
      %c0_73 = arith.constant 0 : index
      %167 = vector.load %arg19[%c0_71, %c0_72, %c0_73] : memref<4x8x8xbf16, #tpu.memory_space<vmem>>, vector<4x8x8xbf16>
      tpu.vector_store %arg19[%c0_71, %c0_72, %c0_73], %166 {strides = array<i32>} : memref<4x8x8xbf16, #tpu.memory_space<vmem>>, vector<4x8x8xbf16>,
    } else {
    }
    %c8_i32 = arith.constant 8 : i32
    %3 = arith.muli %arg1, %c8_i32 : i32
    %4 = tpu.assume_multiple %3, 8 : i32
    %c0 = arith.constant 0 : index
    %5 = arith.index_cast %4 : i32 to index
    %c0_1 = arith.constant 0 : index
    %6 = vector.load %arg17[%c0, %5, %c0_1] : memref<4x8x8xbf16, #tpu.memory_space<vmem>>, vector<4x8x8xbf16>
    %c0_2 = arith.constant 0 : index
    %c0_3 = arith.constant 0 : index
    %c0_4 = arith.constant 0 : index
    %7 = vector.load %arg18[%c0_2, %c0_3, %c0_4] : memref<4x8x8xbf16, #tpu.memory_space<vmem>>, vector<4x8x8xbf16>
    %c0_5 = arith.constant 0 : index
    %c0_6 = arith.constant 0 : index
    %c0_7 = arith.constant 0 : index
    %8 = vector.load %arg19[%c0_5, %c0_6, %c0_7] : memref<4x8x8xbf16, #tpu.memory_space<vmem>>, vector<4x8x8xbf16>
    "tpu.trace_start"() <{level = 10 : i32, message = "hqd,hkd->hqk"}> : () -> ()
    %cst = arith.constant dense<0.000000e+00> : vector<4x8x8xf32>
    %9 = tpu.matmul %6, %7, %cst {dimension_numbers = #tpu.dot_dimension_numbers<[2], [2], [1], [1], [0, 0, 0, 1, 1, 1], [0], [0]>} : vector<4x8x8xbf16>, vector<4x8x8xbf16>, vector<4x8x8xf32> -> vector<4x8x8xf32>
    "tpu.trace_stop"() : () -> ()
    %c0_8 = arith.constant 0 : index
    %c0_9 = arith.constant 0 : index
    %c0_10 = arith.constant 0 : index
    %10 = vector.load %arg3[%c0_8, %c0_9, %c0_10] : memref<1x1x8xi8, #tpu.memory_space<vmem>>, vector<1x1x8xi8>
    %11 = vector.shape_cast %10 : vector<1x1x8xi8> to vector<1x8xi8>
    %c0_i8 = arith.constant 0 : i8
    %12 = vector.broadcast %c0_i8 : i8 to vector<1x8xi8>
    %13 = arith.cmpi ne, %11, %12 : vector<1x8xi8>
    %14 = vector.shape_cast %13 : vector<1x8xi1> to vector<1x1x8xi1>
    %cst_11 = arith.constant -6.550400e+04 : f32
    %15 = vector.shape_cast %14 : vector<1x1x8xi1> to vector<1x1x8xi1>
    %16 = vector.broadcast %15 : vector<1x1x8xi1> to vector<4x8x8xi1>
    %17 = vector.broadcast %cst_11 : f32 to vector<4x8x8xf32>
    %18 = arith.select %16, %9, %17 : vector<4x8x8xi1>, vector<4x8x8xf32>
    %cst_12 = arith.constant dense<0xFF800000> : vector<4x8xf32>
    %19 = vector.multi_reduction <maximumf>, %18, %cst_12 [2] : vector<4x8x8xf32> to vector<4x8xf32>
    %20 = vector.shape_cast %19 : vector<4x8xf32> to vector<4x8x1xf32>
    %21 = vector.broadcast %20 : vector<4x8x1xf32> to vector<4x8x8xf32>
    %22 = arith.subf %18, %21 : vector<4x8x8xf32>
    %23 = math.exp %22 : vector<4x8x8xf32>
    %cst_13 = arith.constant dense<0.000000e+00> : vector<4x8xf32>
    %24 = vector.multi_reduction <add>, %23, %cst_13 [2] : vector<4x8x8xf32> to vector<4x8xf32>
    %25 = vector.shape_cast %24 : vector<4x8xf32> to vector<4x8x1xf32>
    %26 = tpu.reciprocal %25 {approx = true} : vector<4x8x1xf32> -> vector<4x8x1xf32>
    %27 = vector.broadcast %26 : vector<4x8x1xf32> to vector<4x8x8xf32>
    %28 = arith.mulf %23, %27 : vector<4x8x8xf32>
    %29 = arith.truncf %28 : vector<4x8x8xf32> to vector<4x8x8xbf16>
    "tpu.trace_start"() <{level = 10 : i32, message = "hqk,hkd->hqd"}> : () -> ()
    %cst_14 = arith.constant dense<0.000000e+00> : vector<4x8x8xf32>
    %30 = tpu.matmul %29, %8, %cst_14 {dimension_numbers = #tpu.dot_dimension_numbers<[2], [1], [1], [2], [0, 0, 0, 1, 1, 2], [0], [0]>} : vector<4x8x8xbf16>, vector<4x8x8xbf16>, vector<4x8x8xf32> -> vector<4x8x8xf32>
    "tpu.trace_stop"() : () -> ()
    %31 = arith.truncf %30 : vector<4x8x8xf32> to vector<4x8x8xbf16>
    %32 = vector.extract_strided_slice %31 {offsets = [0, 0, 0], sizes = [1, 8, 8], strides = [1, 1, 1]} : vector<4x8x8xbf16> to vector<1x8x8xbf16>
    %33 = vector.shape_cast %32 : vector<1x8x8xbf16> to vector<8x8xbf16>
    %34 = vector.extract_strided_slice %31 {offsets = [1, 0, 0], sizes = [1, 8, 8], strides = [1, 1, 1]} : vector<4x8x8xbf16> to vector<1x8x8xbf16>
    %35 = vector.shape_cast %34 : vector<1x8x8xbf16> to vector<8x8xbf16>
    %36 = vector.extract_strided_slice %31 {offsets = [2, 0, 0], sizes = [1, 8, 8], strides = [1, 1, 1]} : vector<4x8x8xbf16> to vector<1x8x8xbf16>
    %37 = vector.shape_cast %36 : vector<1x8x8xbf16> to vector<8x8xbf16>
    %38 = vector.extract_strided_slice %31 {offsets = [3, 0, 0], sizes = [1, 8, 8], strides = [1, 1, 1]} : vector<4x8x8xbf16> to vector<1x8x8xbf16>
    %39 = vector.shape_cast %38 : vector<1x8x8xbf16> to vector<8x8xbf16>
    %40 = tpu.concatenate %33, %35, %37, %39 in 1 : vector<8x8xbf16>, vector<8x8xbf16>, vector<8x8xbf16>, vector<8x8xbf16> -> vector<8x32xbf16>
    %c0_15 = arith.constant 0 : index
    %c0_16 = arith.constant 0 : index
    %41 = vector.load %arg6[%c0_15, %c0_16] : memref<32x32xbf16, #tpu.memory_space<vmem>>, vector<32x32xbf16>
    %cst_17 = arith.constant dense<0.000000e+00> : vector<8x32xf32>
    %42 = tpu.matmul %40, %41, %cst_17 {dimension_numbers = #tpu.dot_dimension_numbers<[1], [0], [0], [1], [0, 0, 1, 1], [], []>} : vector<8x32xbf16>, vector<32x32xbf16>, vector<8x32xf32> -> vector<8x32xf32>
    %c0_18 = arith.constant 0 : index
    %c0_19 = arith.constant 0 : index
    %43 = vector.load %arg7[%c0_18, %c0_19] : memref<1x32xf32, #tpu.memory_space<vmem>>, vector<1x32xf32>
    %44 = vector.broadcast %43 : vector<1x32xf32> to vector<8x32xf32>
    %45 = arith.addf %42, %44 : vector<8x32xf32>
    %c0_20 = arith.constant 0 : index
    %46 = arith.index_cast %4 : i32 to index
    %c0_21 = arith.constant 0 : index
    %47 = vector.load %arg2[%c0_20, %46, %c0_21] : memref<1x8x32xf32, #tpu.memory_space<vmem>>, vector<1x8x32xf32>
    %48 = vector.shape_cast %47 : vector<1x8x32xf32> to vector<8x32xf32>
    %49 = arith.addf %48, %45 : vector<8x32xf32>
    %c0_22 = arith.constant 0 : index
    %c0_23 = arith.constant 0 : index
    %50 = vector.load %arg8[%c0_22, %c0_23] : memref<1x32xf32, #tpu.memory_space<vmem>>, vector<1x32xf32>
    %c0_24 = arith.constant 0 : index
    %c0_25 = arith.constant 0 : index
    %51 = vector.load %arg9[%c0_24, %c0_25] : memref<1x32xf32, #tpu.memory_space<vmem>>, vector<1x32xf32>
    %cst_26 = arith.constant dense<0.000000e+00> : vector<8xf32>
    %52 = vector.multi_reduction <add>, %49, %cst_26 [1] : vector<8x32xf32> to vector<8xf32>
    %53 = vector.shape_cast %52 : vector<8xf32> to vector<8x1xf32>
    %cst_27 = arith.constant 3.200000e+01 : f32
    %54 = vector.broadcast %cst_27 : f32 to vector<8x1xf32>
    %55 = arith.divf %53, %54 : vector<8x1xf32>
    %56 = vector.broadcast %55 : vector<8x1xf32> to vector<8x32xf32>
    %57 = arith.subf %49, %56 : vector<8x32xf32>
    %58 = arith.mulf %57, %57 : vector<8x32xf32>
    %cst_28 = arith.constant dense<0.000000e+00> : vector<8xf32>
    %59 = vector.multi_reduction <add>, %58, %cst_28 [1] : vector<8x32xf32> to vector<8xf32>
    %60 = vector.shape_cast %59 : vector<8xf32> to vector<8x1xf32>
    %cst_29 = arith.constant 3.200000e+01 : f32
    %61 = vector.broadcast %cst_29 : f32 to vector<8x1xf32>
    %62 = arith.divf %60, %61 : vector<8x1xf32>
    %63 = vector.broadcast %55 : vector<8x1xf32> to vector<8x32xf32>
    %64 = arith.subf %49, %63 : vector<8x32xf32>
    %cst_30 = arith.constant 9.99999974E-6 : f32
    %65 = vector.broadcast %cst_30 : f32 to vector<8x1xf32>
    %66 = arith.addf %62, %65 : vector<8x1xf32>
    %67 = math.rsqrt %66 : vector<8x1xf32>
    %68 = vector.broadcast %67 : vector<8x1xf32> to vector<8x32xf32>
    %69 = arith.mulf %64, %68 : vector<8x32xf32>
    %70 = vector.broadcast %50 : vector<1x32xf32> to vector<8x32xf32>
    %71 = arith.mulf %69, %70 : vector<8x32xf32>
    %72 = vector.broadcast %51 : vector<1x32xf32> to vector<8x32xf32>
    %73 = arith.addf %71, %72 : vector<8x32xf32>
    %74 = arith.truncf %73 : vector<8x32xf32> to vector<8x32xbf16>
    %c0_31 = arith.constant 0 : index
    %c0_32 = arith.constant 0 : index
    %75 = vector.load %arg10[%c0_31, %c0_32] : memref<32x128xbf16, #tpu.memory_space<vmem>>, vector<32x128xbf16>
    %cst_33 = arith.constant dense<0.000000e+00> : vector<8x128xf32>
    %76 = tpu.matmul %74, %75, %cst_33 {dimension_numbers = #tpu.dot_dimension_numbers<[1], [0], [0], [1], [0, 0, 1, 1], [], []>} : vector<8x32xbf16>, vector<32x128xbf16>, vector<8x128xf32> -> vector<8x128xf32>
    %c0_34 = arith.constant 0 : index
    %c0_35 = arith.constant 0 : index
    %77 = vector.load %arg11[%c0_34, %c0_35] : memref<1x128xf32, #tpu.memory_space<vmem>>, vector<1x128xf32>
    %78 = vector.broadcast %77 : vector<1x128xf32> to vector<8x128xf32>
    %79 = arith.addf %76, %78 : vector<8x128xf32>
    %cst_36 = arith.constant 5.000000e-01 : f32
    %80 = vector.broadcast %cst_36 : f32 to vector<8x128xf32>
    %81 = arith.mulf %80, %79 : vector<8x128xf32>
    %cst_37 = arith.constant 4.471500e-02 : f32
    %82 = vector.broadcast %cst_37 : f32 to vector<8x128xf32>
    %83 = arith.mulf %82, %79 : vector<8x128xf32>
    %84 = arith.mulf %83, %79 : vector<8x128xf32>
    %85 = arith.mulf %84, %79 : vector<8x128xf32>
    %86 = arith.addf %79, %85 : vector<8x128xf32>
    %cst_38 = arith.constant 0.797884583 : f32
    %87 = vector.broadcast %cst_38 : f32 to vector<8x128xf32>
    %88 = arith.mulf %87, %86 : vector<8x128xf32>
    %89 = math.tanh %88 : vector<8x128xf32>
    %cst_39 = arith.constant 1.000000e+00 : f32
    %90 = vector.broadcast %cst_39 : f32 to vector<8x128xf32>
    %91 = arith.addf %90, %89 : vector<8x128xf32>
    %92 = arith.mulf %81, %91 : vector<8x128xf32>
    %93 = arith.truncf %92 : vector<8x128xf32> to vector<8x128xbf16>
    %c0_40 = arith.constant 0 : index
    %c0_41 = arith.constant 0 : index
    %94 = vector.load %arg12[%c0_40, %c0_41] : memref<128x32xbf16, #tpu.memory_space<vmem>>, vector<128x32xbf16>
    %cst_42 = arith.constant dense<0.000000e+00> : vector<8x32xf32>
    %95 = tpu.matmul %93, %94, %cst_42 {dimension_numbers = #tpu.dot_dimension_numbers<[1], [0], [0], [1], [0, 0, 1, 1], [], []>} : vector<8x128xbf16>, vector<128x32xbf16>, vector<8x32xf32> -> vector<8x32xf32>
    %c0_43 = arith.constant 0 : index
    %c0_44 = arith.constant 0 : index
    %96 = vector.load %arg13[%c0_43, %c0_44] : memref<1x32xf32, #tpu.memory_space<vmem>>, vector<1x32xf32>
    %97 = vector.broadcast %96 : vector<1x32xf32> to vector<8x32xf32>
    %98 = arith.addf %95, %97 : vector<8x32xf32>
    %c0_45 = arith.constant 0 : index
    %c0_46 = arith.constant 0 : index
    %99 = vector.load %arg14[%c0_45, %c0_46] : memref<1x32xf32, #tpu.memory_space<vmem>>, vector<1x32xf32>
    %c0_47 = arith.constant 0 : index
    %c0_48 = arith.constant 0 : index
    %100 = vector.load %arg15[%c0_47, %c0_48] : memref<1x32xf32, #tpu.memory_space<vmem>>, vector<1x32xf32>
    %cst_49 = arith.constant dense<0.000000e+00> : vector<8xf32>
    %101 = vector.multi_reduction <add>, %98, %cst_49 [1] : vector<8x32xf32> to vector<8xf32>
    %102 = vector.shape_cast %101 : vector<8xf32> to vector<8x1xf32>
    %cst_50 = arith.constant 3.200000e+01 : f32
    %103 = vector.broadcast %cst_50 : f32 to vector<8x1xf32>
    %104 = arith.divf %102, %103 : vector<8x1xf32>
    %105 = vector.broadcast %104 : vector<8x1xf32> to vector<8x32xf32>
    %106 = arith.subf %98, %105 : vector<8x32xf32>
    %107 = arith.mulf %106, %106 : vector<8x32xf32>
    %cst_51 = arith.constant dense<0.000000e+00> : vector<8xf32>
    %108 = vector.multi_reduction <add>, %107, %cst_51 [1] : vector<8x32xf32> to vector<8xf32>
    %109 = vector.shape_cast %108 : vector<8xf32> to vector<8x1xf32>
    %cst_52 = arith.constant 3.200000e+01 : f32
    %110 = vector.broadcast %cst_52 : f32 to vector<8x1xf32>
    %111 = arith.divf %109, %110 : vector<8x1xf32>
    %112 = vector.broadcast %104 : vector<8x1xf32> to vector<8x32xf32>
    %113 = arith.subf %98, %112 : vector<8x32xf32>
    %cst_53 = arith.constant 2.500000e-06 : f32
    %114 = vector.broadcast %cst_53 : f32 to vector<8x1xf32>
    %115 = arith.addf %111, %114 : vector<8x1xf32>
    %116 = math.rsqrt %115 : vector<8x1xf32>
    %117 = vector.broadcast %116 : vector<8x1xf32> to vector<8x32xf32>
    %118 = arith.mulf %113, %117 : vector<8x32xf32>
    %119 = vector.broadcast %99 : vector<1x32xf32> to vector<8x32xf32>
    %120 = arith.mulf %118, %119 : vector<8x32xf32>
    %121 = vector.broadcast %100 : vector<1x32xf32> to vector<8x32xf32>
    %122 = arith.addf %120, %121 : vector<8x32xf32>
    %c0_54 = arith.constant 0 : index
    %c0_55 = arith.constant 0 : index
    %c0_56 = arith.constant 0 : index
    %123 = vector.load %arg16[%c0_54, %c0_55, %c0_56] : memref<1x8x32xf32, #tpu.memory_space<vmem>>, vector<1x8x32xf32>
    %124 = vector.shape_cast %123 : vector<1x8x32xf32> to vector<8x32xf32>
    %125 = vector.shape_cast %122 : vector<8x32xf32> to vector<1x8x32xf32>
    tpu.vector_store %arg16[%c0_54, %c0_55, %c0_56], %125 {strides = array<i32>} : memref<1x8x32xf32, #tpu.memory_space<vmem>>, vector<1x8x32xf32>,
    return
  }
  func.func @transform_0(%arg0: i32, %arg1: i32) -> (i32, i32, i32) {
    %c0_i32 = arith.constant 0 : i32
    %c0_i32_0 = arith.constant 0 : i32
    %c0_i32_1 = arith.constant 0 : i32
    return %arg0, %c0_i32, %c0_i32_0 : i32, i32, i32
  }
  func.func @transform_1(%arg0: i32, %arg1: i32) -> (i32, i32, i32) {
    %c0_i32 = arith.constant 0 : i32
    %c0_i32_0 = arith.constant 0 : i32
    %c0_i32_1 = arith.constant 0 : i32
    return %arg0, %c0_i32, %c0_i32_0 : i32, i32, i32
  }
  func.func @transform_2(%arg0: i32, %arg1: i32) -> (i32, i32) {
    %c0_i32 = arith.constant 0 : i32
    %c0_i32_0 = arith.constant 0 : i32
    %c0_i32_1 = arith.constant 0 : i32
    return %c0_i32, %c0_i32_0 : i32, i32
  }
  func.func @transform_3(%arg0: i32, %arg1: i32) -> (i32, i32) {
    %c0_i32 = arith.constant 0 : i32
    %c0_i32_0 = arith.constant 0 : i32
    %c0_i32_1 = arith.constant 0 : i32
    return %c0_i32, %c0_i32_0 : i32, i32
  }
  func.func @transform_4(%arg0: i32, %arg1: i32) -> (i32, i32) {
    %c0_i32 = arith.constant 0 : i32
    %c0_i32_0 = arith.constant 0 : i32
    %c0_i32_1 = arith.constant 0 : i32
    return %c0_i32, %c0_i32_0 : i32, i32
  }
  func.func @transform_5(%arg0: i32, %arg1: i32) -> (i32, i32) {
    %c0_i32 = arith.constant 0 : i32
    %c0_i32_0 = arith.constant 0 : i32
    %c0_i32_1 = arith.constant 0 : i32
    return %c0_i32, %c0_i32_0 : i32, i32
  }
  func.func @transform_6(%arg0: i32, %arg1: i32) -> (i32, i32) {
    %c0_i32 = arith.constant 0 : i32
    %c0_i32_0 = arith.constant 0 : i32
    %c0_i32_1 = arith.constant 0 : i32
    return %c0_i32, %c0_i32_0 : i32, i32
  }
  func.func @transform_7(%arg0: i32, %arg1: i32) -> (i32, i32) {
    %c0_i32 = arith.constant 0 : i32
    %c0_i32_0 = arith.constant 0 : i32
    %c0_i32_1 = arith.constant 0 : i32
    return %c0_i32, %c0_i32_0 : i32, i32
  }
  func.func @transform_8(%arg0: i32, %arg1: i32) -> (i32, i32) {
    %c0_i32 = arith.constant 0 : i32
    %c0_i32_0 = arith.constant 0 : i32
    %c0_i32_1 = arith.constant 0 : i32
    return %c0_i32, %c0_i32_0 : i32, i32
  }
  func.func @transform_9(%arg0: i32, %arg1: i32) -> (i32, i32) {
    %c0_i32 = arith.constant 0 : i32
    %c0_i32_0 = arith.constant 0 : i32
    %c0_i32_1 = arith.constant 0 : i32
    return %c0_i32, %c0_i32_0 : i32, i32
  }
  func.func @transform_10(%arg0: i32, %arg1: i32) -> (i32, i32) {
    %c0_i32 = arith.constant 0 : i32
    %c0_i32_0 = arith.constant 0 : i32
    %c0_i32_1 = arith.constant 0 : i32
    return %c0_i32, %c0_i32_0 : i32, i32
  }
  func.func @transform_11(%arg0: i32, %arg1: i32) -> (i32, i32) {
    %c0_i32 = arith.constant 0 : i32
    %c0_i32_0 = arith.constant 0 : i32
    %c0_i32_1 = arith.constant 0 : i32
    return %c0_i32, %c0_i32_0 : i32, i32
  }
  func.func @transform_12(%arg0: i32, %arg1: i32) -> (i32, i32) {
    %c0_i32 = arith.constant 0 : i32
    %c0_i32_0 = arith.constant 0 : i32
    %c0_i32_1 = arith.constant 0 : i32
    return %c0_i32, %c0_i32_0 : i32, i32
  }
  func.func @transform_13(%arg0: i32, %arg1: i32) -> (i32, i32) {
    %c0_i32 = arith.constant 0 : i32
    %c0_i32_0 = arith.constant 0 : i32
    %c0_i32_1 = arith.constant 0 : i32
    return %c0_i32, %c0_i32_0 : i32, i32
  }
  func.func @transform_14(%arg0: i32, %arg1: i32) -> (i32, i32, i32) {
    %c0_i32 = arith.constant 0 : i32
    %c0_i32_0 = arith.constant 0 : i32
    return %arg0, %arg1, %c0_i32 : i32, i32, i32
  }
}

module attributes {stable_mosaic.version = 11 : i64} {
  func.func @_transformer_block_kernel(%arg0: i32, %arg1: i32, %arg2: memref<1x8x32xf32, #tpu.memory_space<vmem>>, %arg3: memref<1x1x8xi8, #tpu.memory_space<vmem>>, %arg4: memref<32x96xbf16, #tpu.memory_space<vmem>>, %arg5: memref<1x96xf32, #tpu.memory_space<vmem>>, %arg6: memref<32x32xbf16, #tpu.memory_space<vmem>>, %arg7: memref<1x32xf32, #tpu.memory_space<vmem>>, %arg8: memref<1x32xf32, #tpu.memory_space<vmem>>, %arg9: memref<1x32xf32, #tpu.memory_space<vmem>>, %arg10: memref<32x128xbf16, #tpu.memory_space<vmem>>, %arg11: memref<1x128xf32, #tpu.memory_space<vmem>>, %arg12: memref<128x32xbf16, #tpu.memory_space<vmem>>, %arg13: memref<1x32xf32, #tpu.memory_space<vmem>>, %arg14: memref<1x32xf32, #tpu.memory_space<vmem>>, %arg15: memref<1x32xf32, #tpu.memory_space<vmem>>, %arg16: memref<1x8x32xf32, #tpu.memory_space<vmem>>, %arg17: memref<4x8x8xbf16, #tpu.memory_space<vmem>>, %arg18: memref<4x8x8xbf16, #tpu.memory_space<vmem>>, %arg19: memref<4x8x8xbf16, #tpu.memory_space<vmem>>) attributes {dimension_semantics = [#tpu.dimension_semantics<parallel>, #tpu.dimension_semantics<arbitrary>], iteration_bounds = array<i64: 2, 1>, scalar_prefetch = 0 : i64, scratch_operands = 3 : i64, tpu.core_type = #tpu.core_type<tc>, window_params = [{transform_indices = @transform_0, window_bounds = array<i64: 1, 8, 32>}, {transform_indices = @transform_1, window_bounds = array<i64: 1, 1, 8>}, {pipeline_mode = #tpu.pipeline_mode<synchronous>, transform_indices = @transform_2, window_bounds = array<i64: 32, 96>}, {pipeline_mode = #tpu.pipeline_mode<synchronous>, transform_indices = @transform_3, window_bounds = array<i64: 1, 96>}, {pipeline_mode = #tpu.pipeline_mode<synchronous>, transform_indices = @transform_4, window_bounds = array<i64: 32, 32>}, {pipeline_mode = #tpu.pipeline_mode<synchronous>, transform_indices = @transform_5, window_bounds = array<i64: 1, 32>}, {pipeline_mode = #tpu.pipeline_mode<synchronous>, transform_indices = @transform_6, window_bounds = array<i64: 1, 32>}, {pipeline_mode = #tpu.pipeline_mode<synchronous>, transform_indices = @transform_7, window_bounds = array<i64: 1, 32>}, {pipeline_mode = #tpu.pipeline_mode<synchronous>, transform_indices = @transform_8, window_bounds = array<i64: 32, 128>}, {pipeline_mode = #tpu.pipeline_mode<synchronous>, transform_indices = @transform_9, window_bounds = array<i64: 1, 128>}, {pipeline_mode = #tpu.pipeline_mode<synchronous>, transform_indices = @transform_10, window_bounds = array<i64: 128, 32>}, {pipeline_mode = #tpu.pipeline_mode<synchronous>, transform_indices = @transform_11, window_bounds = array<i64: 1, 32>}, {pipeline_mode = #tpu.pipeline_mode<synchronous>, transform_indices = @transform_12, window_bounds = array<i64: 1, 32>}, {pipeline_mode = #tpu.pipeline_mode<synchronous>, transform_indices = @transform_13, window_bounds = array<i64: 1, 32>}, {transform_indices = @transform_14, window_bounds = array<i64: 1, 8, 32>}]} {
    %c0_i32 = arith.constant 0 : i32
    %0 = arith.cmpi eq, %arg1, %c0_i32 : i32
    %1 = arith.extui %0 : i1 to i32
    %c0_i32_0 = arith.constant 0 : i32
    %2 = arith.cmpi ne, %1, %c0_i32_0 : i32
    scf.if %2 {
      %c0_57 = arith.constant 0 : index
      %c0_58 = arith.constant 0 : index
      %c0_59 = arith.constant 0 : index
      %119 = vector.load %arg2[%c0_57, %c0_58, %c0_59] : memref<1x8x32xf32, #tpu.memory_space<vmem>>, vector<1x8x32xf32>
      %120 = vector.shape_cast %119 : vector<1x8x32xf32> to vector<8x32xf32>
      %121 = arith.truncf %120 : vector<8x32xf32> to vector<8x32xbf16>
      %c0_60 = arith.constant 0 : index
      %c0_61 = arith.constant 0 : index
      %122 = vector.load %arg4[%c0_60, %c0_61] : memref<32x96xbf16, #tpu.memory_space<vmem>>, vector<32x96xbf16>
      %cst_62 = arith.constant dense<0.000000e+00> : vector<8x96xf32>
      %123 = tpu.matmul %121, %122, %cst_62 {dimension_numbers = #tpu.dot_dimension_numbers<[1], [0], [0], [1], [0, 0, 1, 1], [], []>} : vector<8x32xbf16>, vector<32x96xbf16>, vector<8x96xf32> -> vector<8x96xf32>
      %c0_63 = arith.constant 0 : index
      %c0_64 = arith.constant 0 : index
      %124 = vector.load %arg5[%c0_63, %c0_64] : memref<1x96xf32, #tpu.memory_space<vmem>>, vector<1x96xf32>
      %125 = vector.broadcast %124 : vector<1x96xf32> to vector<8x96xf32>
      %126 = arith.addf %123, %125 : vector<8x96xf32>
      %127 = arith.truncf %126 : vector<8x96xf32> to vector<8x96xbf16>
      %128 = vector.extract_strided_slice %127 {offsets = [0, 0], sizes = [8, 32], strides = [1, 1]} : vector<8x96xbf16> to vector<8x32xbf16>
      %129 = vector.shape_cast %128 : vector<8x32xbf16> to vector<8x4x8xbf16>
      %130 = tpu.transpose %129, [1, 0, 2] : vector<8x4x8xbf16> -> vector<4x8x8xbf16>
      %c0_65 = arith.constant 0 : index
      %c0_66 = arith.constant 0 : index
      %c0_67 = arith.constant 0 : index
      %131 = vector.load %arg17[%c0_65, %c0_66, %c0_67] : memref<4x8x8xbf16, #tpu.memory_space<vmem>>, vector<4x8x8xbf16>
      tpu.vector_store %arg17[%c0_65, %c0_66, %c0_67], %130 {strides = array<i32>} : memref<4x8x8xbf16, #tpu.memory_space<vmem>>, vector<4x8x8xbf16>,
      %132 = vector.extract_strided_slice %127 {offsets = [0, 32], sizes = [8, 32], strides = [1, 1]} : vector<8x96xbf16> to vector<8x32xbf16>
      %133 = vector.shape_cast %132 : vector<8x32xbf16> to vector<8x4x8xbf16>
      %134 = tpu.transpose %133, [1, 0, 2] : vector<8x4x8xbf16> -> vector<4x8x8xbf16>
      %c0_68 = arith.constant 0 : index
      %c0_69 = arith.constant 0 : index
      %c0_70 = arith.constant 0 : index
      %135 = vector.load %arg18[%c0_68, %c0_69, %c0_70] : memref<4x8x8xbf16, #tpu.memory_space<vmem>>, vector<4x8x8xbf16>
      tpu.vector_store %arg18[%c0_68, %c0_69, %c0_70], %134 {strides = array<i32>} : memref<4x8x8xbf16, #tpu.memory_space<vmem>>, vector<4x8x8xbf16>,
      %136 = vector.extract_strided_slice %127 {offsets = [0, 64], sizes = [8, 32], strides = [1, 1]} : vector<8x96xbf16> to vector<8x32xbf16>
      %137 = vector.shape_cast %136 : vector<8x32xbf16> to vector<8x4x8xbf16>
      %138 = tpu.transpose %137, [1, 0, 2] : vector<8x4x8xbf16> -> vector<4x8x8xbf16>
      %c0_71 = arith.constant 0 : index
      %c0_72 = arith.constant 0 : index
      %c0_73 = arith.constant 0 : index
      %139 = vector.load %arg19[%c0_71, %c0_72, %c0_73] : memref<4x8x8xbf16, #tpu.memory_space<vmem>>, vector<4x8x8xbf16>
      tpu.vector_store %arg19[%c0_71, %c0_72, %c0_73], %138 {strides = array<i32>} : memref<4x8x8xbf16, #tpu.memory_space<vmem>>, vector<4x8x8xbf16>,
    } else {
    }
    %c8_i32 = arith.constant 8 : i32
    %3 = arith.muli %arg1, %c8_i32 : i32
    %4 = tpu.assume_multiple %3, 8 : i32
    %c0 = arith.constant 0 : index
    %5 = arith.index_cast %4 : i32 to index
    %c0_1 = arith.constant 0 : index
    %6 = vector.load %arg17[%c0, %5, %c0_1] : memref<4x8x8xbf16, #tpu.memory_space<vmem>>, vector<4x8x8xbf16>
    %c0_2 = arith.constant 0 : index
    %c0_3 = arith.constant 0 : index
    %c0_4 = arith.constant 0 : index
    %7 = vector.load %arg18[%c0_2, %c0_3, %c0_4] : memref<4x8x8xbf16, #tpu.memory_space<vmem>>, vector<4x8x8xbf16>
    %c0_5 = arith.constant 0 : index
    %c0_6 = arith.constant 0 : index
    %c0_7 = arith.constant 0 : index
    %8 = vector.load %arg19[%c0_5, %c0_6, %c0_7] : memref<4x8x8xbf16, #tpu.memory_space<vmem>>, vector<4x8x8xbf16>
    "tpu.trace_start"() <{level = 10 : i32, message = "hqd,hkd->hqk"}> : () -> ()
    %cst = arith.constant dense<0.000000e+00> : vector<4x8x8xf32>
    %9 = tpu.matmul %6, %7, %cst {dimension_numbers = #tpu.dot_dimension_numbers<[2], [2], [1], [1], [0, 0, 0, 1, 1, 1], [0], [0]>} : vector<4x8x8xbf16>, vector<4x8x8xbf16>, vector<4x8x8xf32> -> vector<4x8x8xf32>
    "tpu.trace_stop"() : () -> ()
    %c0_8 = arith.constant 0 : index
    %c0_9 = arith.constant 0 : index
    %c0_10 = arith.constant 0 : index
    %10 = vector.load %arg3[%c0_8, %c0_9, %c0_10] : memref<1x1x8xi8, #tpu.memory_space<vmem>>, vector<1x1x8xi8>
    %11 = vector.shape_cast %10 : vector<1x1x8xi8> to vector<1x8xi8>
    %c0_i8 = arith.constant 0 : i8
    %12 = vector.broadcast %c0_i8 : i8 to vector<1x8xi8>
    %13 = arith.cmpi ne, %11, %12 : vector<1x8xi8>
    %14 = vector.shape_cast %13 : vector<1x8xi1> to vector<1x1x8xi1>
    %cst_11 = arith.constant -6.550400e+04 : f32
    %15 = vector.shape_cast %14 : vector<1x1x8xi1> to vector<1x1x8xi1>
    %16 = vector.broadcast %15 : vector<1x1x8xi1> to vector<4x8x8xi1>
    %17 = vector.broadcast %cst_11 : f32 to vector<4x8x8xf32>
    %18 = arith.select %16, %9, %17 : vector<4x8x8xi1>, vector<4x8x8xf32>
    %cst_12 = arith.constant dense<0xFF800000> : vector<4x8xf32>
    %19 = vector.multi_reduction <maximumf>, %18, %cst_12 [2] : vector<4x8x8xf32> to vector<4x8xf32>
    %20 = vector.shape_cast %19 : vector<4x8xf32> to vector<4x8x1xf32>
    %21 = vector.broadcast %20 : vector<4x8x1xf32> to vector<4x8x8xf32>
    %22 = arith.subf %18, %21 : vector<4x8x8xf32>
    %23 = math.exp %22 : vector<4x8x8xf32>
    %cst_13 = arith.constant dense<0.000000e+00> : vector<4x8xf32>
    %24 = vector.multi_reduction <add>, %23, %cst_13 [2] : vector<4x8x8xf32> to vector<4x8xf32>
    %25 = vector.shape_cast %24 : vector<4x8xf32> to vector<4x8x1xf32>
    %26 = tpu.reciprocal %25 {approx = true} : vector<4x8x1xf32> -> vector<4x8x1xf32>
    %27 = vector.broadcast %26 : vector<4x8x1xf32> to vector<4x8x8xf32>
    %28 = arith.mulf %23, %27 : vector<4x8x8xf32>
    %29 = arith.truncf %28 : vector<4x8x8xf32> to vector<4x8x8xbf16>
    "tpu.trace_start"() <{level = 10 : i32, message = "hqk,hkd->hqd"}> : () -> ()
    %cst_14 = arith.constant dense<0.000000e+00> : vector<4x8x8xf32>
    %30 = tpu.matmul %29, %8, %cst_14 {dimension_numbers = #tpu.dot_dimension_numbers<[2], [1], [1], [2], [0, 0, 0, 1, 1, 2], [0], [0]>} : vector<4x8x8xbf16>, vector<4x8x8xbf16>, vector<4x8x8xf32> -> vector<4x8x8xf32>
    "tpu.trace_stop"() : () -> ()
    %31 = arith.truncf %30 : vector<4x8x8xf32> to vector<4x8x8xbf16>
    %32 = tpu.transpose %31, [1, 0, 2] : vector<4x8x8xbf16> -> vector<8x4x8xbf16>
    %33 = vector.shape_cast %32 : vector<8x4x8xbf16> to vector<8x32xbf16>
    %c0_15 = arith.constant 0 : index
    %c0_16 = arith.constant 0 : index
    %34 = vector.load %arg6[%c0_15, %c0_16] : memref<32x32xbf16, #tpu.memory_space<vmem>>, vector<32x32xbf16>
    %cst_17 = arith.constant dense<0.000000e+00> : vector<8x32xf32>
    %35 = tpu.matmul %33, %34, %cst_17 {dimension_numbers = #tpu.dot_dimension_numbers<[1], [0], [0], [1], [0, 0, 1, 1], [], []>} : vector<8x32xbf16>, vector<32x32xbf16>, vector<8x32xf32> -> vector<8x32xf32>
    %c0_18 = arith.constant 0 : index
    %c0_19 = arith.constant 0 : index
    %36 = vector.load %arg7[%c0_18, %c0_19] : memref<1x32xf32, #tpu.memory_space<vmem>>, vector<1x32xf32>
    %37 = vector.broadcast %36 : vector<1x32xf32> to vector<8x32xf32>
    %38 = arith.addf %35, %37 : vector<8x32xf32>
    %c0_20 = arith.constant 0 : index
    %39 = arith.index_cast %4 : i32 to index
    %c0_21 = arith.constant 0 : index
    %40 = vector.load %arg2[%c0_20, %39, %c0_21] : memref<1x8x32xf32, #tpu.memory_space<vmem>>, vector<1x8x32xf32>
    %41 = vector.shape_cast %40 : vector<1x8x32xf32> to vector<8x32xf32>
    %42 = arith.addf %41, %38 : vector<8x32xf32>
    %c0_22 = arith.constant 0 : index
    %c0_23 = arith.constant 0 : index
    %43 = vector.load %arg8[%c0_22, %c0_23] : memref<1x32xf32, #tpu.memory_space<vmem>>, vector<1x32xf32>
    %c0_24 = arith.constant 0 : index
    %c0_25 = arith.constant 0 : index
    %44 = vector.load %arg9[%c0_24, %c0_25] : memref<1x32xf32, #tpu.memory_space<vmem>>, vector<1x32xf32>
    %cst_26 = arith.constant dense<0.000000e+00> : vector<8xf32>
    %45 = vector.multi_reduction <add>, %42, %cst_26 [1] : vector<8x32xf32> to vector<8xf32>
    %46 = vector.shape_cast %45 : vector<8xf32> to vector<8x1xf32>
    %cst_27 = arith.constant 3.200000e+01 : f32
    %47 = vector.broadcast %cst_27 : f32 to vector<8x1xf32>
    %48 = arith.divf %46, %47 : vector<8x1xf32>
    %49 = vector.broadcast %48 : vector<8x1xf32> to vector<8x32xf32>
    %50 = arith.subf %42, %49 : vector<8x32xf32>
    %51 = arith.mulf %50, %50 : vector<8x32xf32>
    %cst_28 = arith.constant dense<0.000000e+00> : vector<8xf32>
    %52 = vector.multi_reduction <add>, %51, %cst_28 [1] : vector<8x32xf32> to vector<8xf32>
    %53 = vector.shape_cast %52 : vector<8xf32> to vector<8x1xf32>
    %cst_29 = arith.constant 3.200000e+01 : f32
    %54 = vector.broadcast %cst_29 : f32 to vector<8x1xf32>
    %55 = arith.divf %53, %54 : vector<8x1xf32>
    %56 = vector.broadcast %48 : vector<8x1xf32> to vector<8x32xf32>
    %57 = arith.subf %42, %56 : vector<8x32xf32>
    %cst_30 = arith.constant 9.99999974E-6 : f32
    %58 = vector.broadcast %cst_30 : f32 to vector<8x1xf32>
    %59 = arith.addf %55, %58 : vector<8x1xf32>
    %60 = math.rsqrt %59 : vector<8x1xf32>
    %61 = vector.broadcast %60 : vector<8x1xf32> to vector<8x32xf32>
    %62 = arith.mulf %57, %61 : vector<8x32xf32>
    %63 = vector.broadcast %43 : vector<1x32xf32> to vector<8x32xf32>
    %64 = arith.mulf %62, %63 : vector<8x32xf32>
    %65 = vector.broadcast %44 : vector<1x32xf32> to vector<8x32xf32>
    %66 = arith.addf %64, %65 : vector<8x32xf32>
    %67 = arith.truncf %66 : vector<8x32xf32> to vector<8x32xbf16>
    %c0_31 = arith.constant 0 : index
    %c0_32 = arith.constant 0 : index
    %68 = vector.load %arg10[%c0_31, %c0_32] : memref<32x128xbf16, #tpu.memory_space<vmem>>, vector<32x128xbf16>
    %cst_33 = arith.constant dense<0.000000e+00> : vector<8x128xf32>
    %69 = tpu.matmul %67, %68, %cst_33 {dimension_numbers = #tpu.dot_dimension_numbers<[1], [0], [0], [1], [0, 0, 1, 1], [], []>} : vector<8x32xbf16>, vector<32x128xbf16>, vector<8x128xf32> -> vector<8x128xf32>
    %c0_34 = arith.constant 0 : index
    %c0_35 = arith.constant 0 : index
    %70 = vector.load %arg11[%c0_34, %c0_35] : memref<1x128xf32, #tpu.memory_space<vmem>>, vector<1x128xf32>
    %71 = vector.broadcast %70 : vector<1x128xf32> to vector<8x128xf32>
    %72 = arith.addf %69, %71 : vector<8x128xf32>
    %cst_36 = arith.constant 5.000000e-01 : f32
    %73 = vector.broadcast %cst_36 : f32 to vector<8x128xf32>
    %74 = arith.mulf %73, %72 : vector<8x128xf32>
    %cst_37 = arith.constant 4.471500e-02 : f32
    %75 = vector.broadcast %cst_37 : f32 to vector<8x128xf32>
    %76 = arith.mulf %75, %72 : vector<8x128xf32>
    %77 = arith.mulf %76, %72 : vector<8x128xf32>
    %78 = arith.mulf %77, %72 : vector<8x128xf32>
    %79 = arith.addf %72, %78 : vector<8x128xf32>
    %cst_38 = arith.constant 0.797884583 : f32
    %80 = vector.broadcast %cst_38 : f32 to vector<8x128xf32>
    %81 = arith.mulf %80, %79 : vector<8x128xf32>
    %82 = math.tanh %81 : vector<8x128xf32>
    %cst_39 = arith.constant 1.000000e+00 : f32
    %83 = vector.broadcast %cst_39 : f32 to vector<8x128xf32>
    %84 = arith.addf %83, %82 : vector<8x128xf32>
    %85 = arith.mulf %74, %84 : vector<8x128xf32>
    %86 = arith.truncf %85 : vector<8x128xf32> to vector<8x128xbf16>
    %c0_40 = arith.constant 0 : index
    %c0_41 = arith.constant 0 : index
    %87 = vector.load %arg12[%c0_40, %c0_41] : memref<128x32xbf16, #tpu.memory_space<vmem>>, vector<128x32xbf16>
    %cst_42 = arith.constant dense<0.000000e+00> : vector<8x32xf32>
    %88 = tpu.matmul %86, %87, %cst_42 {dimension_numbers = #tpu.dot_dimension_numbers<[1], [0], [0], [1], [0, 0, 1, 1], [], []>} : vector<8x128xbf16>, vector<128x32xbf16>, vector<8x32xf32> -> vector<8x32xf32>
    %c0_43 = arith.constant 0 : index
    %c0_44 = arith.constant 0 : index
    %89 = vector.load %arg13[%c0_43, %c0_44] : memref<1x32xf32, #tpu.memory_space<vmem>>, vector<1x32xf32>
    %90 = vector.broadcast %89 : vector<1x32xf32> to vector<8x32xf32>
    %91 = arith.addf %88, %90 : vector<8x32xf32>
    %c0_45 = arith.constant 0 : index
    %c0_46 = arith.constant 0 : index
    %92 = vector.load %arg14[%c0_45, %c0_46] : memref<1x32xf32, #tpu.memory_space<vmem>>, vector<1x32xf32>
    %c0_47 = arith.constant 0 : index
    %c0_48 = arith.constant 0 : index
    %93 = vector.load %arg15[%c0_47, %c0_48] : memref<1x32xf32, #tpu.memory_space<vmem>>, vector<1x32xf32>
    %cst_49 = arith.constant dense<0.000000e+00> : vector<8xf32>
    %94 = vector.multi_reduction <add>, %91, %cst_49 [1] : vector<8x32xf32> to vector<8xf32>
    %95 = vector.shape_cast %94 : vector<8xf32> to vector<8x1xf32>
    %cst_50 = arith.constant 3.200000e+01 : f32
    %96 = vector.broadcast %cst_50 : f32 to vector<8x1xf32>
    %97 = arith.divf %95, %96 : vector<8x1xf32>
    %98 = vector.broadcast %97 : vector<8x1xf32> to vector<8x32xf32>
    %99 = arith.subf %91, %98 : vector<8x32xf32>
    %100 = arith.mulf %99, %99 : vector<8x32xf32>
    %cst_51 = arith.constant dense<0.000000e+00> : vector<8xf32>
    %101 = vector.multi_reduction <add>, %100, %cst_51 [1] : vector<8x32xf32> to vector<8xf32>
    %102 = vector.shape_cast %101 : vector<8xf32> to vector<8x1xf32>
    %cst_52 = arith.constant 3.200000e+01 : f32
    %103 = vector.broadcast %cst_52 : f32 to vector<8x1xf32>
    %104 = arith.divf %102, %103 : vector<8x1xf32>
    %105 = vector.broadcast %97 : vector<8x1xf32> to vector<8x32xf32>
    %106 = arith.subf %91, %105 : vector<8x32xf32>
    %cst_53 = arith.constant 2.500000e-06 : f32
    %107 = vector.broadcast %cst_53 : f32 to vector<8x1xf32>
    %108 = arith.addf %104, %107 : vector<8x1xf32>
    %109 = math.rsqrt %108 : vector<8x1xf32>
    %110 = vector.broadcast %109 : vector<8x1xf32> to vector<8x32xf32>
    %111 = arith.mulf %106, %110 : vector<8x32xf32>
    %112 = vector.broadcast %92 : vector<1x32xf32> to vector<8x32xf32>
    %113 = arith.mulf %111, %112 : vector<8x32xf32>
    %114 = vector.broadcast %93 : vector<1x32xf32> to vector<8x32xf32>
    %115 = arith.addf %113, %114 : vector<8x32xf32>
    %c0_54 = arith.constant 0 : index
    %c0_55 = arith.constant 0 : index
    %c0_56 = arith.constant 0 : index
    %116 = vector.load %arg16[%c0_54, %c0_55, %c0_56] : memref<1x8x32xf32, #tpu.memory_space<vmem>>, vector<1x8x32xf32>
    %117 = vector.shape_cast %116 : vector<1x8x32xf32> to vector<8x32xf32>
    %118 = vector.shape_cast %115 : vector<8x32xf32> to vector<1x8x32xf32>
    tpu.vector_store %arg16[%c0_54, %c0_55, %c0_56], %118 {strides = array<i32>} : memref<1x8x32xf32, #tpu.memory_space<vmem>>, vector<1x8x32xf32>,
    return
  }
  func.func @transform_0(%arg0: i32, %arg1: i32) -> (i32, i32, i32) {
    %c0_i32 = arith.constant 0 : i32
    %c0_i32_0 = arith.constant 0 : i32
    %c0_i32_1 = arith.constant 0 : i32
    return %arg0, %c0_i32, %c0_i32_0 : i32, i32, i32
  }
  func.func @transform_1(%arg0: i32, %arg1: i32) -> (i32, i32, i32) {
    %c0_i32 = arith.constant 0 : i32
    %c0_i32_0 = arith.constant 0 : i32
    %c0_i32_1 = arith.constant 0 : i32
    return %arg0, %c0_i32, %c0_i32_0 : i32, i32, i32
  }
  func.func @transform_2(%arg0: i32, %arg1: i32) -> (i32, i32) {
    %c0_i32 = arith.constant 0 : i32
    %c0_i32_0 = arith.constant 0 : i32
    %c0_i32_1 = arith.constant 0 : i32
    return %c0_i32, %c0_i32_0 : i32, i32
  }
  func.func @transform_3(%arg0: i32, %arg1: i32) -> (i32, i32) {
    %c0_i32 = arith.constant 0 : i32
    %c0_i32_0 = arith.constant 0 : i32
    %c0_i32_1 = arith.constant 0 : i32
    return %c0_i32, %c0_i32_0 : i32, i32
  }
  func.func @transform_4(%arg0: i32, %arg1: i32) -> (i32, i32) {
    %c0_i32 = arith.constant 0 : i32
    %c0_i32_0 = arith.constant 0 : i32
    %c0_i32_1 = arith.constant 0 : i32
    return %c0_i32, %c0_i32_0 : i32, i32
  }
  func.func @transform_5(%arg0: i32, %arg1: i32) -> (i32, i32) {
    %c0_i32 = arith.constant 0 : i32
    %c0_i32_0 = arith.constant 0 : i32
    %c0_i32_1 = arith.constant 0 : i32
    return %c0_i32, %c0_i32_0 : i32, i32
  }
  func.func @transform_6(%arg0: i32, %arg1: i32) -> (i32, i32) {
    %c0_i32 = arith.constant 0 : i32
    %c0_i32_0 = arith.constant 0 : i32
    %c0_i32_1 = arith.constant 0 : i32
    return %c0_i32, %c0_i32_0 : i32, i32
  }
  func.func @transform_7(%arg0: i32, %arg1: i32) -> (i32, i32) {
    %c0_i32 = arith.constant 0 : i32
    %c0_i32_0 = arith.constant 0 : i32
    %c0_i32_1 = arith.constant 0 : i32
    return %c0_i32, %c0_i32_0 : i32, i32
  }
  func.func @transform_8(%arg0: i32, %arg1: i32) -> (i32, i32) {
    %c0_i32 = arith.constant 0 : i32
    %c0_i32_0 = arith.constant 0 : i32
    %c0_i32_1 = arith.constant 0 : i32
    return %c0_i32, %c0_i32_0 : i32, i32
  }
  func.func @transform_9(%arg0: i32, %arg1: i32) -> (i32, i32) {
    %c0_i32 = arith.constant 0 : i32
    %c0_i32_0 = arith.constant 0 : i32
    %c0_i32_1 = arith.constant 0 : i32
    return %c0_i32, %c0_i32_0 : i32, i32
  }
  func.func @transform_10(%arg0: i32, %arg1: i32) -> (i32, i32) {
    %c0_i32 = arith.constant 0 : i32
    %c0_i32_0 = arith.constant 0 : i32
    %c0_i32_1 = arith.constant 0 : i32
    return %c0_i32, %c0_i32_0 : i32, i32
  }
  func.func @transform_11(%arg0: i32, %arg1: i32) -> (i32, i32) {
    %c0_i32 = arith.constant 0 : i32
    %c0_i32_0 = arith.constant 0 : i32
    %c0_i32_1 = arith.constant 0 : i32
    return %c0_i32, %c0_i32_0 : i32, i32
  }
  func.func @transform_12(%arg0: i32, %arg1: i32) -> (i32, i32) {
    %c0_i32 = arith.constant 0 : i32
    %c0_i32_0 = arith.constant 0 : i32
    %c0_i32_1 = arith.constant 0 : i32
    return %c0_i32, %c0_i32_0 : i32, i32
  }
  func.func @transform_13(%arg0: i32, %arg1: i32) -> (i32, i32) {
    %c0_i32 = arith.constant 0 : i32
    %c0_i32_0 = arith.constant 0 : i32
    %c0_i32_1 = arith.constant 0 : i32
    return %c0_i32, %c0_i32_0 : i32, i32
  }
  func.func @transform_14(%arg0: i32, %arg1: i32) -> (i32, i32, i32) {
    %c0_i32 = arith.constant 0 : i32
    %c0_i32_0 = arith.constant 0 : i32
    return %arg0, %arg1, %c0_i32 : i32, i32, i32
  }
}

module attributes {stable_mosaic.version = 11 : i64} {
  func.func @_transformer_block_kernel(%arg0: i32, %arg1: i32, %arg2: memref<1x8x32xf32, #tpu.memory_space<vmem>>, %arg3: memref<1x1x8xi8, #tpu.memory_space<vmem>>, %arg4: memref<32x96xbf16, #tpu.memory_space<vmem>>, %arg5: memref<1x96xf32, #tpu.memory_space<vmem>>, %arg6: memref<32x32xbf16, #tpu.memory_space<vmem>>, %arg7: memref<1x32xf32, #tpu.memory_space<vmem>>, %arg8: memref<1x32xf32, #tpu.memory_space<vmem>>, %arg9: memref<1x32xf32, #tpu.memory_space<vmem>>, %arg10: memref<32x128xbf16, #tpu.memory_space<vmem>>, %arg11: memref<1x128xf32, #tpu.memory_space<vmem>>, %arg12: memref<128x32xbf16, #tpu.memory_space<vmem>>, %arg13: memref<1x32xf32, #tpu.memory_space<vmem>>, %arg14: memref<1x32xf32, #tpu.memory_space<vmem>>, %arg15: memref<1x32xf32, #tpu.memory_space<vmem>>, %arg16: memref<1x8x32xf32, #tpu.memory_space<vmem>>, %arg17: memref<4x8x8xbf16, #tpu.memory_space<vmem>>, %arg18: memref<4x8x8xbf16, #tpu.memory_space<vmem>>, %arg19: memref<4x8x8xbf16, #tpu.memory_space<vmem>>) attributes {dimension_semantics = [#tpu.dimension_semantics<parallel>, #tpu.dimension_semantics<arbitrary>], iteration_bounds = array<i64: 2, 1>, scalar_prefetch = 0 : i64, scratch_operands = 3 : i64, tpu.core_type = #tpu.core_type<tc>, window_params = [{transform_indices = @transform_0, window_bounds = array<i64: 1, 8, 32>}, {transform_indices = @transform_1, window_bounds = array<i64: 1, 1, 8>}, {pipeline_mode = #tpu.pipeline_mode<synchronous>, transform_indices = @transform_2, window_bounds = array<i64: 32, 96>}, {pipeline_mode = #tpu.pipeline_mode<synchronous>, transform_indices = @transform_3, window_bounds = array<i64: 1, 96>}, {pipeline_mode = #tpu.pipeline_mode<synchronous>, transform_indices = @transform_4, window_bounds = array<i64: 32, 32>}, {pipeline_mode = #tpu.pipeline_mode<synchronous>, transform_indices = @transform_5, window_bounds = array<i64: 1, 32>}, {pipeline_mode = #tpu.pipeline_mode<synchronous>, transform_indices = @transform_6, window_bounds = array<i64: 1, 32>}, {pipeline_mode = #tpu.pipeline_mode<synchronous>, transform_indices = @transform_7, window_bounds = array<i64: 1, 32>}, {pipeline_mode = #tpu.pipeline_mode<synchronous>, transform_indices = @transform_8, window_bounds = array<i64: 32, 128>}, {pipeline_mode = #tpu.pipeline_mode<synchronous>, transform_indices = @transform_9, window_bounds = array<i64: 1, 128>}, {pipeline_mode = #tpu.pipeline_mode<synchronous>, transform_indices = @transform_10, window_bounds = array<i64: 128, 32>}, {pipeline_mode = #tpu.pipeline_mode<synchronous>, transform_indices = @transform_11, window_bounds = array<i64: 1, 32>}, {pipeline_mode = #tpu.pipeline_mode<synchronous>, transform_indices = @transform_12, window_bounds = array<i64: 1, 32>}, {pipeline_mode = #tpu.pipeline_mode<synchronous>, transform_indices = @transform_13, window_bounds = array<i64: 1, 32>}, {transform_indices = @transform_14, window_bounds = array<i64: 1, 8, 32>}]} {
    %c0_i32 = arith.constant 0 : i32
    %0 = arith.cmpi eq, %arg1, %c0_i32 : i32
    %1 = arith.extui %0 : i1 to i32
    %c0_i32_0 = arith.constant 0 : i32
    %2 = arith.cmpi ne, %1, %c0_i32_0 : i32
    scf.if %2 {
      %c0_57 = arith.constant 0 : index
      %c0_58 = arith.constant 0 : index
      %c0_59 = arith.constant 0 : index
      %126 = vector.load %arg2[%c0_57, %c0_58, %c0_59] : memref<1x8x32xf32, #tpu.memory_space<vmem>>, vector<1x8x32xf32>
      %127 = vector.shape_cast %126 : vector<1x8x32xf32> to vector<8x32xf32>
      %128 = arith.truncf %127 : vector<8x32xf32> to vector<8x32xbf16>
      %c0_60 = arith.constant 0 : index
      %c0_61 = arith.constant 0 : index
      %129 = vector.load %arg4[%c0_60, %c0_61] : memref<32x96xbf16, #tpu.memory_space<vmem>>, vector<32x96xbf16>
      %cst_62 = arith.constant dense<0.000000e+00> : vector<8x96xf32>
      %130 = tpu.matmul %128, %129, %cst_62 {dimension_numbers = #tpu.dot_dimension_numbers<[1], [0], [0], [1], [0, 0, 1, 1], [], []>} : vector<8x32xbf16>, vector<32x96xbf16>, vector<8x96xf32> -> vector<8x96xf32>
      %c0_63 = arith.constant 0 : index
      %c0_64 = arith.constant 0 : index
      %131 = vector.load %arg5[%c0_63, %c0_64] : memref<1x96xf32, #tpu.memory_space<vmem>>, vector<1x96xf32>
      %132 = vector.broadcast %131 : vector<1x96xf32> to vector<8x96xf32>
      %133 = arith.addf %130, %132 : vector<8x96xf32>
      %134 = arith.truncf %133 : vector<8x96xf32> to vector<8x96xbf16>
      %135 = vector.extract_strided_slice %134 {offsets = [0, 0], sizes = [8, 32], strides = [1, 1]} : vector<8x96xbf16> to vector<8x32xbf16>
      %136 = vector.extract_strided_slice %135 {offsets = [0, 0], sizes = [8, 8], strides = [1, 1]} : vector<8x32xbf16> to vector<8x8xbf16>
      %137 = vector.extract_strided_slice %135 {offsets = [0, 8], sizes = [8, 8], strides = [1, 1]} : vector<8x32xbf16> to vector<8x8xbf16>
      %138 = vector.extract_strided_slice %135 {offsets = [0, 16], sizes = [8, 8], strides = [1, 1]} : vector<8x32xbf16> to vector<8x8xbf16>
      %139 = vector.extract_strided_slice %135 {offsets = [0, 24], sizes = [8, 8], strides = [1, 1]} : vector<8x32xbf16> to vector<8x8xbf16>
      %140 = vector.shape_cast %136 : vector<8x8xbf16> to vector<1x8x8xbf16>
      %141 = vector.shape_cast %137 : vector<8x8xbf16> to vector<1x8x8xbf16>
      %142 = vector.shape_cast %138 : vector<8x8xbf16> to vector<1x8x8xbf16>
      %143 = vector.shape_cast %139 : vector<8x8xbf16> to vector<1x8x8xbf16>
      %144 = tpu.concatenate %140, %141, %142, %143 in 0 : vector<1x8x8xbf16>, vector<1x8x8xbf16>, vector<1x8x8xbf16>, vector<1x8x8xbf16> -> vector<4x8x8xbf16>
      %c0_65 = arith.constant 0 : index
      %c0_66 = arith.constant 0 : index
      %c0_67 = arith.constant 0 : index
      %145 = vector.load %arg17[%c0_65, %c0_66, %c0_67] : memref<4x8x8xbf16, #tpu.memory_space<vmem>>, vector<4x8x8xbf16>
      tpu.vector_store %arg17[%c0_65, %c0_66, %c0_67], %144 {strides = array<i32>} : memref<4x8x8xbf16, #tpu.memory_space<vmem>>, vector<4x8x8xbf16>,
      %146 = vector.extract_strided_slice %134 {offsets = [0, 32], sizes = [8, 32], strides = [1, 1]} : vector<8x96xbf16> to vector<8x32xbf16>
      %147 = vector.extract_strided_slice %146 {offsets = [0, 0], sizes = [8, 8], strides = [1, 1]} : vector<8x32xbf16> to vector<8x8xbf16>
      %148 = vector.extract_strided_slice %146 {offsets = [0, 8], sizes = [8, 8], strides = [1, 1]} : vector<8x32xbf16> to vector<8x8xbf16>
      %149 = vector.extract_strided_slice %146 {offsets = [0, 16], sizes = [8, 8], strides = [1, 1]} : vector<8x32xbf16> to vector<8x8xbf16>
      %150 = vector.extract_strided_slice %146 {offsets = [0, 24], sizes = [8, 8], strides = [1, 1]} : vector<8x32xbf16> to vector<8x8xbf16>
      %151 = vector.shape_cast %147 : vector<8x8xbf16> to vector<1x8x8xbf16>
      %152 = vector.shape_cast %148 : vector<8x8xbf16> to vector<1x8x8xbf16>
      %153 = vector.shape_cast %149 : vector<8x8xbf16> to vector<1x8x8xbf16>
      %154 = vector.shape_cast %150 : vector<8x8xbf16> to vector<1x8x8xbf16>
      %155 = tpu.concatenate %151, %152, %153, %154 in 0 : vector<1x8x8xbf16>, vector<1x8x8xbf16>, vector<1x8x8xbf16>, vector<1x8x8xbf16> -> vector<4x8x8xbf16>
      %c0_68 = arith.constant 0 : index
      %c0_69 = arith.constant 0 : index
      %c0_70 = arith.constant 0 : index
      %156 = vector.load %arg18[%c0_68, %c0_69, %c0_70] : memref<4x8x8xbf16, #tpu.memory_space<vmem>>, vector<4x8x8xbf16>
      tpu.vector_store %arg18[%c0_68, %c0_69, %c0_70], %155 {strides = array<i32>} : memref<4x8x8xbf16, #tpu.memory_space<vmem>>, vector<4x8x8xbf16>,
      %157 = vector.extract_strided_slice %134 {offsets = [0, 64], sizes = [8, 32], strides = [1, 1]} : vector<8x96xbf16> to vector<8x32xbf16>
      %158 = vector.extract_strided_slice %157 {offsets = [0, 0], sizes = [8, 8], strides = [1, 1]} : vector<8x32xbf16> to vector<8x8xbf16>
      %159 = vector.extract_strided_slice %157 {offsets = [0, 8], sizes = [8, 8], strides = [1, 1]} : vector<8x32xbf16> to vector<8x8xbf16>
      %160 = vector.extract_strided_slice %157 {offsets = [0, 16], sizes = [8, 8], strides = [1, 1]} : vector<8x32xbf16> to vector<8x8xbf16>
      %161 = vector.extract_strided_slice %157 {offsets = [0, 24], sizes = [8, 8], strides = [1, 1]} : vector<8x32xbf16> to vector<8x8xbf16>
      %162 = vector.shape_cast %158 : vector<8x8xbf16> to vector<1x8x8xbf16>
      %163 = vector.shape_cast %159 : vector<8x8xbf16> to vector<1x8x8xbf16>
      %164 = vector.shape_cast %160 : vector<8x8xbf16> to vector<1x8x8xbf16>
      %165 = vector.shape_cast %161 : vector<8x8xbf16> to vector<1x8x8xbf16>
      %166 = tpu.concatenate %162, %163, %164, %165 in 0 : vector<1x8x8xbf16>, vector<1x8x8xbf16>, vector<1x8x8xbf16>, vector<1x8x8xbf16> -> vector<4x8x8xbf16>
      %c0_71 = arith.constant 0 : index
      %c0_72 = arith.constant 0 : index
      %c0_73 = arith.constant 0 : index
      %167 = vector.load %arg19[%c0_71, %c0_72, %c0_73] : memref<4x8x8xbf16, #tpu.memory_space<vmem>>, vector<4x8x8xbf16>
      tpu.vector_store %arg19[%c0_71, %c0_72, %c0_73], %166 {strides = array<i32>} : memref<4x8x8xbf16, #tpu.memory_space<vmem>>, vector<4x8x8xbf16>,
    } else {
    }
    %c8_i32 = arith.constant 8 : i32
    %3 = arith.muli %arg1, %c8_i32 : i32
    %4 = tpu.assume_multiple %3, 8 : i32
    %c0 = arith.constant 0 : index
    %5 = arith.index_cast %4 : i32 to index
    %c0_1 = arith.constant 0 : index
    %6 = vector.load %arg17[%c0, %5, %c0_1] : memref<4x8x8xbf16, #tpu.memory_space<vmem>>, vector<4x8x8xbf16>
    %c0_2 = arith.constant 0 : index
    %c0_3 = arith.constant 0 : index
    %c0_4 = arith.constant 0 : index
    %7 = vector.load %arg18[%c0_2, %c0_3, %c0_4] : memref<4x8x8xbf16, #tpu.memory_space<vmem>>, vector<4x8x8xbf16>
    %c0_5 = arith.constant 0 : index
    %c0_6 = arith.constant 0 : index
    %c0_7 = arith.constant 0 : index
    %8 = vector.load %arg19[%c0_5, %c0_6, %c0_7] : memref<4x8x8xbf16, #tpu.memory_space<vmem>>, vector<4x8x8xbf16>
    "tpu.trace_start"() <{level = 10 : i32, message = "hqd,hkd->hqk"}> : () -> ()
    %cst = arith.constant dense<0.000000e+00> : vector<4x8x8xf32>
    %9 = tpu.matmul %6, %7, %cst {dimension_numbers = #tpu.dot_dimension_numbers<[2], [2], [1], [1], [0, 0, 0, 1, 1, 1], [0], [0]>} : vector<4x8x8xbf16>, vector<4x8x8xbf16>, vector<4x8x8xf32> -> vector<4x8x8xf32>
    "tpu.trace_stop"() : () -> ()
    %c0_8 = arith.constant 0 : index
    %c0_9 = arith.constant 0 : index
    %c0_10 = arith.constant 0 : index
    %10 = vector.load %arg3[%c0_8, %c0_9, %c0_10] : memref<1x1x8xi8, #tpu.memory_space<vmem>>, vector<1x1x8xi8>
    %11 = vector.shape_cast %10 : vector<1x1x8xi8> to vector<1x8xi8>
    %c0_i8 = arith.constant 0 : i8
    %12 = vector.broadcast %c0_i8 : i8 to vector<1x8xi8>
    %13 = arith.cmpi ne, %11, %12 : vector<1x8xi8>
    %14 = vector.shape_cast %13 : vector<1x8xi1> to vector<1x1x8xi1>
    %cst_11 = arith.constant -6.550400e+04 : f32
    %15 = vector.shape_cast %14 : vector<1x1x8xi1> to vector<1x1x8xi1>
    %16 = vector.broadcast %15 : vector<1x1x8xi1> to vector<4x8x8xi1>
    %17 = vector.broadcast %cst_11 : f32 to vector<4x8x8xf32>
    %18 = arith.select %16, %9, %17 : vector<4x8x8xi1>, vector<4x8x8xf32>
    %cst_12 = arith.constant dense<0xFF800000> : vector<4x8xf32>
    %19 = vector.multi_reduction <maximumf>, %18, %cst_12 [2] : vector<4x8x8xf32> to vector<4x8xf32>
    %20 = vector.shape_cast %19 : vector<4x8xf32> to vector<4x8x1xf32>
    %21 = vector.broadcast %20 : vector<4x8x1xf32> to vector<4x8x8xf32>
    %22 = arith.subf %18, %21 : vector<4x8x8xf32>
    %23 = math.exp %22 : vector<4x8x8xf32>
    %cst_13 = arith.constant dense<0.000000e+00> : vector<4x8xf32>
    %24 = vector.multi_reduction <add>, %23, %cst_13 [2] : vector<4x8x8xf32> to vector<4x8xf32>
    %25 = vector.shape_cast %24 : vector<4x8xf32> to vector<4x8x1xf32>
    %26 = tpu.reciprocal %25 {approx = true} : vector<4x8x1xf32> -> vector<4x8x1xf32>
    %27 = vector.broadcast %26 : vector<4x8x1xf32> to vector<4x8x8xf32>
    %28 = arith.mulf %23, %27 : vector<4x8x8xf32>
    %29 = arith.truncf %28 : vector<4x8x8xf32> to vector<4x8x8xbf16>
    "tpu.trace_start"() <{level = 10 : i32, message = "hqk,hkd->hqd"}> : () -> ()
    %cst_14 = arith.constant dense<0.000000e+00> : vector<4x8x8xf32>
    %30 = tpu.matmul %29, %8, %cst_14 {dimension_numbers = #tpu.dot_dimension_numbers<[2], [1], [1], [2], [0, 0, 0, 1, 1, 2], [0], [0]>} : vector<4x8x8xbf16>, vector<4x8x8xbf16>, vector<4x8x8xf32> -> vector<4x8x8xf32>
    "tpu.trace_stop"() : () -> ()
    %31 = arith.truncf %30 : vector<4x8x8xf32> to vector<4x8x8xbf16>
    %32 = vector.extract_strided_slice %31 {offsets = [0, 0, 0], sizes = [1, 8, 8], strides = [1, 1, 1]} : vector<4x8x8xbf16> to vector<1x8x8xbf16>
    %33 = vector.shape_cast %32 : vector<1x8x8xbf16> to vector<8x8xbf16>
    %34 = vector.extract_strided_slice %31 {offsets = [1, 0, 0], sizes = [1, 8, 8], strides = [1, 1, 1]} : vector<4x8x8xbf16> to vector<1x8x8xbf16>
    %35 = vector.shape_cast %34 : vector<1x8x8xbf16> to vector<8x8xbf16>
    %36 = vector.extract_strided_slice %31 {offsets = [2, 0, 0], sizes = [1, 8, 8], strides = [1, 1, 1]} : vector<4x8x8xbf16> to vector<1x8x8xbf16>
    %37 = vector.shape_cast %36 : vector<1x8x8xbf16> to vector<8x8xbf16>
    %38 = vector.extract_strided_slice %31 {offsets = [3, 0, 0], sizes = [1, 8, 8], strides = [1, 1, 1]} : vector<4x8x8xbf16> to vector<1x8x8xbf16>
    %39 = vector.shape_cast %38 : vector<1x8x8xbf16> to vector<8x8xbf16>
    %40 = tpu.concatenate %33, %35, %37, %39 in 1 : vector<8x8xbf16>, vector<8x8xbf16>, vector<8x8xbf16>, vector<8x8xbf16> -> vector<8x32xbf16>
    %c0_15 = arith.constant 0 : index
    %c0_16 = arith.constant 0 : index
    %41 = vector.load %arg6[%c0_15, %c0_16] : memref<32x32xbf16, #tpu.memory_space<vmem>>, vector<32x32xbf16>
    %cst_17 = arith.constant dense<0.000000e+00> : vector<8x32xf32>
    %42 = tpu.matmul %40, %41, %cst_17 {dimension_numbers = #tpu.dot_dimension_numbers<[1], [0], [0], [1], [0, 0, 1, 1], [], []>} : vector<8x32xbf16>, vector<32x32xbf16>, vector<8x32xf32> -> vector<8x32xf32>
    %c0_18 = arith.constant 0 : index
    %c0_19 = arith.constant 0 : index
    %43 = vector.load %arg7[%c0_18, %c0_19] : memref<1x32xf32, #tpu.memory_space<vmem>>, vector<1x32xf32>
    %44 = vector.broadcast %43 : vector<1x32xf32> to vector<8x32xf32>
    %45 = arith.addf %42, %44 : vector<8x32xf32>
    %c0_20 = arith.constant 0 : index
    %46 = arith.index_cast %4 : i32 to index
    %c0_21 = arith.constant 0 : index
    %47 = vector.load %arg2[%c0_20, %46, %c0_21] : memref<1x8x32xf32, #tpu.memory_space<vmem>>, vector<1x8x32xf32>
    %48 = vector.shape_cast %47 : vector<1x8x32xf32> to vector<8x32xf32>
    %49 = arith.addf %48, %45 : vector<8x32xf32>
    %c0_22 = arith.constant 0 : index
    %c0_23 = arith.constant 0 : index
    %50 = vector.load %arg8[%c0_22, %c0_23] : memref<1x32xf32, #tpu.memory_space<vmem>>, vector<1x32xf32>
    %c0_24 = arith.constant 0 : index
    %c0_25 = arith.constant 0 : index
    %51 = vector.load %arg9[%c0_24, %c0_25] : memref<1x32xf32, #tpu.memory_space<vmem>>, vector<1x32xf32>
    %cst_26 = arith.constant dense<0.000000e+00> : vector<8xf32>
    %52 = vector.multi_reduction <add>, %49, %cst_26 [1] : vector<8x32xf32> to vector<8xf32>
    %53 = vector.shape_cast %52 : vector<8xf32> to vector<8x1xf32>
    %cst_27 = arith.constant 3.200000e+01 : f32
    %54 = vector.broadcast %cst_27 : f32 to vector<8x1xf32>
    %55 = arith.divf %53, %54 : vector<8x1xf32>
    %56 = vector.broadcast %55 : vector<8x1xf32> to vector<8x32xf32>
    %57 = arith.subf %49, %56 : vector<8x32xf32>
    %58 = arith.mulf %57, %57 : vector<8x32xf32>
    %cst_28 = arith.constant dense<0.000000e+00> : vector<8xf32>
    %59 = vector.multi_reduction <add>, %58, %cst_28 [1] : vector<8x32xf32> to vector<8xf32>
    %60 = vector.shape_cast %59 : vector<8xf32> to vector<8x1xf32>
    %cst_29 = arith.constant 3.200000e+01 : f32
    %61 = vector.broadcast %cst_29 : f32 to vector<8x1xf32>
    %62 = arith.divf %60, %61 : vector<8x1xf32>
    %63 = vector.broadcast %55 : vector<8x1xf32> to vector<8x32xf32>
    %64 = arith.subf %49, %63 : vector<8x32xf32>
    %cst_30 = arith.constant 9.99999974E-6 : f32
    %65 = vector.broadcast %cst_30 : f32 to vector<8x1xf32>
    %66 = arith.addf %62, %65 : vector<8x1xf32>
    %67 = math.rsqrt %66 : vector<8x1xf32>
    %68 = vector.broadcast %67 : vector<8x1xf32> to vector<8x32xf32>
    %69 = arith.mulf %64, %68 : vector<8x32xf32>
    %70 = vector.broadcast %50 : vector<1x32xf32> to vector<8x32xf32>
    %71 = arith.mulf %69, %70 : vector<8x32xf32>
    %72 = vector.broadcast %51 : vector<1x32xf32> to vector<8x32xf32>
    %73 = arith.addf %71, %72 : vector<8x32xf32>
    %74 = arith.truncf %73 : vector<8x32xf32> to vector<8x32xbf16>
    %c0_31 = arith.constant 0 : index
    %c0_32 = arith.constant 0 : index
    %75 = vector.load %arg10[%c0_31, %c0_32] : memref<32x128xbf16, #tpu.memory_space<vmem>>, vector<32x128xbf16>
    %cst_33 = arith.constant dense<0.000000e+00> : vector<8x128xf32>
    %76 = tpu.matmul %74, %75, %cst_33 {dimension_numbers = #tpu.dot_dimension_numbers<[1], [0], [0], [1], [0, 0, 1, 1], [], []>} : vector<8x32xbf16>, vector<32x128xbf16>, vector<8x128xf32> -> vector<8x128xf32>
    %c0_34 = arith.constant 0 : index
    %c0_35 = arith.constant 0 : index
    %77 = vector.load %arg11[%c0_34, %c0_35] : memref<1x128xf32, #tpu.memory_space<vmem>>, vector<1x128xf32>
    %78 = vector.broadcast %77 : vector<1x128xf32> to vector<8x128xf32>
    %79 = arith.addf %76, %78 : vector<8x128xf32>
    %cst_36 = arith.constant 5.000000e-01 : f32
    %80 = vector.broadcast %cst_36 : f32 to vector<8x128xf32>
    %81 = arith.mulf %80, %79 : vector<8x128xf32>
    %cst_37 = arith.constant 4.471500e-02 : f32
    %82 = vector.broadcast %cst_37 : f32 to vector<8x128xf32>
    %83 = arith.mulf %82, %79 : vector<8x128xf32>
    %84 = arith.mulf %83, %79 : vector<8x128xf32>
    %85 = arith.mulf %84, %79 : vector<8x128xf32>
    %86 = arith.addf %79, %85 : vector<8x128xf32>
    %cst_38 = arith.constant 0.797884583 : f32
    %87 = vector.broadcast %cst_38 : f32 to vector<8x128xf32>
    %88 = arith.mulf %87, %86 : vector<8x128xf32>
    %89 = math.tanh %88 : vector<8x128xf32>
    %cst_39 = arith.constant 1.000000e+00 : f32
    %90 = vector.broadcast %cst_39 : f32 to vector<8x128xf32>
    %91 = arith.addf %90, %89 : vector<8x128xf32>
    %92 = arith.mulf %81, %91 : vector<8x128xf32>
    %93 = arith.truncf %92 : vector<8x128xf32> to vector<8x128xbf16>
    %c0_40 = arith.constant 0 : index
    %c0_41 = arith.constant 0 : index
    %94 = vector.load %arg12[%c0_40, %c0_41] : memref<128x32xbf16, #tpu.memory_space<vmem>>, vector<128x32xbf16>
    %cst_42 = arith.constant dense<0.000000e+00> : vector<8x32xf32>
    %95 = tpu.matmul %93, %94, %cst_42 {dimension_numbers = #tpu.dot_dimension_numbers<[1], [0], [0], [1], [0, 0, 1, 1], [], []>} : vector<8x128xbf16>, vector<128x32xbf16>, vector<8x32xf32> -> vector<8x32xf32>
    %c0_43 = arith.constant 0 : index
    %c0_44 = arith.constant 0 : index
    %96 = vector.load %arg13[%c0_43, %c0_44] : memref<1x32xf32, #tpu.memory_space<vmem>>, vector<1x32xf32>
    %97 = vector.broadcast %96 : vector<1x32xf32> to vector<8x32xf32>
    %98 = arith.addf %95, %97 : vector<8x32xf32>
    %c0_45 = arith.constant 0 : index
    %c0_46 = arith.constant 0 : index
    %99 = vector.load %arg14[%c0_45, %c0_46] : memref<1x32xf32, #tpu.memory_space<vmem>>, vector<1x32xf32>
    %c0_47 = arith.constant 0 : index
    %c0_48 = arith.constant 0 : index
    %100 = vector.load %arg15[%c0_47, %c0_48] : memref<1x32xf32, #tpu.memory_space<vmem>>, vector<1x32xf32>
    %cst_49 = arith.constant dense<0.000000e+00> : vector<8xf32>
    %101 = vector.multi_reduction <add>, %98, %cst_49 [1] : vector<8x32xf32> to vector<8xf32>
    %102 = vector.shape_cast %101 : vector<8xf32> to vector<8x1xf32>
    %cst_50 = arith.constant 3.200000e+01 : f32
    %103 = vector.broadcast %cst_50 : f32 to vector<8x1xf32>
    %104 = arith.divf %102, %103 : vector<8x1xf32>
    %105 = vector.broadcast %104 : vector<8x1xf32> to vector<8x32xf32>
    %106 = arith.subf %98, %105 : vector<8x32xf32>
    %107 = arith.mulf %106, %106 : vector<8x32xf32>
    %cst_51 = arith.constant dense<0.000000e+00> : vector<8xf32>
    %108 = vector.multi_reduction <add>, %107, %cst_51 [1] : vector<8x32xf32> to vector<8xf32>
    %109 = vector.shape_cast %108 : vector<8xf32> to vector<8x1xf32>
    %cst_52 = arith.constant 3.200000e+01 : f32
    %110 = vector.broadcast %cst_52 : f32 to vector<8x1xf32>
    %111 = arith.divf %109, %110 : vector<8x1xf32>
    %112 = vector.broadcast %104 : vector<8x1xf32> to vector<8x32xf32>
    %113 = arith.subf %98, %112 : vector<8x32xf32>
    %cst_53 = arith.constant 2.500000e-06 : f32
    %114 = vector.broadcast %cst_53 : f32 to vector<8x1xf32>
    %115 = arith.addf %111, %114 : vector<8x1xf32>
    %116 = math.rsqrt %115 : vector<8x1xf32>
    %117 = vector.broadcast %116 : vector<8x1xf32> to vector<8x32xf32>
    %118 = arith.mulf %113, %117 : vector<8x32xf32>
    %119 = vector.broadcast %99 : vector<1x32xf32> to vector<8x32xf32>
    %120 = arith.mulf %118, %119 : vector<8x32xf32>
    %121 = vector.broadcast %100 : vector<1x32xf32> to vector<8x32xf32>
    %122 = arith.addf %120, %121 : vector<8x32xf32>
    %c0_54 = arith.constant 0 : index
    %c0_55 = arith.constant 0 : index
    %c0_56 = arith.constant 0 : index
    %123 = vector.load %arg16[%c0_54, %c0_55, %c0_56] : memref<1x8x32xf32, #tpu.memory_space<vmem>>, vector<1x8x32xf32>
    %124 = vector.shape_cast %123 : vector<1x8x32xf32> to vector<8x32xf32>
    %125 = vector.shape_cast %122 : vector<8x32xf32> to vector<1x8x32xf32>
    tpu.vector_store %arg16[%c0_54, %c0_55, %c0_56], %125 {strides = array<i32>} : memref<1x8x32xf32, #tpu.memory_space<vmem>>, vector<1x8x32xf32>,
    return
  }
  func.func @transform_0(%arg0: i32, %arg1: i32) -> (i32, i32, i32) {
    %c0_i32 = arith.constant 0 : i32
    %c0_i32_0 = arith.constant 0 : i32
    %c0_i32_1 = arith.constant 0 : i32
    return %arg0, %c0_i32, %c0_i32_0 : i32, i32, i32
  }
  func.func @transform_1(%arg0: i32, %arg1: i32) -> (i32, i32, i32) {
    %c0_i32 = arith.constant 0 : i32
    %c0_i32_0 = arith.constant 0 : i32
    %c0_i32_1 = arith.constant 0 : i32
    return %arg0, %c0_i32, %c0_i32_0 : i32, i32, i32
  }
  func.func @transform_2(%arg0: i32, %arg1: i32) -> (i32, i32) {
    %c0_i32 = arith.constant 0 : i32
    %c0_i32_0 = arith.constant 0 : i32
    %c0_i32_1 = arith.constant 0 : i32
    return %c0_i32, %c0_i32_0 : i32, i32
  }
  func.func @transform_3(%arg0: i32, %arg1: i32) -> (i32, i32) {
    %c0_i32 = arith.constant 0 : i32
    %c0_i32_0 = arith.constant 0 : i32
    %c0_i32_1 = arith.constant 0 : i32
    return %c0_i32, %c0_i32_0 : i32, i32
  }
  func.func @transform_4(%arg0: i32, %arg1: i32) -> (i32, i32) {
    %c0_i32 = arith.constant 0 : i32
    %c0_i32_0 = arith.constant 0 : i32
    %c0_i32_1 = arith.constant 0 : i32
    return %c0_i32, %c0_i32_0 : i32, i32
  }
  func.func @transform_5(%arg0: i32, %arg1: i32) -> (i32, i32) {
    %c0_i32 = arith.constant 0 : i32
    %c0_i32_0 = arith.constant 0 : i32
    %c0_i32_1 = arith.constant 0 : i32
    return %c0_i32, %c0_i32_0 : i32, i32
  }
  func.func @transform_6(%arg0: i32, %arg1: i32) -> (i32, i32) {
    %c0_i32 = arith.constant 0 : i32
    %c0_i32_0 = arith.constant 0 : i32
    %c0_i32_1 = arith.constant 0 : i32
    return %c0_i32, %c0_i32_0 : i32, i32
  }
  func.func @transform_7(%arg0: i32, %arg1: i32) -> (i32, i32) {
    %c0_i32 = arith.constant 0 : i32
    %c0_i32_0 = arith.constant 0 : i32
    %c0_i32_1 = arith.constant 0 : i32
    return %c0_i32, %c0_i32_0 : i32, i32
  }
  func.func @transform_8(%arg0: i32, %arg1: i32) -> (i32, i32) {
    %c0_i32 = arith.constant 0 : i32
    %c0_i32_0 = arith.constant 0 : i32
    %c0_i32_1 = arith.constant 0 : i32
    return %c0_i32, %c0_i32_0 : i32, i32
  }
  func.func @transform_9(%arg0: i32, %arg1: i32) -> (i32, i32) {
    %c0_i32 = arith.constant 0 : i32
    %c0_i32_0 = arith.constant 0 : i32
    %c0_i32_1 = arith.constant 0 : i32
    return %c0_i32, %c0_i32_0 : i32, i32
  }
  func.func @transform_10(%arg0: i32, %arg1: i32) -> (i32, i32) {
    %c0_i32 = arith.constant 0 : i32
    %c0_i32_0 = arith.constant 0 : i32
    %c0_i32_1 = arith.constant 0 : i32
    return %c0_i32, %c0_i32_0 : i32, i32
  }
  func.func @transform_11(%arg0: i32, %arg1: i32) -> (i32, i32) {
    %c0_i32 = arith.constant 0 : i32
    %c0_i32_0 = arith.constant 0 : i32
    %c0_i32_1 = arith.constant 0 : i32
    return %c0_i32, %c0_i32_0 : i32, i32
  }
  func.func @transform_12(%arg0: i32, %arg1: i32) -> (i32, i32) {
    %c0_i32 = arith.constant 0 : i32
    %c0_i32_0 = arith.constant 0 : i32
    %c0_i32_1 = arith.constant 0 : i32
    return %c0_i32, %c0_i32_0 : i32, i32
  }
  func.func @transform_13(%arg0: i32, %arg1: i32) -> (i32, i32) {
    %c0_i32 = arith.constant 0 : i32
    %c0_i32_0 = arith.constant 0 : i32
    %c0_i32_1 = arith.constant 0 : i32
    return %c0_i32, %c0_i32_0 : i32, i32
  }
  func.func @transform_14(%arg0: i32, %arg1: i32) -> (i32, i32, i32) {
    %c0_i32 = arith.constant 0 : i32
    %c0_i32_0 = arith.constant 0 : i32
    return %arg0, %arg1, %c0_i32 : i32, i32, i32
  }
}

</mosaic_0001>

<bundles_post_ra>
// kernel: tpu_custom_call.1
= control target key start
LH: loop header
LB: loop body
LE: loop exit
PB: predicated region body
PF: predicated region fallthrough
CT: control target
= control target key end

     0   :  { %s2379_s0 = inlined_call_operand.vmem [shape: f32[2,8,32], index: 0, kind: input, shape index: {}]   ;;  %s2380_s1 = inlined_call_operand.vmem [shape: s8[2,1,8], index: 1, kind: input, shape index: {}]   ;;  %s2381_s2 = inlined_call_operand.vmem [shape: bf16[32,96], index: 2, kind: input, shape index: {}]   ;;  %s2382_s3 = inlined_call_operand.vmem [shape: f32[1,96], index: 3, kind: input, shape index: {}]   ;;  %s2383_s4 = inlined_call_operand.vmem [shape: bf16[32,32], index: 4, kind: input, shape index: {}]   ;;  %s2384_s5 = inlined_call_operand.vmem [shape: f32[1,32], index: 5, kind: input, shape index: {}]   ;;  %s2385_s6 = inlined_call_operand.vmem [shape: f32[1,32], index: 6, kind: input, shape index: {}]   ;;  %s2386_s7 = inlined_call_operand.vmem [shape: f32[1,32], index: 7, kind: input, shape index: {}]   ;;  %s2387_s8 = inlined_call_operand.vmem [shape: bf16[32,128], index: 8, kind: input, shape index: {}]   ;;  %s2388_s9 = inlined_call_operand.vmem [shape: f32[1,128], index: 9, kind: input, shape index: {}]   ;;  %s2389_s10 = inlined_call_operand.vmem [shape: bf16[128,32], index: 10, kind: input, shape index: {}]   ;;  %s2390_s11 = inlined_call_operand.vmem [shape: f32[1,32], index: 11, kind: input, shape index: {}]   ;;  %s2391_s12 = inlined_call_operand.vmem [shape: f32[1,32], index: 12, kind: input, shape index: {}]   ;;  %s2392_s13 = inlined_call_operand.vmem [shape: f32[1,32], index: 13, kind: input, shape index: {}]   ;;  %s2393_s14 = inlined_call_operand.hbm [shape: f32[2,8,32], index: 14, kind: output, shape index: {}]  }
   0x1   :  { %2396 = sst [smem:[#allocation11_spill]] %s2379_s0 }
   0x2   :  { %2397 = sst [smem:[#allocation12_spill]] %s2380_s1 }
   0x3   :  { %2398 = sst [smem:[#allocation13_spill]] %s2381_s2 }
   0x4   :  { %19 = vsyncpa [#allocation6], 0 }
   0x5   :  { %21 = vsyncpa [#allocation6 + $0x1], 0  ;;  %s1995_s29 = smov 0   ;;  %s1997_s30 = smov 0  }
   0x6   :  { %s1999_s15 = smov 0   ;;  %s2001_s16 = smov 0  }
   0x7   :  { %s2003_s17 = smov 0   ;;  %s2005_s18 = smov 0  }
   0x8 LB: > { %2399 = sst [smem:[#allocation8_spill]] %s1902_s17  ;;  %s1637_s19 = sadd.s32 4294967295, %s1906_s18   ;;  %s1906_s18 = sphi %s2005_s18, %s27_s18   ;;  %s1902_s17 = sphi %s2003_s17, %s2409_s17   ;;  %s1898_s16 = sphi %s2001_s16, %s2408_s16   ;;  %s1894_s15 = sphi %s1999_s15, %s2412_s15   ;;  %s1890_s30 = sphi %s1997_s30, %s2411_s30   ;;  %s1886_s29 = sphi %s1995_s29, %s2410_s29  }
   0x9   : > { %s1638_s20 = sadd.s32 4294967294, %s1906_s18   ;;  %s39_s21 = sadd.s32 1, %s1902_s17 }
   0xa   : > { %s352_s22 = sadd.s32 1, %s1894_s15  ;;  %p41_p0 = scmp.ge.s32.totalorder %s39_s21, 2 }
   0xb   : > { %p362_p1 = scmp.ne.s32.totalorder %s1894_s15, %s1890_s30  ;;  %p363_p2 = scmp.eq.s32.totalorder %s1637_s19, 1 }
   0xc   : > { %p368_p3 = scmp.ne.s32.totalorder %s1890_s30, %s1886_s29  ;;  %s2414_s21 = smov (%p41_p0, %s39_s21), 0 }
   0xd   : > { %2400 = sst [smem:[#allocation9_spill]] %s2414_s21  ;;  %p2035_p4 = por %p363_p2, %p362_p1 }
   0xe   : > { %p369_p5 = scmp.eq.s32.totalorder %s1638_s20, 1  ;;  %s347_s24 = ssub.s32 %s1902_s17, %s2414_s21 }
   0xf   : > { %p1641_p6 = scmp.ge.s32.totalorder %s1906_s18, 1  ;;  %p350_p7 = scmp.eq.s32.totalorder %s347_s24, 0 }
  0x10   : > { %p2042_p8 = por %p369_p5, %p368_p3  ;;  %p436_p9 = scmp.lt.s32.totalorder %s1906_s18, 3 }
  0x11   : > { %s2048_s26 = scalar_select %p350_p7, %s1894_s15, %s352_s22  }
  0x12   : > { %p437_p10 = pnand %p1641_p6, %p436_p9 }
  0x13   : > { %2403 = sst [smem:[#allocation10_spill]] %s2048_s26  ;;  %p484_p11 = scmp.lt.s32.totalorder (!%p437_p10), %s1898_s16, 1 }
  0x14   : > { %440 = sbr.rel (%p437_p10) target bundleno = 2075 (0x81b), region = 76  ;;  %s2404_s2 = sld [smem:[#allocation13_spill]] (!%p437_p10) }
  0x15   : > { %s2405_s0 = sld [smem:[#allocation11_spill]] (!%p437_p10)  ;;  %s1908_s19 = smov (!%p437_p10), 104  }
  0x16   : > { %s1909_s17 = smov (!%p437_p10), 120   ;;  %s1912_s20 = smov (!%p437_p10), 64  }
  0x17   : > { %s2406_s1 = sld [smem:[#allocation12_spill]] (!%p437_p10) }
  0x19   : > { %s2058_s24 = scalar_select %p484_p11, %s1898_s16, 1  ;;  %vm520_vm0 = vcmask 261120   ;;  %v1796_v4 = vld [vmem:[%s2382_s3] ss:$0 sm:$0xff]  ;;  %v1913_v9 = vmov 1983009808  }
  0x1a   : > { %v1716_v0 = vld [vmem:[%s2404_s2 + $0x8] sm:$0xff]  ;;  %v1715_v1 = vld [vmem:[%s2404_s2] sm:$0xff]  ;;  %v559_v10 = vunpack.c.l.s4 %v1913_v9  ;;  %v1914_v18 = vmov 1934713408   ;;  %vm568_vm1 = vcmask 1047556   ;;  %vm664_vm2 = vcmask 60416  }
  0x1b   : > { %530 = vmatpush.bf16.msra.mxu0 %v1716_v0  ;;  %s1643_s21 = sshll.u32 %s2058_s24, 3  ;;  %v573_v19 = vunpack.c.l.s4 %v1914_v18  ;;  %vm946_vm3 = vcmask 64512   ;;  %vm1086_vm7 = vcmask 1043456   ;;  %vm1294_vm8 = vcmask 130048  }
  0x1c   : > { %s487_s26 = scalar_lea.vmem %s2405_s0, %s1643_s21  ;;  %s1910_s21 = smov 96   ;;  %v2080_v14 = vunpack.c.0.s8 %v559_v10  ;;  %vm1297_vm9 = vcmask 195584  }
  0x1d   : > { %v2064_v2 = vld [vmem:[%s487_s26] sm:$0xff]  ;;  %s1911_s26 = smov 112   ;;  %v2092_v26 = vunpack.c.0.s8 %v573_v19  ;;  %s490_s28 = scalar_lea.vmem %s2406_s1, %s2058_s24 }
  0x1e   : > { %v499_v3 = vpack.c.bf16 %v2064_v2, %v2064_v2  ;;  %s1916_s24 = smov 8  }
  0x1f   : > { %531 = vmatpush.bf16.msra.mxu0 %v1715_v1 }
  0x22   : > { %1652 = vmatmul.msk.bf16.vlgmr.msra.gmra.mxu0 %vm520_vm0, %v499_v3 }
  0x9f   : > { %v533_v5 = vpop.f32.mrf.mxu0 }
  0xa0   : > { %v534_v6 = vadd.f32 %v1796_v4, %v533_v5 }
  0xa2   : > { %v537_v7 = vpack.c.bf16 %v534_v6, %v534_v6 }
  0xa4   : > { %543 = vrot.lane.b32.xlu1 %v537_v7, %s1908_s19  ;;  %539 = vrot.lane.b32.xlu0 %v537_v7, %s1909_s17  ;;  %v548_v16 = vshrl.u32 %v537_v7, 16  ;;  %s1917_s19 = smov 16   ;;  %s1918_s17 = smov 24  }
  0xa7   : > { %v535_v8 = vpop.f32.mrf.mxu0 }
  0xac   : > { %669 = vrot.lane.b32.xlu1 %v537_v7, %s1910_s21  ;;  %541 = vrot.lane.b32.xlu0 %v537_v7, %s1911_s26 }
  0xb4   : > { %799 = vrot.lane.b32.xlu1 %v537_v7, %s1912_s20 }
 0x116   : > { %v2073_v11 = vpop.permute.xlu1 %543  ;;  %v2075_v12 = vpop.permute.xlu0 %539 }
 0x117   : > { %v549_v13 = vshrl.u32 %v2075_v12, 16  ;;  %675 = vrot.lane.b32.xlu0 %v2073_v11, %s1910_s21  ;;  %671 = vrot.lane.b32.xlu2 %v2075_v12, %s1910_s21  ;;  %v547_v15 = vpack.i.b16 %v2075_v12, %v537_v7  ;;  %v555_v22 = vshrl.u32 %v2073_v11, 16 }
 0x119   : > { %v550_v17 = vpack.i.b16 %v549_v13, %v548_v16  ;;  %v561_v20 = vperm.slane %v547_v15, %v2080_v14 }
 0x11b   : > { %v588_v23 = vperm.slane %v550_v17, %v2080_v14  ;;  %v570_v27 = vrot.slane %v561_v20, 4 }
 0x11d   : > { %v596_v30 = vrot.slane %v588_v23, 4 }
 0x11e   : > { %v2084_v21 = vpop.permute.xlu0 %541  ;;  %v670_v19 = vpop.permute.xlu1 %669 }
 0x11f   : > { %v553_v24 = vpack.i.b16 %v2073_v11, %v2084_v21  ;;  %v554_v25 = vshrl.u32 %v2084_v21, 16  ;;  %673 = vrot.lane.b32.xlu2 %v2084_v21, %s1910_s21 }
 0x121   : > { %v556_v28 = vpack.i.b16 %v555_v22, %v554_v25  ;;  %v566_v29 = vperm.slane %v553_v24, %v2080_v14  ;;  %v680_v22 = vshrl.u32 %v670_v19, 16 }
 0x123   : > { %v567_v31 = vrot.slane %v566_v29, 4  ;;  %v571_v32 = vsel %vm568_vm1, %v566_v29, %v570_v27  ;;  %v593_v33 = vperm.slane %v556_v28, %v2080_v14 }
 0x124   : > { %v579_v34 = vperm.slane %v571_v32, %v2092_v26 }
 0x125   : > { %v569_v35 = vsel %vm568_vm1, %v567_v31, %v561_v20  ;;  %v594_v36 = vrot.slane %v593_v33, 4  ;;  %v597_v37 = vsel %vm568_vm1, %v593_v33, %v596_v30 }
 0x126   : > { %v575_v38 = vperm.slane %v569_v35, %v2092_v26  ;;  %v582_v39 = vrot.slane %v579_v34, 4  ;;  %v605_v40 = vperm.slane %v597_v37, %v2092_v26 }
 0x127   : > { %v595_v41 = vsel %vm568_vm1, %v594_v36, %v588_v23 }
 0x128   : > { %v580_v42 = vrot.slane %v575_v38, 4  ;;  %v583_v43 = vsel %vm568_vm1, 0, %v582_v39  ;;  %v601_v44 = vperm.slane %v595_v41, %v2092_v26  ;;  %v608_v45 = vrot.slane %v605_v40, 4 }
 0x129   : > { %v615_v46 = vrot.slane %v583_v43, 4  ;;  %v610_v50 = vsel %vm568_vm1, %v582_v39, %v575_v38 }
 0x12a   : > { %v581_v47 = vsel %vm568_vm1, 0, %v580_v42  ;;  %v606_v48 = vrot.slane %v601_v44, 4  ;;  %v609_v49 = vsel %vm568_vm1, 0, %v608_v45  ;;  %v629_v55 = vsel %vm568_vm1, %v608_v45, %v601_v44 }
 0x12b   : > { %v616_v51 = vsel %vm568_vm1, %v615_v46, %v581_v47  ;;  %v634_v52 = vrot.slane %v609_v49, 4  ;;  %v614_v57 = vperm.slane %v610_v50, %v2080_v14  ;;  %v633_v61 = vperm.slane %v629_v55, %v2080_v14 }
 0x12c   : > { %v607_v53 = vsel %vm568_vm1, 0, %v606_v48  ;;  %v620_v54 = vperm.slane %v616_v51, %v2080_v14 }
 0x12d   : > { %v635_v56 = vsel %vm568_vm1, %v634_v52, %v607_v53 }
 0x12e   : > { %v621_v58 = vrot.slane %v620_v54, 4  ;;  %v639_v59 = vperm.slane %v635_v56, %v2080_v14 }
 0x130   : > { %v622_v60 = vsel %vm568_vm1, %v621_v58, %v614_v57  ;;  %v640_v62 = vrot.slane %v639_v59, 4 }
 0x131   : > { %v626_v63 = vperm.slane %v622_v60, %v2092_v26 }
 0x132   : > { %v641_v0 = vsel %vm568_vm1, %v640_v62, %v633_v61 }
 0x133   : > { %v627_v1 = vrot.slane %v626_v63, 4  ;;  %v645_v3 = vperm.slane %v641_v0, %v2092_v26  ;;  %v652_v4 = vshrl.u32 %v626_v63, 16 }
 0x135   : > { %v628_v5 = vsel %vm568_vm1, 0, %v627_v1  ;;  %v646_v6 = vrot.slane %v645_v3, 4  ;;  %v650_v7 = vpack.i.b16 %v645_v3, %v626_v63  ;;  %v653_v8 = vshrl.u32 %v645_v3, 16 }
 0x136   : > { %v660_v15 = vshrl.u32 %v628_v5, 16 }
 0x137   : > { %v647_v9 = vsel %vm568_vm1, 0, %v646_v6  ;;  %v654_v10 = vpack.i.b16 %v653_v8, %v652_v4  ;;  %665 = vst.msk [vmem:[#allocation2] sm:$0xf] %vm664_vm2, %v650_v7 }
 0x138   : > { %v658_v13 = vpack.i.b16 %v647_v9, %v628_v5  ;;  %v661_v16 = vshrl.u32 %v647_v9, 16 }
 0x139   : > { %666 = vst.msk [vmem:[#allocation2 + $0x4] sm:$0xf] %vm664_vm2, %v654_v10 }
 0x13a   : > { %v662_v17 = vpack.i.b16 %v661_v16, %v660_v15  ;;  %667 = vst.msk [vmem:[#allocation2 + $0x8] sm:$0xf] %vm664_vm2, %v658_v13 }
 0x13c   : > { %668 = vst.msk [vmem:[#allocation2 + $0xc] sm:$0xf] %vm664_vm2, %v662_v17 }
 0x171   : > { %v672_v18 = vpop.permute.xlu2 %671 }
 0x172   : > { %v681_v20 = vshrl.u32 %v672_v18, 16  ;;  %v679_v23 = vpack.i.b16 %v672_v18, %v670_v19 }
 0x174   : > { %v682_v24 = vpack.i.b16 %v681_v20, %v680_v22  ;;  %v693_v27 = vperm.slane %v679_v23, %v2080_v14 }
 0x176   : > { %v719_v29 = vperm.slane %v682_v24, %v2080_v14  ;;  %v701_v33 = vrot.slane %v693_v27, 4 }
 0x178   : > { %v727_v36 = vrot.slane %v719_v29, 4 }
 0x179   : > { %v674_v25 = vpop.permute.xlu2 %673 }
 0x17a   : > { %v686_v30 = vshrl.u32 %v674_v25, 16 }
 0x189   : > { %v676_v28 = vpop.permute.xlu0 %675 }
 0x18a   : > { %v685_v31 = vpack.i.b16 %v676_v28, %v674_v25  ;;  %v687_v32 = vshrl.u32 %v676_v28, 16 }
 0x18c   : > { %v688_v34 = vpack.i.b16 %v687_v32, %v686_v30  ;;  %v698_v35 = vperm.slane %v685_v31, %v2080_v14 }
 0x18e   : > { %v699_v37 = vrot.slane %v698_v35, 4  ;;  %v702_v38 = vsel %vm568_vm1, %v698_v35, %v701_v33  ;;  %v724_v39 = vperm.slane %v688_v34, %v2080_v14  ;;  %v934_v34 = vld [vmem:[#allocation2] sm:$0xf]  ;;  %v935_v35 = vld [vmem:[#allocation2 + $0x4] sm:$0xf] }
 0x18f   : > { %v710_v40 = vperm.slane %v702_v38, %v2092_v26  ;;  %v1023_v38 = vld [vmem:[%s490_s28] sm:$0x1]  ;;  %s481_s28 = sand.u32 1, %s1890_s30  }
 0x190   : > { %v700_v41 = vsel %vm568_vm1, %v699_v37, %v693_v27  ;;  %v725_v42 = vrot.slane %v724_v39, 4  ;;  %v728_v43 = vsel %vm568_vm1, %v724_v39, %v727_v36  ;;  %v936_v36 = vld [vmem:[#allocation2 + $0x8] sm:$0xf]  ;;  %v937_v37 = vld [vmem:[#allocation2 + $0xc] sm:$0xf]  ;;  %vm1024_vm4 = vnez %v1023_v38 }
 0x191   : > { %v706_v44 = vperm.slane %v700_v41, %v2092_v26  ;;  %v713_v45 = vrot.slane %v710_v40, 4  ;;  %v736_v46 = vperm.slane %v728_v43, %v2092_v26  ;;  %v1915_v39 = vmov 0  }
 0x192   : > { %v726_v47 = vsel %vm568_vm1, %v725_v42, %v719_v29  ;;  %v1025_v40 = vsel %vm1024_vm4, 16843009, %v1915_v39 }
 0x193   : > { %v711_v48 = vrot.slane %v706_v44, 4  ;;  %v714_v49 = vsel %vm568_vm1, 0, %v713_v45  ;;  %v732_v50 = vperm.slane %v726_v47, %v2092_v26  ;;  %v739_v51 = vrot.slane %v736_v46, 4 }
 0x194   : > { %v746_v52 = vrot.slane %v714_v49, 4  ;;  %v741_v56 = vsel %vm568_vm1, %v713_v45, %v706_v44  ;;  %v1026_v41 = vunpack.c.0.s8 %v1025_v40 }
 0x195   : > { %v712_v53 = vsel %vm568_vm1, 0, %v711_v48  ;;  %v737_v54 = vrot.slane %v732_v50, 4  ;;  %v740_v55 = vsel %vm568_vm1, 0, %v739_v51  ;;  %v760_v61 = vsel %vm568_vm1, %v739_v51, %v732_v50 }
 0x196   : > { %v747_v57 = vsel %vm568_vm1, %v746_v52, %v712_v53  ;;  %v765_v58 = vrot.slane %v740_v55, 4  ;;  %v745_v63 = vperm.slane %v741_v56, %v2080_v14  ;;  %v764_v4 = vperm.slane %v760_v61, %v2080_v14 }
 0x197   : > { %v738_v59 = vsel %vm568_vm1, 0, %v737_v54  ;;  %v751_v60 = vperm.slane %v747_v57, %v2080_v14  ;;  %vm1027_vm5 = vcmp.ne.s32.totalorder %v1026_v41, 0 }
 0x198   : > { %v766_v62 = vsel %vm568_vm1, %v765_v58, %v738_v59  ;;  %v1028_v42 = vsel %vm1027_vm5, 1, %v1915_v39 }
 0x199   : > { %v752_v0 = vrot.slane %v751_v60, 4  ;;  %v770_v1 = vperm.slane %v766_v62, %v2080_v14  ;;  %v1029_v43 = vperm.slane %v1028_v42, 0  ;;  %v800_v60 = vpop.permute.xlu1 %799 }
 0x19b   : > { %v753_v3 = vsel %vm568_vm1, %v752_v0, %v745_v63  ;;  %v771_v5 = vrot.slane %v770_v1, 4  ;;  %vm1030_vm6 = vcmp.eq.s32.totalorder %v1029_v43, 1 }
 0x19c   : > { %v757_v6 = vperm.slane %v753_v3, %v2092_v26 }
 0x19d   : > { %v772_v7 = vsel %vm568_vm1, %v771_v5, %v764_v4 }
 0x19e   : > { %v758_v8 = vrot.slane %v757_v6, 4  ;;  %v776_v9 = vperm.slane %v772_v7, %v2092_v26  ;;  %v783_v10 = vshrl.u32 %v757_v6, 16 }
 0x1a0   : > { %v759_v13 = vsel %vm568_vm1, 0, %v758_v8  ;;  %v777_v15 = vrot.slane %v776_v9, 4  ;;  %v781_v16 = vpack.i.b16 %v776_v9, %v757_v6  ;;  %v784_v17 = vshrl.u32 %v776_v9, 16 }
 0x1a1   : > { %v791_v22 = vshrl.u32 %v759_v13, 16 }
 0x1a2   : > { %v778_v18 = vsel %vm568_vm1, 0, %v777_v15  ;;  %v785_v19 = vpack.i.b16 %v784_v17, %v783_v10  ;;  %795 = vst.msk [vmem:[#allocation3] sm:$0xf] %vm664_vm2, %v781_v16 }
 0x1a3   : > { %v789_v20 = vpack.i.b16 %v778_v18, %v759_v13  ;;  %v792_v23 = vshrl.u32 %v778_v18, 16 }
 0x1a4   : > { %796 = vst.msk [vmem:[#allocation3 + $0x4] sm:$0xf] %vm664_vm2, %v785_v19  ;;  %v810_v19 = vshrl.u32 %v800_v60, 16 }
 0x1a5   : > { %v793_v24 = vpack.i.b16 %v792_v23, %v791_v22  ;;  %797 = vst.msk [vmem:[#allocation3 + $0x8] sm:$0xf] %vm664_vm2, %v789_v20 }
 0x1a7   : > { %798 = vst.msk [vmem:[#allocation3 + $0xc] sm:$0xf] %vm664_vm2, %v793_v24 }
 0x1a9   : > { %v938_v25 = vld [vmem:[#allocation3] sm:$0xf] }
 0x1aa   : > { %v951_v27 = vsel %vm946_vm3, %v938_v25, 0 }
 0x1ab   : > { %960 = vmatpush.bf16.xpose.msra.mxu1 %v951_v27  ;;  %v939_v28 = vld [vmem:[#allocation3 + $0x4] sm:$0xf] }
 0x1ac   : > { %v970_v29 = vsel %vm946_vm3, %v939_v28, 0  ;;  %v940_v30 = vld [vmem:[#allocation3 + $0x8] sm:$0xf] }
 0x1ad   : > { %979 = vmatpush.bf16.xpose.msra.mxu2 %v970_v29  ;;  %v989_v31 = vsel %vm946_vm3, %v940_v30, 0 }
 0x1ae   : > { %998 = vmatpush.bf16.xpose.msra.mxu3 %v989_v31  ;;  %v941_v32 = vld [vmem:[#allocation3 + $0xc] sm:$0xf] }
 0x1af   : > { %v1008_v33 = vsel %vm946_vm3, %v941_v32, 0 }
 0x1b0   : > { %1017 = vmatpush.bf16.xpose.msrb.mxu0 %v1008_v33 }
 0x1b2   : > { %1653 = vmatmul.msk.bf16.vlgmr.msra.gmra.mxu1 %vm946_vm3, %v934_v34 }
 0x1b4   : > { %1654 = vmatmul.msk.bf16.vlgmr.msra.gmra.mxu2 %vm946_vm3, %v935_v35 }
 0x1b5   : > { %1655 = vmatmul.msk.bf16.vlgmr.msra.gmra.mxu3 %vm946_vm3, %v936_v36 }
 0x1b7   : > { %1656 = vmatmul.msk.bf16.vlgmr.msrb.gmra.mxu0 %vm946_vm3, %v937_v37 }
 0x22f   : > { %v962_v44 = vpop.f32.mrf.mxu1 }
 0x230   : > { %v1031_v45 = vsel %vm1030_vm6, %v962_v44, -65504.0 }
 0x231   : > { %v1035_v46 = vsel %vm946_vm3, %v1031_v45, -inf }
 0x232   : > { %1036 = vmax.xlane.f32.xlu0 %v1035_v46 }
 0x234   : > { %v1019_v47 = vpop.f32.mrf.mxu0 }
 0x235   : > { %v1034_v48 = vsel %vm1030_vm6, %v1019_v47, -65504.0 }
 0x236   : > { %v1044_v49 = vsel %vm946_vm3, %v1034_v48, -inf }
 0x237   : > { %v964_v50 = vpop.f32.mrf.mxu1  ;;  %v981_v51 = vpop.f32.mrf.mxu2  ;;  %1045 = vmax.xlane.f32.xlu2 %v1044_v49 }
 0x238   : > { %v1032_v52 = vsel %vm1030_vm6, %v981_v51, -65504.0  ;;  %v1000_v53 = vpop.f32.mrf.mxu3 }
 0x239   : > { %v1038_v54 = vsel %vm946_vm3, %v1032_v52, -inf  ;;  %v1033_v55 = vsel %vm1030_vm6, %v1000_v53, -65504.0 }
 0x23a   : > { %1039 = vmax.xlane.f32.xlu1 %v1038_v54  ;;  %v1041_v57 = vsel %vm946_vm3, %v1033_v55, -inf }
 0x23c   : > { %v1021_v56 = vpop.f32.mrf.mxu0 }
 0x23f   : > { %v983_v58 = vpop.f32.mrf.mxu2  ;;  %1042 = vmax.xlane.f32.xlu2 %v1041_v57 }
 0x240   : > { %v1002_v59 = vpop.f32.mrf.mxu3 }
 0x246   : > { %803 = vrot.lane.b32.xlu0 %v2084_v21, %s1912_s20 }
 0x253   : > { %805 = vrot.lane.b32.xlu1 %v2073_v11, %s1912_s20 }
 0x257   : > { %801 = vrot.lane.b32.xlu2 %v2075_v12, %s1912_s20 }
 0x2a5   : > { %v1037_v61 = vpop.xlane.xlu0 %1036 }
 0x2a6   : > { %v1047_v62 = vsub.f32 %v1031_v45, %v1037_v61 }
 0x2a8   : > { %v1051_v63 = vmul.f32 1.442695, %v1047_v62 }
 0x2aa   : > { %1804 = vpow2.f32 %v1051_v63  ;;  %v1046_v0 = vpop.xlane.xlu2 %1045 }
 0x2ab   : > { %v1050_v5 = vsub.f32 %v1034_v48, %v1046_v0 }
 0x2ad   : > { %v1040_v1 = vpop.xlane.xlu1 %1039  ;;  %v1057_v12 = vmul.f32 1.442695, %v1050_v5 }
 0x2ae   : > { %v1048_v3 = vsub.f32 %v1032_v52, %v1040_v1 }
 0x2b0   : > { %v2182_v4 = vpop.eup %1804  ;;  %v1053_v6 = vmul.f32 1.442695, %v1048_v3 }
 0x2b1   : > { %v1059_v21 = vsel %vm946_vm3, %v2182_v4, 0.0 }
 0x2b2   : > { %1806 = vpow2.f32 %v1053_v6  ;;  %1060 = vadd.xlane.f32.xlu1 %v1059_v21  ;;  %v1043_v11 = vpop.xlane.xlu2 %1042 }
 0x2b3   : > { %v1049_v7 = vsub.f32 %v1033_v55, %v1043_v11 }
 0x2b5   : > { %v1055_v8 = vmul.f32 1.442695, %v1049_v7 }
 0x2b7   : > { %1808 = vpow2.f32 %v1055_v8 }
 0x2b8   : > { %v2186_v9 = vpop.eup %1806  ;;  %1810 = vpow2.f32 %v1057_v12  ;;  %v804_v24 = vpop.permute.xlu0 %803 }
 0x2b9   : > { %v1062_v10 = vsel %vm946_vm3, %v2186_v9, 0.0  ;;  %v816_v28 = vshrl.u32 %v804_v24, 16 }
 0x2ba   : > { %1063 = vadd.xlane.f32.xlu0 %v1062_v10  ;;  %v802_v13 = vpop.permute.xlu2 %801 }
 0x2bb   : > { %v811_v17 = vshrl.u32 %v802_v13, 16  ;;  %v809_v20 = vpack.i.b16 %v802_v13, %v800_v60 }
 0x2bd   : > { %v2190_v15 = vpop.eup %1808  ;;  %v812_v23 = vpack.i.b16 %v811_v17, %v810_v19  ;;  %v823_v25 = vperm.slane %v809_v20, %v2080_v14 }
 0x2be   : > { %v2192_v16 = vpop.eup %1810  ;;  %v1065_v18 = vsel %vm946_vm3, %v2190_v15, 0.0 }
 0x2bf   : > { %1066 = vadd.xlane.f32.xlu2 %v1065_v18  ;;  %v1068_v22 = vsel %vm946_vm3, %v2192_v16, 0.0  ;;  %v849_v29 = vperm.slane %v812_v23, %v2080_v14  ;;  %v831_v32 = vrot.slane %v823_v25, 4 }
 0x2c1   : > { %v857_v35 = vrot.slane %v849_v29, 4 }
 0x2c2   : > { %1069 = vadd.xlane.f32.xlu0 %v1068_v22 }
 0x2c5   : > { %v806_v27 = vpop.permute.xlu1 %805 }
 0x2c6   : > { %v815_v30 = vpack.i.b16 %v806_v27, %v804_v24  ;;  %v817_v31 = vshrl.u32 %v806_v27, 16 }
 0x2c8   : > { %v818_v33 = vpack.i.b16 %v817_v31, %v816_v28  ;;  %v828_v34 = vperm.slane %v815_v30, %v2080_v14 }
 0x2ca   : > { %v829_v36 = vrot.slane %v828_v34, 4  ;;  %v832_v37 = vsel %vm568_vm1, %v828_v34, %v831_v32  ;;  %v854_v38 = vperm.slane %v818_v33, %v2080_v14 }
 0x2cb   : > { %v840_v39 = vperm.slane %v832_v37, %v2092_v26 }
 0x2cc   : > { %v830_v40 = vsel %vm568_vm1, %v829_v36, %v823_v25  ;;  %v855_v41 = vrot.slane %v854_v38, 4  ;;  %v858_v42 = vsel %vm568_vm1, %v854_v38, %v857_v35 }
 0x2cd   : > { %v836_v43 = vperm.slane %v830_v40, %v2092_v26  ;;  %v843_v44 = vrot.slane %v840_v39, 4  ;;  %v866_v45 = vperm.slane %v858_v42, %v2092_v26 }
 0x2ce   : > { %v856_v46 = vsel %vm568_vm1, %v855_v41, %v849_v29 }
 0x2cf   : > { %v841_v47 = vrot.slane %v836_v43, 4  ;;  %v844_v48 = vsel %vm568_vm1, 0, %v843_v44  ;;  %v862_v49 = vperm.slane %v856_v46, %v2092_v26  ;;  %v869_v50 = vrot.slane %v866_v45, 4 }
 0x2d0   : > { %v876_v51 = vrot.slane %v844_v48, 4  ;;  %v871_v55 = vsel %vm568_vm1, %v843_v44, %v836_v43 }
 0x2d1   : > { %v842_v52 = vsel %vm568_vm1, 0, %v841_v47  ;;  %v867_v53 = vrot.slane %v862_v49, 4  ;;  %v870_v54 = vsel %vm568_vm1, 0, %v869_v50  ;;  %v890_v60 = vsel %vm568_vm1, %v869_v50, %v862_v49 }
 0x2d2   : > { %v877_v56 = vsel %vm568_vm1, %v876_v51, %v842_v52  ;;  %v895_v57 = vrot.slane %v870_v54, 4  ;;  %v875_v62 = vperm.slane %v871_v55, %v2080_v14  ;;  %v894_v3 = vperm.slane %v890_v60, %v2080_v14 }
 0x2d3   : > { %v868_v58 = vsel %vm568_vm1, 0, %v867_v53  ;;  %v881_v59 = vperm.slane %v877_v56, %v2080_v14 }
 0x2d4   : > { %v896_v61 = vsel %vm568_vm1, %v895_v57, %v868_v58 }
 0x2d5   : > { %v882_v63 = vrot.slane %v881_v59, 4  ;;  %v900_v0 = vperm.slane %v896_v61, %v2080_v14 }
 0x2d7   : > { %v883_v1 = vsel %vm568_vm1, %v882_v63, %v875_v62  ;;  %v901_v5 = vrot.slane %v900_v0, 4 }
 0x2d8   : > { %v887_v6 = vperm.slane %v883_v1, %v2092_v26 }
 0x2d9   : > { %v902_v21 = vsel %vm568_vm1, %v901_v5, %v894_v3 }
 0x2da   : > { %v888_v11 = vrot.slane %v887_v6, 4  ;;  %v906_v7 = vperm.slane %v902_v21, %v2092_v26  ;;  %v913_v12 = vshrl.u32 %v887_v6, 16 }
 0x2dc   : > { %v889_v8 = vsel %vm568_vm1, 0, %v888_v11  ;;  %v907_v10 = vrot.slane %v906_v7, 4  ;;  %v911_v13 = vpack.i.b16 %v906_v7, %v887_v6  ;;  %v914_v17 = vshrl.u32 %v906_v7, 16 }
 0x2dd   : > { %v921_v22 = vshrl.u32 %v889_v8, 16 }
 0x2de   : > { %v908_v18 = vsel %vm568_vm1, 0, %v907_v10  ;;  %v915_v19 = vpack.i.b16 %v914_v17, %v913_v12  ;;  %925 = vst.msk [vmem:[#allocation4] sm:$0xf] %vm664_vm2, %v911_v13 }
 0x2df   : > { %v919_v20 = vpack.i.b16 %v908_v18, %v889_v8  ;;  %v922_v23 = vshrl.u32 %v908_v18, 16 }
 0x2e0   : > { %926 = vst.msk [vmem:[#allocation4 + $0x4] sm:$0xf] %vm664_vm2, %v915_v19 }
 0x2e1   : > { %v923_v24 = vpack.i.b16 %v922_v23, %v921_v22  ;;  %927 = vst.msk [vmem:[#allocation4 + $0x8] sm:$0xf] %vm664_vm2, %v919_v20 }
 0x2e3   : > { %928 = vst.msk [vmem:[#allocation4 + $0xc] sm:$0xf] %vm664_vm2, %v923_v24 }
 0x2e5   : > { %v942_v25 = vld [vmem:[#allocation4] sm:$0xf] }
 0x2e6   : > { %v1088_v27 = vsel %vm1086_vm7, %v942_v25, 0 }
 0x2e7   : > { %1097 = vmatpush.bf16.msrb.mxu1 %v1088_v27  ;;  %v943_v28 = vld [vmem:[#allocation4 + $0x4] sm:$0xf] }
 0x2e8   : > { %v1107_v29 = vsel %vm1086_vm7, %v943_v28, 0  ;;  %v944_v30 = vld [vmem:[#allocation4 + $0x8] sm:$0xf] }
 0x2e9   : > { %1116 = vmatpush.bf16.msrb.mxu2 %v1107_v29  ;;  %v1126_v31 = vsel %vm1086_vm7, %v944_v30, 0 }
 0x2ea   : > { %1135 = vmatpush.bf16.msrb.mxu3 %v1126_v31  ;;  %v945_v32 = vld [vmem:[#allocation4 + $0xc] sm:$0xf] }
 0x2eb   : > { %v1145_v33 = vsel %vm1086_vm7, %v945_v32, 0 }
 0x2ec   : > { %1154 = vmatpush.bf16.msra.mxu0 %v1145_v33 }
 0x325   : > { %v1061_v34 = vpop.xlane.xlu1 %1060 }
 0x326   : > { %1812 = vrcp.f32 %v1061_v34 }
 0x32c   : > { %v1813_v35 = vpop.eup %1812 }
 0x32d   : > { %v1075_v36 = vmul.f32 %v1813_v35, %v2182_v4  ;;  %v1064_v37 = vpop.xlane.xlu0 %1063 }
 0x32e   : > { %1814 = vrcp.f32 %v1064_v37 }
 0x32f   : > { %v1079_v38 = vpack.c.bf16 %v1075_v36, %v1075_v36 }
 0x331   : > { %1657 = vmatmul.msk.bf16.vlgmr.msrb.gmra.mxu1 %vm946_vm3, %v1079_v38 }
 0x332   : > { %v1067_v39 = vpop.xlane.xlu2 %1066 }
 0x333   : > { %1816 = vrcp.f32 %v1067_v39 }
 0x334   : > { %v1815_v40 = vpop.eup %1814 }
 0x335   : > { %v1076_v41 = vmul.f32 %v1815_v40, %v2186_v9  ;;  %v1070_v42 = vpop.xlane.xlu0 %1069 }
 0x336   : > { %1818 = vrcp.f32 %v1070_v42 }
 0x337   : > { %v1080_v43 = vpack.c.bf16 %v1076_v41, %v1076_v41 }
 0x339   : > { %v1817_v44 = vpop.eup %1816  ;;  %1658 = vmatmul.msk.bf16.vlgmr.msrb.gmra.mxu2 %vm946_vm3, %v1080_v43 }
 0x33a   : > { %v1077_v45 = vmul.f32 %v1817_v44, %v2190_v15 }
 0x33c   : > { %v1819_v46 = vpop.eup %1818  ;;  %v1081_v4 = vpack.c.bf16 %v1077_v45, %v1077_v45 }
 0x33d   : > { %v1078_v47 = vmul.f32 %v1819_v46, %v2192_v16 }
 0x33e   : > { %1659 = vmatmul.msk.bf16.vlgmr.msrb.gmra.mxu3 %vm946_vm3, %v1081_v4 }
 0x33f   : > { %v1082_v48 = vpack.c.bf16 %v1078_v47, %v1078_v47 }
 0x341   : > { %1660 = vmatmul.msk.bf16.vlgmr.msra.gmra.mxu0 %vm946_vm3, %v1082_v48 }
 0x3ae   : > { %v1099_v49 = vpop.f32.mrf.mxu1 }
 0x3af   : > { %v1160_v9 = vpack.c.bf16 %v1099_v49, %v1099_v49 }
 0x3b1   : > { %v1167_v54 = vshrl.u32 %v1160_v9, 16 }
 0x3b6   : > { %v1101_v50 = vpop.f32.mrf.mxu1 }
 0x3bc   : > { %v1118_v51 = vpop.f32.mrf.mxu2 }
 0x3bd   : > { %v1161_v52 = vpack.c.bf16 %v1118_v51, %v1118_v51 }
 0x3be   : > { %v1156_v53 = vpop.f32.mrf.mxu0 }
 0x3bf   : > { %v1166_v55 = vpack.i.b16 %v1161_v52, %v1160_v9  ;;  %v1168_v56 = vshrl.u32 %v1161_v52, 16  ;;  %v1163_v57 = vpack.c.bf16 %v1156_v53, %v1156_v53 }
 0x3c1   : > { %v1169_v15 = vpack.i.b16 %v1168_v56, %v1167_v54  ;;  %v1137_v58 = vpop.f32.mrf.mxu3  ;;  %v1180_v59 = vperm.slane %v1166_v55, %v2080_v14  ;;  %v1174_v61 = vshrl.u32 %v1163_v57, 16 }
 0x3c2   : > { %v1162_v16 = vpack.c.bf16 %v1137_v58, %v1137_v58 }
 0x3c3   : > { %v1207_v60 = vperm.slane %v1169_v15, %v2080_v14  ;;  %v1189_v1 = vrot.slane %v1180_v59, 4 }
 0x3c4   : > { %v1172_v62 = vpack.i.b16 %v1163_v57, %v1162_v16  ;;  %v1173_v63 = vshrl.u32 %v1162_v16, 16  ;;  %v1120_v0 = vpop.f32.mrf.mxu2 }
 0x3c5   : > { %v1215_v21 = vrot.slane %v1207_v60, 4 }
 0x3c6   : > { %v1175_v3 = vpack.i.b16 %v1174_v61, %v1173_v63  ;;  %v1185_v5 = vperm.slane %v1172_v62, %v2080_v14  ;;  %v1158_v6 = vpop.f32.mrf.mxu0  ;;  %v1718_v61 = vld [vmem:[%s2383_s4 + $0x8] sm:$0xff]  ;;  %v1717_v62 = vld [vmem:[%s2383_s4] sm:$0xff] }
 0x3c7   : > { %1329 = vmatpush.bf16.msra.mxu1 %v1718_v61 }
 0x3c8   : > { %v1186_v11 = vrot.slane %v1185_v5, 4  ;;  %v1190_v7 = vsel %vm568_vm1, %v1185_v5, %v1189_v1  ;;  %v1212_v12 = vperm.slane %v1175_v3, %v2080_v14 }
 0x3c9   : > { %v1198_v8 = vperm.slane %v1190_v7, %v2092_v26  ;;  %v1139_v10 = vpop.f32.mrf.mxu3 }
 0x3ca   : > { %v1188_v13 = vsel %vm568_vm1, %v1186_v11, %v1180_v59  ;;  %v1213_v17 = vrot.slane %v1212_v12, 4  ;;  %v1216_v18 = vsel %vm568_vm1, %v1212_v12, %v1215_v21  ;;  %v1797_v21 = vld [vmem:[%s2384_s5] ss:$0 sm:$0xff] }
 0x3cb   : > { %v1194_v19 = vperm.slane %v1188_v13, %v2092_v26  ;;  %v1201_v20 = vrot.slane %v1198_v8, 4  ;;  %v1224_v22 = vperm.slane %v1216_v18, %v2092_v26  ;;  %1330 = vmatpush.bf16.msra.mxu1 %v1717_v62  ;;  %v1919_v13 = vmov 32.0  }
 0x3cc   : > { %v1214_v23 = vsel %vm568_vm1, %v1213_v17, %v1207_v60  ;;  %1820 = vrcp.f32 %v1919_v13 }
 0x3cd   : > { %v1199_v24 = vrot.slane %v1194_v19, 4  ;;  %v1202_v25 = vsel %vm568_vm1, 0, %v1201_v20  ;;  %v1220_v27 = vperm.slane %v1214_v23, %v2092_v26  ;;  %v1227_v28 = vrot.slane %v1224_v22, 4 }
 0x3ce   : > { %v1234_v29 = vrot.slane %v1202_v25, 4  ;;  %v1229_v33 = vsel %vm568_vm1, %v1201_v20, %v1194_v19 }
 0x3cf   : > { %v1200_v30 = vsel %vm568_vm1, 0, %v1199_v24  ;;  %v1225_v31 = vrot.slane %v1220_v27, 4  ;;  %v1228_v32 = vsel %vm568_vm1, 0, %v1227_v28  ;;  %v1248_v38 = vsel %vm568_vm1, %v1227_v28, %v1220_v27 }
 0x3d0   : > { %v1235_v34 = vsel %vm568_vm1, %v1234_v29, %v1200_v30  ;;  %v1253_v35 = vrot.slane %v1228_v32, 4  ;;  %v1233_v40 = vperm.slane %v1229_v33, %v2080_v14  ;;  %v1252_v44 = vperm.slane %v1248_v38, %v2080_v14  ;;  %v1720_v29 = vld [vmem:[%s2387_s8 + $0x8] sm:$0xff]  ;;  %v1719_v30 = vld [vmem:[%s2387_s8] sm:$0xff] }
 0x3d1   : > { %v1226_v36 = vsel %vm568_vm1, 0, %v1225_v31  ;;  %v1239_v37 = vperm.slane %v1235_v34, %v2080_v14  ;;  %1408 = vmatpush.bf16.msra.mxu2 %v1720_v29  ;;  %v1728_v31 = vld [vmem:[%s2389_s10 + $0x38] sm:$0xff]  ;;  %v1727_v34 = vld [vmem:[%s2389_s10 + $0x30] sm:$0xff] }
 0x3d2   : > { %v1254_v39 = vsel %vm568_vm1, %v1253_v35, %v1226_v36  ;;  %v1821_v17 = vpop.eup %1820  ;;  %1493 = vmatpush.bf16.msra.mxu3 %v1728_v31 }
 0x3d3   : > { %v1240_v41 = vrot.slane %v1239_v37, 4  ;;  %v1258_v42 = vperm.slane %v1254_v39, %v2080_v14  ;;  %v1345_v18 = vmul.f32 32.0, %v1821_v17  ;;  %vm1349_vm10 = vweird.f32 %v1821_v17 }
 0x3d5   : > { %v1241_v43 = vsel %vm568_vm1, %v1240_v41, %v1233_v40  ;;  %v1259_v45 = vrot.slane %v1258_v42, 4  ;;  %v1346_v19 = vsub.f32 1.0, %v1345_v18  ;;  %1409 = vmatpush.bf16.msra.mxu2 %v1719_v30  ;;  %v1798_v42 = vld [vmem:[%s2385_s6] ss:$0 sm:$0xff] }
 0x3d6   : > { %v1245_v46 = vperm.slane %v1241_v43, %v2092_v26  ;;  %1494 = vmatpush.bf16.msra.mxu3 %v1727_v34 }
 0x3d7   : > { %v1260_v4 = vsel %vm568_vm1, %v1259_v45, %v1252_v44  ;;  %v1347_v20 = vmul.f32 %v1821_v17, %v1346_v19  ;;  %v1799_v45 = vld [vmem:[%s2386_s7] ss:$0 sm:$0xff] }
 0x3d8   : > { %v1264_v47 = vperm.slane %v1260_v4, %v2092_v26  ;;  %v1246_v48 = vrot.slane %v1245_v46, 4  ;;  %v1270_v49 = vshrl.u32 %v1245_v46, 16 }
 0x3d9   : > { %v1348_v22 = vadd.f32 %v1821_v17, %v1347_v20 }
 0x3da   : > { %v1271_v50 = vshrl.u32 %v1264_v47, 16  ;;  %v1247_v9 = vsel %vm568_vm1, 0, %v1246_v48  ;;  %v1265_v51 = vrot.slane %v1264_v47, 4  ;;  %v1269_v52 = vpack.i.b16 %v1264_v47, %v1245_v46  ;;  %v1726_v48 = vld [vmem:[%s2389_s10 + $0x28] sm:$0xff] }
 0x3db   : > { %v1276_v56 = vshrl.u32 %v1247_v9, 16  ;;  %v2283_v23 = vsel %vm1349_vm10, %v1821_v17, %v1348_v22  ;;  %1495 = vmatpush.bf16.msra.mxu3 %v1726_v48 }
 0x3dc   : > { %v1272_v53 = vpack.i.b16 %v1271_v50, %v1270_v49  ;;  %v1266_v54 = vsel %vm568_vm1, 0, %v1265_v51  ;;  %v1725_v49 = vld [vmem:[%s2389_s10 + $0x20] sm:$0xff]  ;;  %v1724_v50 = vld [vmem:[%s2389_s10 + $0x18] sm:$0xff]  ;;  %v1722_v51 = vld [vmem:[%s2389_s10 + $0x8] sm:$0xff] }
 0x3dd   : > { %v1275_v55 = vpack.i.b16 %v1266_v54, %v1247_v9  ;;  %v1277_v14 = vshrl.u32 %v1266_v54, 16  ;;  %v1723_v9 = vld [vmem:[%s2389_s10 + $0x10] sm:$0xff] }
 0x3de   : > { %v1279_v57 = vunpack.c.l.b16 %v1272_v53  ;;  %v1800_v53 = vld [vmem:[%s2388_s9] ss:$0 sm:$0xff] }
 0x3df   : > { %v1283_v15 = vunpack.c.l.b16 %v1275_v55  ;;  %v1278_v58 = vpack.i.b16 %v1277_v14, %v1276_v56  ;;  %1496 = vmatpush.bf16.msra.mxu3 %v1725_v49 }
 0x3e0   : > { %v1280_v59 = vpack.c.b16 %v1279_v57, %v1279_v57 }
 0x3e1   : > { %v1284_v16 = vpack.c.b16 %v1283_v15, %v1283_v15  ;;  %v1287_v60 = vunpack.c.l.b16 %v1278_v58 }
 0x3e2   : > { %1281 = vrot.lane.b32.xlu2 %v1280_v59, %s1916_s24  ;;  %s1642_s24 = sshll.u32 %s481_s28, 3 }
 0x3e3   : > { %1285 = vrot.lane.b32.xlu1 %v1284_v16, %s1917_s19  ;;  %v1288_v26 = vpack.c.b16 %v1287_v60, %v1287_v60  ;;  %1497 = vmatpush.bf16.msra.mxu3 %v1724_v50  ;;  %s1712_s19 = sshll.u32 %s1898_s16, 3  ;;  %s483_s1 = scalar_lea.vmem [#allocation5], %s1642_s24 }
 0x3e4   : > { %s1551_s22 = scalar_lea.hbm %s2393_s14, %s1712_s19  ;;  %s1553_s16 = sshll.u32 %s483_s1, 4  ;;  %s1554_s16 = int_to_ptr.vmem [resolvable:$true] %s1553_s16 }
 0x3e5   : > { %1289 = vrot.lane.b32.xlu0 %v1288_v26, %s1918_s17  ;;  %s1555_s2 = sshll.u32 %s1551_s22, 4  ;;  %s1540_s17 = scalar_lea.sflag [#allocation6], %s481_s28  ;;  %s1556_s2 = int_to_ptr.hbm [resolvable:$true] %s1555_s2 }
 0x3e6   : > { %s1842_s21 = sshra.s32 %s1556_s2, 4  ;;  %s1848_s24 = scalar_lea.hbm %s2393_s14, 16  ;;  %s1843_s21 = int_to_ptr.hbm [resolvable:$true] %s1842_s21 }
 0x3e7   : > { %1498 = vmatpush.bf16.msra.mxu3 %v1723_v9  ;;  %s1844_s19 = scalar_lea.hbm %s1843_s21, 8  ;;  %p1849_p1 = scmp.lt.s32.totalorder %s1843_s21, %s2393_s14 }
 0x3e8   : > { %p1845_p12 = scmp.ne.s32.totalorder %s1843_s21, %s1844_s19  ;;  %p1850_p2 = scmp.lt.s32.totalorder %s1848_s24, %s1844_s19 }
 0x3ea   : > { %p1846_p13 = pnand %p1845_p12, %p2035_p4  ;;  %p1851_p3 = por %p1850_p2, %p1849_p1 }
 0x3eb   : > { %1499 = vmatpush.bf16.msra.mxu3 %v1722_v51 }
 0x3ec   : > { %p1847_p0 = pneg %p1846_p13 }
 0x3ee   : > { %p1852_p5 = pnand %p1851_p3, %p1847_p0 }
 0x43c   : > { %v1282_v63 = vpop.permute.xlu2 %1281 }
 0x43d   : > { %v1293_v0 = vsel %vm946_vm3, %v1269_v52, %v1282_v63  ;;  %v1721_v52 = vld [vmem:[%s2389_s10] sm:$0xff] }
 0x43e   : > { %1500 = vmatpush.bf16.msra.mxu3 %v1721_v52  ;;  %v1801_v63 = vld [vmem:[%s2390_s11] ss:$0 sm:$0xff] }
 0x455   : > { %v1286_v1 = vpop.permute.xlu1 %1285 }
 0x456   : > { %v1296_v3 = vsel %vm1294_vm8, %v1293_v0, %v1286_v1 }
 0x457   : > { %v1290_v5 = vpop.permute.xlu0 %1289 }
 0x458   : > { %v1299_v6 = vsel %vm1297_vm9, %v1296_v3, %v1290_v5 }
 0x459   : > { %1669 = vmatmul.msk.bf16.vlgmr.msra.gmra.mxu1 %vm520_vm0, %v1299_v6 }
 0x4d6   : > { %v1332_v11 = vpop.f32.mrf.mxu1 }
 0x4d7   : > { %v1333_v7 = vadd.f32 %v1797_v21, %v1332_v11 }
 0x4d9   : > { %v1338_v12 = vadd.f32 %v1333_v7, %v2064_v2 }
 0x4db   : > { %v1341_v8 = vsel %vm520_vm0, %v1338_v12, 0.0 }
 0x4dc   : > { %1342 = vadd.xlane.f32.xlu2 %v1341_v8 }
 0x4de   : > { %v1334_v10 = vpop.f32.mrf.mxu1 }
 0x54f   : > { %v1343_v24 = vpop.xlane.xlu2 %1342 }
 0x550   : > { %v1351_v25 = vmul.f32 %v2283_v23, %v1343_v24 }
 0x552   : > { %v1352_v27 = vsub.f32 %v1338_v12, %v1351_v25  ;;  %v1802_v25 = vld [vmem:[%s2391_s12] ss:$0 sm:$0xff] }
 0x554   : > { %v1353_v28 = vmul.f32 %v1352_v27, %v1352_v27 }
 0x556   : > { %v1354_v2 = vsel %vm520_vm0, %v1353_v28, 0.0  ;;  %v1803_v28 = vld [vmem:[%s2392_s13] ss:$0 sm:$0xff] }
 0x557   : > { %1355 = vadd.xlane.f32.xlu0 %v1354_v2 }
 0x5ca   : > { %v1356_v32 = vpop.xlane.xlu0 %1355 }
 0x5cb   : > { %v1357_v33 = vmul.f32 %v1356_v32, %v2283_v23 }
 0x5cd   : > { %v1358_v35 = vadd.f32 1e-05, %v1357_v33 }
 0x5cf   : > { %1822 = vrsqrt.f32 %v1358_v35  ;;  %vm1365_vm12 = vweird.f32 %v1358_v35 }
 0x5d5   : > { %v1823_v36 = vpop.eup %1822 }
 0x5d6   : > { %v1360_v37 = vmul.f32 %v1823_v36, %v1358_v35  ;;  %vm1366_vm11 = vweird.f32 %v1823_v36 }
 0x5d7   : > { %vm1367_vm13 = vmor %vm1365_vm12, %vm1366_vm11 }
 0x5d8   : > { %v1361_v38 = vmul.f32 %v1823_v36, %v1360_v37 }
 0x5da   : > { %v1362_v39 = vmul.f32 0.5, %v1361_v38 }
 0x5dc   : > { %v1363_v40 = vsub.f32 1.5, %v1362_v39 }
 0x5de   : > { %v1364_v41 = vmul.f32 %v1823_v36, %v1363_v40 }
 0x5e0   : > { %v1368_v43 = vsel %vm1367_vm13, %v1823_v36, %v1364_v41 }
 0x5e1   : > { %v1369_v44 = vmul.f32 %v1368_v43, %v1352_v27 }
 0x5e3   : > { %v1373_v46 = vmul.f32 %v1798_v42, %v1369_v44 }
 0x5e5   : > { %v1377_v4 = vadd.f32 %v1799_v45, %v1373_v46 }
 0x5e7   : > { %v1378_v47 = vpack.c.bf16 %v1377_v4, %v1377_v4 }
 0x5e9   : > { %1678 = vmatmul.msk.bf16.vlgmr.msra.gmra.mxu2 %vm520_vm0, %v1378_v47 }
 0x66c   : > { %v1411_v54 = vpop.f32.mrf.mxu2 }
 0x66d   : > { %v1412_v55 = vadd.f32 %v1800_v53, %v1411_v54 }
 0x66f   : > { %v1416_v56 = vmul.f32 0.044715, %v1412_v55  ;;  %v1415_v60 = vmul.f32 0.5, %v1412_v55 }
 0x671   : > { %v1417_v14 = vmul.f32 %v1416_v56, %v1412_v55 }
 0x673   : > { %v1418_v57 = vmul.f32 %v1417_v14, %v1412_v55 }
 0x674   : > { %v1413_v15 = vpop.f32.mrf.mxu2 }
 0x675   : > { %v1419_v58 = vadd.f32 %v1418_v57, %v1412_v55 }
 0x677   : > { %v1420_v59 = vmul.f32 0.7978846, %v1419_v58 }
 0x679   : > { %1824 = vtanh.f32 %v1420_v59 }
 0x67f   : > { %v1825_v16 = vpop.eup %1824 }
 0x680   : > { %v1422_v26 = vadd.f32 1.0, %v1825_v16 }
 0x682   : > { %v1423_v61 = vmul.f32 %v1422_v26, %v1415_v60 }
 0x684   : > { %v1424_v62 = vpack.c.bf16 %v1423_v61, %v1423_v61 }
 0x686   : > { %1501 = vmatmul.bf16.vlgmr.msra.gmra.mxu3 %v1424_v62 }
 0x709   : > { %v1502_v0 = vpop.f32.mrf.mxu3 }
 0x70a   : > { %v1503_v1 = vadd.f32 %v1801_v63, %v1502_v0 }
 0x70c   : > { %v1508_v3 = vsel %vm520_vm0, %v1503_v1, 0.0 }
 0x70d   : > { %1509 = vadd.xlane.f32.xlu1 %v1508_v3 }
 0x711   : > { %v1504_v5 = vpop.f32.mrf.mxu3 }
 0x780   : > { %v1510_v6 = vpop.xlane.xlu1 %1509 }
 0x781   : > { %v1511_v21 = vmul.f32 %v1510_v6, %v2283_v23 }
 0x783   : > { %v1512_v11 = vsub.f32 %v1503_v1, %v1511_v21 }
 0x785   : > { %v1513_v7 = vmul.f32 %v1512_v11, %v1512_v11 }
 0x787   : > { %v1514_v12 = vsel %vm520_vm0, %v1513_v7, 0.0 }
 0x788   : > { %1515 = vadd.xlane.f32.xlu2 %v1514_v12 }
 0x7fb   : > { %v1516_v8 = vpop.xlane.xlu2 %1515 }
 0x7fc   : > { %v1517_v10 = vmul.f32 %v1516_v8, %v2283_v23 }
 0x7fe   : > { %v1518_v13 = vadd.f32 2.5e-06, %v1517_v10 }
 0x800   : > { %1826 = vrsqrt.f32 %v1518_v13  ;;  %vm1525_vm15 = vweird.f32 %v1518_v13 }
 0x806   : > { %v1827_v17 = vpop.eup %1826 }
 0x807   : > { %v1520_v18 = vmul.f32 %v1827_v17, %v1518_v13  ;;  %vm1526_vm14 = vweird.f32 %v1827_v17 }
 0x808   : > { %vm1527_vm1 = vmor %vm1525_vm15, %vm1526_vm14 }
 0x809   : > { %v1521_v19 = vmul.f32 %v1827_v17, %v1520_v18 }
 0x80b   : > { %v1522_v20 = vmul.f32 0.5, %v1521_v19 }
 0x80d   : > { %v1523_v22 = vsub.f32 1.5, %v1522_v20 }
 0x80f   : > { %v1524_v24 = vmul.f32 %v1827_v17, %v1523_v22 }
 0x811   : > { %v1528_v23 = vsel %vm1527_vm1, %v1827_v17, %v1524_v24 }
 0x812   : > { %v1529_v27 = vmul.f32 %v1528_v23, %v1512_v11 }
 0x814   : > { %v1533_v2 = vmul.f32 %v1802_v25, %v1529_v27 }
 0x816   : > { %v1537_v29 = vadd.f32 %v1803_v28, %v1533_v2 }
 0x818   : > { %1538 = vst.msk [vmem:[%s483_s1] sm:$0xff] %vm520_vm0, %v1537_v29 }
 0x819   : > { %1855 = shalt.err (!%p1852_p5)
}
 0x81a   : > { %1729 = dma.vmem_to_hbm [thread:$0]  (%p2035_p4), %s1554_s16, 128, %s1556_s2, %s1540_s17  }
 0x81b PF: > { %p1735_p6 = scmp.ge.s32.totalorder %s1906_s18, 2  ;;  %s1567_s1 = sand.u32 1, %s1886_s29  }
 0x81c   : > { %s1568_s28 = scalar_lea.sflag [#allocation6], %s1567_s1 }
 0x81d   : > { %p1732_p7 = pnand %p1735_p6, %p2042_p8 }
 0x81f   : > { %p1733_p9 = pneg %p1732_p7 }
 0x821   : > { %1881 = dma.done.wait (%p1733_p9), %s1568_s28, 128  }
 0x822   : > { %1883 = vsyncadd (%p1733_p9), %s1568_s28, 4294967168  ;;  %s27_s18 = sadd.s32 1, %s1906_s18   ;;  %s2407_s27 = sld [smem:[#allocation10_spill]] }
 0x823   : > { %p24_p10 = scmp.ge.s32.totalorder %s27_s18, 4   ;;  %s2408_s16 = sld [smem:[#allocation8_spill]] }
 0x824   : > { %s2409_s17 = sld [smem:[#allocation9_spill]]  ;;  %s2410_s29 = smov %s1890_s30 }
 0x825   : > { %s2411_s30 = smov %s1894_s15  ;;  %26 = sbr.rel (!%p24_p10) target bundleno = 8 (0x8), region = 120 }
 0x828   : > { %s2412_s15 = smov %s2407_s27 }
 0x82a   :  { %1574 = vsyncpa [#allocation6], 1 }
 0x82b   :  { %1576 = vsyncpa [#allocation6 + $0x1], 1 }

// kernel: tpu_custom_call.1
= control target key start
LH: loop header
LB: loop body
LE: loop exit
PB: predicated region body
PF: predicated region fallthrough
CT: control target
= control target key end

     0   :  { %s1788_s0 = inlined_call_operand.vmem [shape: f32[2,8,32], index: 0, kind: input, shape index: {}]   ;;  %s1789_s1 = inlined_call_operand.vmem [shape: s8[2,1,8], index: 1, kind: input, shape index: {}]   ;;  %s1790_s2 = inlined_call_operand.vmem [shape: bf16[32,96], index: 2, kind: input, shape index: {}]   ;;  %s1791_s3 = inlined_call_operand.vmem [shape: f32[1,96], index: 3, kind: input, shape index: {}]   ;;  %s1792_s4 = inlined_call_operand.vmem [shape: bf16[32,32], index: 4, kind: input, shape index: {}]   ;;  %s1793_s5 = inlined_call_operand.vmem [shape: f32[1,32], index: 5, kind: input, shape index: {}]   ;;  %s1794_s6 = inlined_call_operand.vmem [shape: f32[1,32], index: 6, kind: input, shape index: {}]   ;;  %s1795_s7 = inlined_call_operand.vmem [shape: f32[1,32], index: 7, kind: input, shape index: {}]   ;;  %s1796_s8 = inlined_call_operand.vmem [shape: bf16[32,128], index: 8, kind: input, shape index: {}]   ;;  %s1797_s9 = inlined_call_operand.vmem [shape: f32[1,128], index: 9, kind: input, shape index: {}]   ;;  %s1798_s10 = inlined_call_operand.vmem [shape: bf16[128,32], index: 10, kind: input, shape index: {}]   ;;  %s1799_s11 = inlined_call_operand.vmem [shape: f32[1,32], index: 11, kind: input, shape index: {}]   ;;  %s1800_s12 = inlined_call_operand.vmem [shape: f32[1,32], index: 12, kind: input, shape index: {}]   ;;  %s1801_s13 = inlined_call_operand.vmem [shape: f32[1,32], index: 13, kind: input, shape index: {}]   ;;  %s1802_s14 = inlined_call_operand.hbm [shape: f32[2,8,32], index: 14, kind: output, shape index: {}]  }
   0x1   :  { %1805 = sst [smem:[#allocation11_spill]] %s1788_s0 }
   0x2   :  { %1806 = sst [smem:[#allocation12_spill]] %s1789_s1 }
   0x3   :  { %1807 = sst [smem:[#allocation13_spill]] %s1790_s2 }
   0x4   :  { %19 = vsyncpa [#allocation6], 0 }
   0x5   :  { %21 = vsyncpa [#allocation6 + $0x1], 0  ;;  %s1535_s29 = smov 0   ;;  %s1537_s30 = smov 0  }
   0x6   :  { %s1539_s15 = smov 0   ;;  %s1541_s16 = smov 0  }
   0x7   :  { %s1543_s17 = smov 0   ;;  %s1545_s18 = smov 0  }
   0x8 LB: > { %1808 = sst [smem:[#allocation8_spill]] %s1444_s17  ;;  %s1181_s19 = sadd.s32 4294967295, %s1448_s18   ;;  %s1448_s18 = sphi %s1545_s18, %s27_s18   ;;  %s1444_s17 = sphi %s1543_s17, %s1818_s17   ;;  %s1440_s16 = sphi %s1541_s16, %s1817_s16   ;;  %s1436_s15 = sphi %s1539_s15, %s1821_s15   ;;  %s1432_s30 = sphi %s1537_s30, %s1820_s30   ;;  %s1428_s29 = sphi %s1535_s29, %s1819_s29  }
   0x9   : > { %s1182_s20 = sadd.s32 4294967294, %s1448_s18   ;;  %s39_s21 = sadd.s32 1, %s1444_s17 }
   0xa   : > { %s352_s22 = sadd.s32 1, %s1436_s15  ;;  %p41_p0 = scmp.ge.s32.totalorder %s39_s21, 2 }
   0xb   : > { %p362_p1 = scmp.ne.s32.totalorder %s1436_s15, %s1432_s30  ;;  %p363_p2 = scmp.eq.s32.totalorder %s1181_s19, 1 }
   0xc   : > { %p368_p3 = scmp.ne.s32.totalorder %s1432_s30, %s1428_s29  ;;  %s1823_s21 = smov (%p41_p0, %s39_s21), 0 }
   0xd   : > { %1809 = sst [smem:[#allocation9_spill]] %s1823_s21  ;;  %p1575_p4 = por %p363_p2, %p362_p1 }
   0xe   : > { %p369_p5 = scmp.eq.s32.totalorder %s1182_s20, 1  ;;  %s347_s24 = ssub.s32 %s1444_s17, %s1823_s21 }
   0xf   : > { %p1185_p6 = scmp.ge.s32.totalorder %s1448_s18, 1  ;;  %p350_p7 = scmp.eq.s32.totalorder %s347_s24, 0 }
  0x10   : > { %p1582_p8 = por %p369_p5, %p368_p3  ;;  %p436_p9 = scmp.lt.s32.totalorder %s1448_s18, 3 }
  0x11   : > { %s1588_s26 = scalar_select %p350_p7, %s1436_s15, %s352_s22  }
  0x12   : > { %p437_p10 = pnand %p1185_p6, %p436_p9 }
  0x13   : > { %1812 = sst [smem:[#allocation10_spill]] %s1588_s26  ;;  %p484_p11 = scmp.lt.s32.totalorder (!%p437_p10), %s1440_s16, 1 }
  0x14   : > { %440 = sbr.rel (%p437_p10) target bundleno = 2007 (0x7d7), region = 76  ;;  %s1813_s2 = sld [smem:[#allocation13_spill]] (!%p437_p10) }
  0x15   : > { %s1814_s0 = sld [smem:[#allocation11_spill]] (!%p437_p10)  ;;  %s1450_s17 = smov (!%p437_p10), 104  }
  0x16   : > { %s1453_s19 = smov (!%p437_p10), 96   ;;  %s1815_s1 = sld [smem:[#allocation12_spill]] (!%p437_p10) }
  0x17   : > { %s1456_s28 = smov (!%p437_p10), 8  }
  0x19   : > { %s1598_s24 = scalar_select %p484_p11, %s1440_s16, 1  ;;  %vm520_vm0 = vcmask 261120   ;;  %v1338_v4 = vld [vmem:[%s1791_s3] ss:$0 sm:$0xff]  ;;  %vm548_vm1 = vcmask 60416   ;;  %vm602_vm2 = vcmask 64512  }
  0x1a   : > { %v1260_v0 = vld [vmem:[%s1813_s2 + $0x8] sm:$0xff]  ;;  %v1259_v1 = vld [vmem:[%s1813_s2] sm:$0xff]  ;;  %v1454_v31 = vmov 0   ;;  %vm742_vm6 = vcmask 1043456   ;;  %vm838_vm7 = vcmask 130048   ;;  %vm841_vm8 = vcmask 195584  }
  0x1b   : > { %530 = vmatpush.bf16.msra.mxu0 %v1260_v0  ;;  %s1187_s21 = sshll.u32 %s1598_s24, 3 }
  0x1c   : > { %s487_s26 = scalar_lea.vmem %s1814_s0, %s1187_s21  ;;  %s1451_s21 = smov 120  }
  0x1d   : > { %v1604_v2 = vld [vmem:[%s487_s26] sm:$0xff]  ;;  %s1452_s26 = smov 112   ;;  %s490_s27 = scalar_lea.vmem %s1815_s1, %s1598_s24 }
  0x1e   : > { %v499_v3 = vpack.c.bf16 %v1604_v2, %v1604_v2  ;;  %v679_v30 = vld [vmem:[%s490_s27] sm:$0x1]  ;;  %s1455_s24 = smov 64  }
  0x1f   : > { %531 = vmatpush.bf16.msra.mxu0 %v1259_v1  ;;  %vm680_vm3 = vnez %v679_v30 }
  0x20   : > { %v681_v32 = vsel %vm680_vm3, 16843009, %v1454_v31 }
  0x21   : > { %v682_v33 = vunpack.c.0.s8 %v681_v32 }
  0x22   : > { %1196 = vmatmul.msk.bf16.vlgmr.msra.gmra.mxu0 %vm520_vm0, %v499_v3 }
  0x23   : > { %vm683_vm4 = vcmp.ne.s32.totalorder %v682_v33, 0 }
  0x24   : > { %v684_v34 = vsel %vm683_vm4, 1, %v1454_v31 }
  0x25   : > { %v685_v35 = vperm.slane %v684_v34, 0 }
  0x27   : > { %vm686_vm5 = vcmp.eq.s32.totalorder %v685_v35, 1 }
  0x9f   : > { %v533_v5 = vpop.f32.mrf.mxu0 }
  0xa0   : > { %v534_v6 = vadd.f32 %v1338_v4, %v533_v5 }
  0xa2   : > { %v1612_v7 = vpack.c.bf16 %v534_v6, %v534_v6 }
  0xa4   : > { %549 = vst.msk [vmem:[#allocation2] sm:$0xf] %vm548_vm1, %v1612_v7  ;;  %545 = vrot.lane.b32.xlu1 %v1612_v7, %s1450_s17  ;;  %539 = vrot.lane.b32.xlu0 %v1612_v7, %s1451_s21  ;;  %s1457_s17 = smov 16   ;;  %s1458_s21 = smov 24  }
  0xa7   : > { %v535_v8 = vpop.f32.mrf.mxu0 }
  0xab   : > { %v590_v15 = vld [vmem:[#allocation2] sm:$0xf] }
  0xac   : > { %542 = vrot.lane.b32.xlu0 %v1612_v7, %s1452_s26 }
  0xb4   : > { %553 = vrot.lane.b32.xlu0 %v1612_v7, %s1453_s19 }
 0x116   : > { %v1620_v9 = vpop.permute.xlu1 %545  ;;  %v1622_v10 = vpop.permute.xlu0 %539 }
 0x117   : > { %552 = vst.msk [vmem:[#allocation2 + $0xc] sm:$0xf] %vm548_vm1, %v1620_v9  ;;  %555 = vrot.lane.b32.xlu1 %v1622_v10, %s1453_s19 }
 0x118   : > { %550 = vst.msk [vmem:[#allocation2 + $0x4] sm:$0xf] %vm548_vm1, %v1622_v10 }
 0x11e   : > { %v1629_v11 = vpop.permute.xlu0 %542  ;;  %v593_v24 = vld [vmem:[#allocation2 + $0xc] sm:$0xf] }
 0x11f   : > { %551 = vst.msk [vmem:[#allocation2 + $0x8] sm:$0xf] %vm548_vm1, %v1629_v11  ;;  %557 = vrot.lane.b32.xlu2 %v1629_v11, %s1453_s19  ;;  %v591_v27 = vld [vmem:[#allocation2 + $0x4] sm:$0xf] }
 0x126   : > { %v554_v12 = vpop.permute.xlu0 %553  ;;  %v592_v21 = vld [vmem:[#allocation2 + $0x8] sm:$0xf] }
 0x127   : > { %565 = vst.msk [vmem:[#allocation3] sm:$0xf] %vm548_vm1, %v554_v12  ;;  %559 = vrot.lane.b32.xlu2 %v1620_v9, %s1453_s19 }
 0x12e   : > { %v594_v13 = vld [vmem:[#allocation3] sm:$0xf] }
 0x12f   : > { %v607_v14 = vsel %vm602_vm2, %v594_v13, 0 }
 0x130   : > { %616 = vmatpush.bf16.xpose.msra.mxu1 %v607_v14 }
 0x137   : > { %1197 = vmatmul.msk.bf16.vlgmr.msra.gmra.mxu1 %vm602_vm2, %v590_v15 }
 0x179   : > { %v558_v16 = vpop.permute.xlu2 %557 }
 0x17a   : > { %567 = vst.msk [vmem:[#allocation3 + $0x8] sm:$0xf] %vm548_vm1, %v558_v16 }
 0x181   : > { %v560_v17 = vpop.permute.xlu2 %559  ;;  %v596_v18 = vld [vmem:[#allocation3 + $0x8] sm:$0xf] }
 0x182   : > { %568 = vst.msk [vmem:[#allocation3 + $0xc] sm:$0xf] %vm548_vm1, %v560_v17  ;;  %v645_v19 = vsel %vm602_vm2, %v596_v18, 0 }
 0x183   : > { %654 = vmatpush.bf16.xpose.msra.mxu3 %v645_v19 }
 0x189   : > { %v556_v20 = vpop.permute.xlu1 %555  ;;  %v597_v22 = vld [vmem:[#allocation3 + $0xc] sm:$0xf] }
 0x18a   : > { %566 = vst.msk [vmem:[#allocation3 + $0x4] sm:$0xf] %vm548_vm1, %v556_v20  ;;  %1199 = vmatmul.msk.bf16.vlgmr.msra.gmra.mxu3 %vm602_vm2, %v592_v21  ;;  %v664_v23 = vsel %vm602_vm2, %v597_v22, 0 }
 0x18b   : > { %673 = vmatpush.bf16.xpose.msrb.mxu0 %v664_v23 }
 0x191   : > { %v595_v25 = vld [vmem:[#allocation3 + $0x4] sm:$0xf] }
 0x192   : > { %1200 = vmatmul.msk.bf16.vlgmr.msrb.gmra.mxu0 %vm602_vm2, %v593_v24  ;;  %v626_v26 = vsel %vm602_vm2, %v595_v25, 0 }
 0x193   : > { %635 = vmatpush.bf16.xpose.msra.mxu2 %v626_v26 }
 0x19a   : > { %1198 = vmatmul.msk.bf16.vlgmr.msra.gmra.mxu2 %vm602_vm2, %v591_v27 }
 0x1b4   : > { %v618_v28 = vpop.f32.mrf.mxu1 }
 0x1b5   : > { %v687_v42 = vsel %vm686_vm5, %v618_v28, -65504.0 }
 0x1b6   : > { %v691_v45 = vsel %vm602_vm2, %v687_v42, -inf }
 0x1bc   : > { %v620_v29 = vpop.f32.mrf.mxu1 }
 0x20d   : > { %v656_v36 = vpop.f32.mrf.mxu3 }
 0x20e   : > { %v689_v37 = vsel %vm686_vm5, %v656_v36, -65504.0 }
 0x20f   : > { %v675_v38 = vpop.f32.mrf.mxu0  ;;  %v697_v39 = vsel %vm602_vm2, %v689_v37, -inf }
 0x210   : > { %v690_v40 = vsel %vm686_vm5, %v675_v38, -65504.0  ;;  %698 = vmax.xlane.f32.xlu2 %v697_v39 }
 0x211   : > { %v700_v41 = vsel %vm602_vm2, %v690_v40, -inf }
 0x212   : > { %701 = vmax.xlane.f32.xlu0 %v700_v41 }
 0x215   : > { %v658_v43 = vpop.f32.mrf.mxu3 }
 0x217   : > { %v677_v44 = vpop.f32.mrf.mxu0 }
 0x218   : > { %692 = vmax.xlane.f32.xlu2 %v691_v45 }
 0x21d   : > { %v637_v46 = vpop.f32.mrf.mxu2 }
 0x21e   : > { %v688_v47 = vsel %vm686_vm5, %v637_v46, -65504.0 }
 0x21f   : > { %v694_v48 = vsel %vm602_vm2, %v688_v47, -inf }
 0x220   : > { %695 = vmax.xlane.f32.xlu1 %v694_v48 }
 0x225   : > { %v639_v49 = vpop.f32.mrf.mxu2 }
 0x226   : > { %573 = vrot.lane.b32.xlu0 %v1629_v11, %s1455_s24 }
 0x22e   : > { %569 = vrot.lane.b32.xlu0 %v1612_v7, %s1455_s24 }
 0x239   : > { %571 = vrot.lane.b32.xlu1 %v1622_v10, %s1455_s24 }
 0x283   : > { %v699_v50 = vpop.xlane.xlu2 %698 }
 0x284   : > { %v705_v62 = vsub.f32 %v689_v37, %v699_v50 }
 0x285   : > { %v702_v51 = vpop.xlane.xlu0 %701 }
 0x286   : > { %v706_v52 = vsub.f32 %v690_v40, %v702_v51  ;;  %v711_v3 = vmul.f32 1.442695, %v705_v62 }
 0x288   : > { %v713_v53 = vmul.f32 1.442695, %v706_v52  ;;  %v1262_v52 = vld [vmem:[%s1792_s4 + $0x8] sm:$0xff] }
 0x28a   : > { %1346 = vpow2.f32 %v713_v53  ;;  %v1261_v53 = vld [vmem:[%s1792_s4] sm:$0xff] }
 0x28b   : > { %v693_v54 = vpop.xlane.xlu2 %692 }
 0x28c   : > { %v703_v55 = vsub.f32 %v687_v42, %v693_v54 }
 0x28e   : > { %v707_v56 = vmul.f32 1.442695, %v703_v55 }
 0x290   : > { %v1347_v57 = vpop.eup %1346  ;;  %1348 = vpow2.f32 %v707_v56 }
 0x291   : > { %v724_v58 = vsel %vm602_vm2, %v1347_v57, 0.0 }
 0x292   : > { %725 = vadd.xlane.f32.xlu1 %v724_v58 }
 0x293   : > { %v696_v59 = vpop.xlane.xlu1 %695 }
 0x294   : > { %v704_v60 = vsub.f32 %v688_v47, %v696_v59 }
 0x296   : > { %v1349_v61 = vpop.eup %1348  ;;  %v709_v63 = vmul.f32 1.442695, %v704_v60 }
 0x297   : > { %v715_v0 = vsel %vm602_vm2, %v1349_v61, 0.0 }
 0x298   : > { %1350 = vpow2.f32 %v709_v63  ;;  %v574_v1 = vpop.permute.xlu0 %573  ;;  %716 = vadd.xlane.f32.xlu0 %v715_v0 }
 0x299   : > { %583 = vst.msk [vmem:[#allocation4 + $0x8] sm:$0xf] %vm548_vm1, %v574_v1  ;;  %1352 = vpow2.f32 %v711_v3 }
 0x29e   : > { %v1351_v4 = vpop.eup %1350 }
 0x29f   : > { %v718_v5 = vsel %vm602_vm2, %v1351_v4, 0.0  ;;  %v1353_v10 = vpop.eup %1352 }
 0x2a0   : > { %v570_v6 = vpop.permute.xlu0 %569  ;;  %719 = vadd.xlane.f32.xlu2 %v718_v5  ;;  %v600_v7 = vld [vmem:[#allocation4 + $0x8] sm:$0xf]  ;;  %v721_v11 = vsel %vm602_vm2, %v1353_v10, 0.0 }
 0x2a1   : > { %581 = vst.msk [vmem:[#allocation4] sm:$0xf] %vm548_vm1, %v570_v6  ;;  %v782_v8 = vsel %vm742_vm6, %v600_v7, 0 }
 0x2a2   : > { %791 = vmatpush.bf16.msrb.mxu3 %v782_v8 }
 0x2a8   : > { %722 = vadd.xlane.f32.xlu2 %v721_v11  ;;  %v598_v12 = vld [vmem:[#allocation4] sm:$0xf] }
 0x2a9   : > { %v744_v13 = vsel %vm742_vm6, %v598_v12, 0 }
 0x2aa   : > { %753 = vmatpush.bf16.msrb.mxu1 %v744_v13 }
 0x2ab   : > { %v572_v14 = vpop.permute.xlu1 %571 }
 0x2ac   : > { %582 = vst.msk [vmem:[#allocation4 + $0x4] sm:$0xf] %vm548_vm1, %v572_v14 }
 0x2ae   : > { %873 = vmatpush.bf16.msra.mxu1 %v1262_v52 }
 0x2b2   : > { %874 = vmatpush.bf16.msra.mxu1 %v1261_v53 }
 0x2b3   : > { %v599_v15 = vld [vmem:[#allocation4 + $0x4] sm:$0xf] }
 0x2b4   : > { %v763_v16 = vsel %vm742_vm6, %v599_v15, 0 }
 0x2b5   : > { %772 = vmatpush.bf16.msrb.mxu2 %v763_v16  ;;  %v1264_v16 = vld [vmem:[%s1796_s8 + $0x8] sm:$0xff] }
 0x2b9   : > { %952 = vmatpush.bf16.msra.mxu2 %v1264_v16 }
 0x2c0   : > { %575 = vrot.lane.b32.xlu2 %v1620_v9, %s1455_s24  ;;  %s481_s24 = sand.u32 1, %s1432_s30  }
 0x305   : > { %v726_v26 = vpop.xlane.xlu1 %725 }
 0x30b   : > { %v717_v17 = vpop.xlane.xlu0 %716 }
 0x30c   : > { %1354 = vrcp.f32 %v717_v17  ;;  %v1263_v17 = vld [vmem:[%s1796_s8] sm:$0xff] }
 0x30d   : > { %953 = vmatpush.bf16.msra.mxu2 %v1263_v17 }
 0x312   : > { %v1355_v18 = vpop.eup %1354 }
 0x313   : > { %v731_v19 = vmul.f32 %v1355_v18, %v1349_v61  ;;  %v720_v20 = vpop.xlane.xlu2 %719  ;;  %v1339_v61 = vld [vmem:[%s1793_s5] ss:$0 sm:$0xff]  ;;  %v1272_v18 = vld [vmem:[%s1798_s10 + $0x38] sm:$0xff] }
 0x314   : > { %1356 = vrcp.f32 %v720_v20  ;;  %1037 = vmatpush.bf16.msra.mxu3 %v1272_v18 }
 0x315   : > { %v735_v21 = vpack.c.bf16 %v731_v19, %v731_v19 }
 0x317   : > { %1201 = vmatmul.msk.bf16.vlgmr.msrb.gmra.mxu1 %vm602_vm2, %v735_v21  ;;  %v1271_v21 = vld [vmem:[%s1798_s10 + $0x30] sm:$0xff] }
 0x318   : > { %1038 = vmatpush.bf16.msra.mxu3 %v1271_v21 }
 0x31a   : > { %v1357_v22 = vpop.eup %1356 }
 0x31b   : > { %v732_v23 = vmul.f32 %v1357_v22, %v1351_v4  ;;  %v723_v24 = vpop.xlane.xlu2 %722  ;;  %v1459_v4 = vmov 32.0  }
 0x31c   : > { %1358 = vrcp.f32 %v723_v24 }
 0x31d   : > { %v736_v25 = vpack.c.bf16 %v732_v23, %v732_v23  ;;  %1360 = vrcp.f32 %v726_v26 }
 0x31e   : > { %1362 = vrcp.f32 %v1459_v4 }
 0x31f   : > { %1202 = vmatmul.msk.bf16.vlgmr.msrb.gmra.mxu2 %vm602_vm2, %v736_v25 }
 0x322   : > { %v1359_v27 = vpop.eup %1358 }
 0x323   : > { %v733_v9 = vmul.f32 %v1359_v27, %v1353_v10  ;;  %v576_v28 = vpop.permute.xlu2 %575  ;;  %v1361_v30 = vpop.eup %1360 }
 0x324   : > { %584 = vst.msk [vmem:[#allocation4 + $0xc] sm:$0xf] %vm548_vm1, %v576_v28  ;;  %v734_v31 = vmul.f32 %v1361_v30, %v1347_v57  ;;  %v1363_v5 = vpop.eup %1362  ;;  %v1340_v28 = vld [vmem:[%s1794_s6] ss:$0 sm:$0xff] }
 0x325   : > { %v737_v29 = vpack.c.bf16 %v733_v9, %v733_v9  ;;  %v889_v6 = vmul.f32 32.0, %v1363_v5  ;;  %vm893_vm9 = vweird.f32 %v1363_v5 }
 0x326   : > { %v738_v34 = vpack.c.bf16 %v734_v31, %v734_v31  ;;  %v1341_v31 = vld [vmem:[%s1795_s7] ss:$0 sm:$0xff] }
 0x327   : > { %1203 = vmatmul.msk.bf16.vlgmr.msrb.gmra.mxu3 %vm602_vm2, %v737_v29  ;;  %v890_v7 = vsub.f32 1.0, %v889_v6 }
 0x329   : > { %v891_v8 = vmul.f32 %v1363_v5, %v890_v7 }
 0x32b   : > { %v601_v32 = vld [vmem:[#allocation4 + $0xc] sm:$0xf]  ;;  %v892_v10 = vadd.f32 %v1363_v5, %v891_v8 }
 0x32c   : > { %v801_v33 = vsel %vm742_vm6, %v601_v32, 0 }
 0x32d   : > { %810 = vmatpush.bf16.msra.mxu0 %v801_v33  ;;  %v1692_v11 = vsel %vm893_vm9, %v1363_v5, %v892_v10 }
 0x330   : > { %1204 = vmatmul.msk.bf16.vlgmr.msra.gmra.mxu0 %vm602_vm2, %v738_v34 }
 0x394   : > { %v755_v35 = vpop.f32.mrf.mxu1 }
 0x395   : > { %v816_v56 = vpack.c.bf16 %v755_v35, %v755_v35  ;;  %v1270_v35 = vld [vmem:[%s1798_s10 + $0x28] sm:$0xff] }
 0x396   : > { %1039 = vmatpush.bf16.msra.mxu3 %v1270_v35 }
 0x39c   : > { %v757_v36 = vpop.f32.mrf.mxu1 }
 0x39d   : > { %v1269_v36 = vld [vmem:[%s1798_s10 + $0x20] sm:$0xff] }
 0x39e   : > { %1040 = vmatpush.bf16.msra.mxu3 %v1269_v36 }
 0x3a2   : > { %v774_v37 = vpop.f32.mrf.mxu2 }
 0x3a3   : > { %v817_v38 = vpack.c.bf16 %v774_v37, %v774_v37  ;;  %v1268_v37 = vld [vmem:[%s1798_s10 + $0x18] sm:$0xff] }
 0x3a4   : > { %1041 = vmatpush.bf16.msra.mxu3 %v1268_v37 }
 0x3a5   : > { %v821_v39 = vunpack.c.l.b16 %v817_v38  ;;  %v1267_v38 = vld [vmem:[%s1798_s10 + $0x10] sm:$0xff] }
 0x3a7   : > { %v822_v40 = vpack.c.b16 %v821_v39, %v821_v39  ;;  %v1266_v39 = vld [vmem:[%s1798_s10 + $0x8] sm:$0xff] }
 0x3a8   : > { %1042 = vmatpush.bf16.msra.mxu3 %v1267_v38 }
 0x3a9   : > { %823 = vrot.lane.b32.xlu2 %v822_v40, %s1456_s28  ;;  %v1265_v40 = vld [vmem:[%s1798_s10] sm:$0xff]  ;;  %s1186_s28 = sshll.u32 %s481_s24, 3 }
 0x3aa   : > { %v776_v41 = vpop.f32.mrf.mxu2  ;;  %v793_v42 = vpop.f32.mrf.mxu3  ;;  %s483_s1 = scalar_lea.vmem [#allocation5], %s1186_s28  ;;  %s1390_s28 = scalar_lea.hbm %s1802_s14, 16 }
 0x3ab   : > { %v818_v43 = vpack.c.bf16 %v793_v42, %v793_v42  ;;  %v1342_v41 = vld [vmem:[%s1797_s9] ss:$0 sm:$0xff] }
 0x3ac   : > { %1043 = vmatpush.bf16.msra.mxu3 %v1266_v39 }
 0x3ad   : > { %v826_v44 = vunpack.c.l.b16 %v818_v43  ;;  %v812_v45 = vpop.f32.mrf.mxu0 }
 0x3ae   : > { %v819_v47 = vpack.c.bf16 %v812_v45, %v812_v45 }
 0x3af   : > { %v827_v46 = vpack.c.b16 %v826_v44, %v826_v44 }
 0x3b0   : > { %v831_v49 = vunpack.c.l.b16 %v819_v47  ;;  %1044 = vmatpush.bf16.msra.mxu3 %v1265_v40 }
 0x3b1   : > { %828 = vrot.lane.b32.xlu2 %v827_v46, %s1457_s17  ;;  %s1256_s17 = sshll.u32 %s1440_s16, 3  ;;  %s1097_s16 = sshll.u32 %s483_s1, 4  ;;  %s1098_s16 = int_to_ptr.vmem [resolvable:$true] %s1097_s16 }
 0x3b2   : > { %v795_v48 = vpop.f32.mrf.mxu3  ;;  %v832_v51 = vpack.c.b16 %v831_v49, %v831_v49  ;;  %s1095_s22 = scalar_lea.hbm %s1802_s14, %s1256_s17 }
 0x3b3   : > { %s1099_s2 = sshll.u32 %s1095_s22, 4  ;;  %s1100_s2 = int_to_ptr.hbm [resolvable:$true] %s1099_s2 }
 0x3b4   : > { %s1384_s26 = sshra.s32 %s1100_s2, 4  ;;  %s1385_s26 = int_to_ptr.hbm [resolvable:$true] %s1384_s26 }
 0x3b5   : > { %v814_v50 = vpop.f32.mrf.mxu0  ;;  %s1386_s17 = scalar_lea.hbm %s1385_s26, 8  ;;  %p1391_p1 = scmp.lt.s32.totalorder %s1385_s26, %s1802_s14 }
 0x3b6   : > { %p1387_p12 = scmp.ne.s32.totalorder %s1385_s26, %s1386_s17  ;;  %p1392_p2 = scmp.lt.s32.totalorder %s1390_s28, %s1386_s17 }
 0x3b8   : > { %p1388_p13 = pnand %p1387_p12, %p1575_p4  ;;  %p1393_p3 = por %p1392_p2, %p1391_p1 }
 0x3b9   : > { %833 = vrot.lane.b32.xlu2 %v832_v51, %s1458_s21  ;;  %s1084_s21 = scalar_lea.sflag [#allocation6], %s481_s24 }
 0x3ba   : > { %p1389_p0 = pneg %p1388_p13 }
 0x3bc   : > { %p1394_p5 = pnand %p1393_p3, %p1389_p0 }
 0x403   : > { %v824_v54 = vpop.permute.xlu2 %823 }
 0x404   : > { %v837_v57 = vsel %vm602_vm2, %v816_v56, %v824_v54 }
 0x40b   : > { %v829_v55 = vpop.permute.xlu2 %828 }
 0x40c   : > { %v840_v58 = vsel %vm838_vm7, %v837_v57, %v829_v55  ;;  %v1343_v55 = vld [vmem:[%s1799_s11] ss:$0 sm:$0xff] }
 0x413   : > { %v834_v59 = vpop.permute.xlu2 %833 }
 0x414   : > { %v843_v60 = vsel %vm841_vm8, %v840_v58, %v834_v59 }
 0x415   : > { %1213 = vmatmul.msk.bf16.vlgmr.msra.gmra.mxu1 %vm520_vm0, %v843_v60 }
 0x492   : > { %v876_v62 = vpop.f32.mrf.mxu1 }
 0x493   : > { %v877_v63 = vadd.f32 %v1339_v61, %v876_v62 }
 0x495   : > { %v882_v0 = vadd.f32 %v877_v63, %v1604_v2 }
 0x497   : > { %v885_v1 = vsel %vm520_vm0, %v882_v0, 0.0 }
 0x498   : > { %886 = vadd.xlane.f32.xlu1 %v885_v1 }
 0x49a   : > { %v878_v3 = vpop.f32.mrf.mxu1 }
 0x50b   : > { %v887_v12 = vpop.xlane.xlu1 %886 }
 0x50c   : > { %v895_v13 = vmul.f32 %v1692_v11, %v887_v12 }
 0x50e   : > { %v896_v14 = vsub.f32 %v882_v0, %v895_v13  ;;  %v1344_v13 = vld [vmem:[%s1800_s12] ss:$0 sm:$0xff] }
 0x510   : > { %v897_v15 = vmul.f32 %v896_v14, %v896_v14 }
 0x512   : > { %v898_v2 = vsel %vm520_vm0, %v897_v15, 0.0  ;;  %v1345_v15 = vld [vmem:[%s1801_s13] ss:$0 sm:$0xff] }
 0x513   : > { %899 = vadd.xlane.f32.xlu2 %v898_v2 }
 0x586   : > { %v900_v19 = vpop.xlane.xlu2 %899 }
 0x587   : > { %v901_v20 = vmul.f32 %v900_v19, %v1692_v11 }
 0x589   : > { %v902_v22 = vadd.f32 1e-05, %v901_v20 }
 0x58b   : > { %1364 = vrsqrt.f32 %v902_v22  ;;  %vm909_vm11 = vweird.f32 %v902_v22 }
 0x591   : > { %v1365_v23 = vpop.eup %1364 }
 0x592   : > { %v904_v24 = vmul.f32 %v1365_v23, %v902_v22  ;;  %vm910_vm10 = vweird.f32 %v1365_v23 }
 0x593   : > { %vm911_vm12 = vmor %vm909_vm11, %vm910_vm10 }
 0x594   : > { %v905_v25 = vmul.f32 %v1365_v23, %v904_v24 }
 0x596   : > { %v906_v26 = vmul.f32 0.5, %v905_v25 }
 0x598   : > { %v907_v27 = vsub.f32 1.5, %v906_v26 }
 0x59a   : > { %v908_v9 = vmul.f32 %v1365_v23, %v907_v27 }
 0x59c   : > { %v912_v29 = vsel %vm911_vm12, %v1365_v23, %v908_v9 }
 0x59d   : > { %v913_v30 = vmul.f32 %v912_v29, %v896_v14 }
 0x59f   : > { %v917_v32 = vmul.f32 %v1340_v28, %v913_v30 }
 0x5a1   : > { %v921_v33 = vadd.f32 %v1341_v31, %v917_v32 }
 0x5a3   : > { %v922_v34 = vpack.c.bf16 %v921_v33, %v921_v33 }
 0x5a5   : > { %1222 = vmatmul.msk.bf16.vlgmr.msra.gmra.mxu2 %vm520_vm0, %v922_v34 }
 0x628   : > { %v955_v42 = vpop.f32.mrf.mxu2 }
 0x629   : > { %v956_v43 = vadd.f32 %v1342_v41, %v955_v42 }
 0x62b   : > { %v960_v44 = vmul.f32 0.044715, %v956_v43  ;;  %v959_v51 = vmul.f32 0.5, %v956_v43 }
 0x62d   : > { %v961_v45 = vmul.f32 %v960_v44, %v956_v43 }
 0x62f   : > { %v962_v46 = vmul.f32 %v961_v45, %v956_v43 }
 0x630   : > { %v957_v47 = vpop.f32.mrf.mxu2 }
 0x631   : > { %v963_v48 = vadd.f32 %v962_v46, %v956_v43 }
 0x633   : > { %v964_v49 = vmul.f32 0.7978846, %v963_v48 }
 0x635   : > { %1366 = vtanh.f32 %v964_v49 }
 0x63b   : > { %v1367_v50 = vpop.eup %1366 }
 0x63c   : > { %v966_v52 = vadd.f32 1.0, %v1367_v50 }
 0x63e   : > { %v967_v53 = vmul.f32 %v966_v52, %v959_v51 }
 0x640   : > { %v968_v54 = vpack.c.bf16 %v967_v53, %v967_v53 }
 0x642   : > { %1045 = vmatmul.bf16.vlgmr.msra.gmra.mxu3 %v968_v54 }
 0x6c5   : > { %v1046_v56 = vpop.f32.mrf.mxu3 }
 0x6c6   : > { %v1047_v57 = vadd.f32 %v1343_v55, %v1046_v56 }
 0x6c8   : > { %v1052_v58 = vsel %vm520_vm0, %v1047_v57, 0.0 }
 0x6c9   : > { %1053 = vadd.xlane.f32.xlu1 %v1052_v58 }
 0x6cd   : > { %v1048_v59 = vpop.f32.mrf.mxu3 }
 0x73c   : > { %v1054_v60 = vpop.xlane.xlu1 %1053 }
 0x73d   : > { %v1055_v61 = vmul.f32 %v1054_v60, %v1692_v11 }
 0x73f   : > { %v1056_v62 = vsub.f32 %v1047_v57, %v1055_v61 }
 0x741   : > { %v1057_v63 = vmul.f32 %v1056_v62, %v1056_v62 }
 0x743   : > { %v1058_v0 = vsel %vm520_vm0, %v1057_v63, 0.0 }
 0x744   : > { %1059 = vadd.xlane.f32.xlu0 %v1058_v0 }
 0x7b7   : > { %v1060_v1 = vpop.xlane.xlu0 %1059 }
 0x7b8   : > { %v1061_v3 = vmul.f32 %v1060_v1, %v1692_v11 }
 0x7ba   : > { %v1062_v4 = vadd.f32 2.5e-06, %v1061_v3 }
 0x7bc   : > { %1368 = vrsqrt.f32 %v1062_v4  ;;  %vm1069_vm14 = vweird.f32 %v1062_v4 }
 0x7c2   : > { %v1369_v5 = vpop.eup %1368 }
 0x7c3   : > { %v1064_v6 = vmul.f32 %v1369_v5, %v1062_v4  ;;  %vm1070_vm13 = vweird.f32 %v1369_v5 }
 0x7c4   : > { %vm1071_vm15 = vmor %vm1069_vm14, %vm1070_vm13 }
 0x7c5   : > { %v1065_v7 = vmul.f32 %v1369_v5, %v1064_v6 }
 0x7c7   : > { %v1066_v8 = vmul.f32 0.5, %v1065_v7 }
 0x7c9   : > { %v1067_v10 = vsub.f32 1.5, %v1066_v8 }
 0x7cb   : > { %v1068_v12 = vmul.f32 %v1369_v5, %v1067_v10 }
 0x7cd   : > { %v1072_v11 = vsel %vm1071_vm15, %v1369_v5, %v1068_v12 }
 0x7ce   : > { %v1073_v14 = vmul.f32 %v1072_v11, %v1056_v62 }
 0x7d0   : > { %v1077_v2 = vmul.f32 %v1344_v13, %v1073_v14 }
 0x7d2   : > { %v1081_v16 = vadd.f32 %v1345_v15, %v1077_v2 }
 0x7d4   : > { %1082 = vst.msk [vmem:[%s483_s1] sm:$0xff] %vm520_vm0, %v1081_v16 }
 0x7d5   : > { %1397 = shalt.err (!%p1394_p5)
}
 0x7d6   : > { %1273 = dma.vmem_to_hbm [thread:$0]  (%p1575_p4), %s1098_s16, 128, %s1100_s2, %s1084_s21  }
 0x7d7 PF: > { %p1279_p6 = scmp.ge.s32.totalorder %s1448_s18, 2  ;;  %s1111_s1 = sand.u32 1, %s1428_s29  }
 0x7d8   : > { %s1112_s24 = scalar_lea.sflag [#allocation6], %s1111_s1 }
 0x7d9   : > { %p1276_p7 = pnand %p1279_p6, %p1582_p8 }
 0x7db   : > { %p1277_p9 = pneg %p1276_p7 }
 0x7dd   : > { %1423 = dma.done.wait (%p1277_p9), %s1112_s24, 128  }
 0x7de   : > { %1425 = vsyncadd (%p1277_p9), %s1112_s24, 4294967168  ;;  %s27_s18 = sadd.s32 1, %s1448_s18   ;;  %s1816_s27 = sld [smem:[#allocation10_spill]] }
 0x7df   : > { %p24_p10 = scmp.ge.s32.totalorder %s27_s18, 4   ;;  %s1817_s16 = sld [smem:[#allocation8_spill]] }
 0x7e0   : > { %s1818_s17 = sld [smem:[#allocation9_spill]]  ;;  %s1819_s29 = smov %s1432_s30 }
 0x7e1   : > { %s1820_s30 = smov %s1436_s15  ;;  %26 = sbr.rel (!%p24_p10) target bundleno = 8 (0x8), region = 120 }
 0x7e4   : > { %s1821_s15 = smov %s1816_s27 }
 0x7e6   :  { %1118 = vsyncpa [#allocation6], 1 }
 0x7e7   :  { %1120 = vsyncpa [#allocation6 + $0x1], 1 }

// kernel: tpu_custom_call.1
= control target key start
LH: loop header
LB: loop body
LE: loop exit
PB: predicated region body
PF: predicated region fallthrough
CT: control target
= control target key end

     0   :  { %s2379_s0 = inlined_call_operand.vmem [shape: f32[2,8,32], index: 0, kind: input, shape index: {}]   ;;  %s2380_s1 = inlined_call_operand.vmem [shape: s8[2,1,8], index: 1, kind: input, shape index: {}]   ;;  %s2381_s2 = inlined_call_operand.vmem [shape: bf16[32,96], index: 2, kind: input, shape index: {}]   ;;  %s2382_s3 = inlined_call_operand.vmem [shape: f32[1,96], index: 3, kind: input, shape index: {}]   ;;  %s2383_s4 = inlined_call_operand.vmem [shape: bf16[32,32], index: 4, kind: input, shape index: {}]   ;;  %s2384_s5 = inlined_call_operand.vmem [shape: f32[1,32], index: 5, kind: input, shape index: {}]   ;;  %s2385_s6 = inlined_call_operand.vmem [shape: f32[1,32], index: 6, kind: input, shape index: {}]   ;;  %s2386_s7 = inlined_call_operand.vmem [shape: f32[1,32], index: 7, kind: input, shape index: {}]   ;;  %s2387_s8 = inlined_call_operand.vmem [shape: bf16[32,128], index: 8, kind: input, shape index: {}]   ;;  %s2388_s9 = inlined_call_operand.vmem [shape: f32[1,128], index: 9, kind: input, shape index: {}]   ;;  %s2389_s10 = inlined_call_operand.vmem [shape: bf16[128,32], index: 10, kind: input, shape index: {}]   ;;  %s2390_s11 = inlined_call_operand.vmem [shape: f32[1,32], index: 11, kind: input, shape index: {}]   ;;  %s2391_s12 = inlined_call_operand.vmem [shape: f32[1,32], index: 12, kind: input, shape index: {}]   ;;  %s2392_s13 = inlined_call_operand.vmem [shape: f32[1,32], index: 13, kind: input, shape index: {}]   ;;  %s2393_s14 = inlined_call_operand.hbm [shape: f32[2,8,32], index: 14, kind: output, shape index: {}]  }
   0x1   :  { %2396 = sst [smem:[#allocation11_spill]] %s2379_s0 }
   0x2   :  { %2397 = sst [smem:[#allocation12_spill]] %s2380_s1 }
   0x3   :  { %2398 = sst [smem:[#allocation13_spill]] %s2381_s2 }
   0x4   :  { %19 = vsyncpa [#allocation6], 0 }
   0x5   :  { %21 = vsyncpa [#allocation6 + $0x1], 0  ;;  %s1995_s29 = smov 0   ;;  %s1997_s30 = smov 0  }
   0x6   :  { %s1999_s15 = smov 0   ;;  %s2001_s16 = smov 0  }
   0x7   :  { %s2003_s17 = smov 0   ;;  %s2005_s18 = smov 0  }
   0x8 LB: > { %2399 = sst [smem:[#allocation8_spill]] %s1902_s17  ;;  %s1637_s19 = sadd.s32 4294967295, %s1906_s18   ;;  %s1906_s18 = sphi %s2005_s18, %s27_s18   ;;  %s1902_s17 = sphi %s2003_s17, %s2409_s17   ;;  %s1898_s16 = sphi %s2001_s16, %s2408_s16   ;;  %s1894_s15 = sphi %s1999_s15, %s2412_s15   ;;  %s1890_s30 = sphi %s1997_s30, %s2411_s30   ;;  %s1886_s29 = sphi %s1995_s29, %s2410_s29  }
   0x9   : > { %s1638_s20 = sadd.s32 4294967294, %s1906_s18   ;;  %s39_s21 = sadd.s32 1, %s1902_s17 }
   0xa   : > { %s352_s22 = sadd.s32 1, %s1894_s15  ;;  %p41_p0 = scmp.ge.s32.totalorder %s39_s21, 2 }
   0xb   : > { %p362_p1 = scmp.ne.s32.totalorder %s1894_s15, %s1890_s30  ;;  %p363_p2 = scmp.eq.s32.totalorder %s1637_s19, 1 }
   0xc   : > { %p368_p3 = scmp.ne.s32.totalorder %s1890_s30, %s1886_s29  ;;  %s2414_s21 = smov (%p41_p0, %s39_s21), 0 }
   0xd   : > { %2400 = sst [smem:[#allocation9_spill]] %s2414_s21  ;;  %p2035_p4 = por %p363_p2, %p362_p1 }
   0xe   : > { %p369_p5 = scmp.eq.s32.totalorder %s1638_s20, 1  ;;  %s347_s24 = ssub.s32 %s1902_s17, %s2414_s21 }
   0xf   : > { %p1641_p6 = scmp.ge.s32.totalorder %s1906_s18, 1  ;;  %p350_p7 = scmp.eq.s32.totalorder %s347_s24, 0 }
  0x10   : > { %p2042_p8 = por %p369_p5, %p368_p3  ;;  %p436_p9 = scmp.lt.s32.totalorder %s1906_s18, 3 }
  0x11   : > { %s2048_s26 = scalar_select %p350_p7, %s1894_s15, %s352_s22  }
  0x12   : > { %p437_p10 = pnand %p1641_p6, %p436_p9 }
  0x13   : > { %2403 = sst [smem:[#allocation10_spill]] %s2048_s26  ;;  %p484_p11 = scmp.lt.s32.totalorder (!%p437_p10), %s1898_s16, 1 }
  0x14   : > { %440 = sbr.rel (%p437_p10) target bundleno = 2075 (0x81b), region = 76  ;;  %s2404_s2 = sld [smem:[#allocation13_spill]] (!%p437_p10) }
  0x15   : > { %s2405_s0 = sld [smem:[#allocation11_spill]] (!%p437_p10)  ;;  %s1908_s19 = smov (!%p437_p10), 104  }
  0x16   : > { %s1909_s17 = smov (!%p437_p10), 120   ;;  %s1912_s20 = smov (!%p437_p10), 64  }
  0x17   : > { %s2406_s1 = sld [smem:[#allocation12_spill]] (!%p437_p10) }
  0x19   : > { %s2058_s24 = scalar_select %p484_p11, %s1898_s16, 1  ;;  %vm520_vm0 = vcmask 261120   ;;  %v1796_v4 = vld [vmem:[%s2382_s3] ss:$0 sm:$0xff]  ;;  %v1913_v9 = vmov 1983009808  }
  0x1a   : > { %v1716_v0 = vld [vmem:[%s2404_s2 + $0x8] sm:$0xff]  ;;  %v1715_v1 = vld [vmem:[%s2404_s2] sm:$0xff]  ;;  %v559_v10 = vunpack.c.l.s4 %v1913_v9  ;;  %v1914_v18 = vmov 1934713408   ;;  %vm568_vm1 = vcmask 1047556   ;;  %vm664_vm2 = vcmask 60416  }
  0x1b   : > { %530 = vmatpush.bf16.msra.mxu0 %v1716_v0  ;;  %s1643_s21 = sshll.u32 %s2058_s24, 3  ;;  %v573_v19 = vunpack.c.l.s4 %v1914_v18  ;;  %vm946_vm3 = vcmask 64512   ;;  %vm1086_vm7 = vcmask 1043456   ;;  %vm1294_vm8 = vcmask 130048  }
  0x1c   : > { %s487_s26 = scalar_lea.vmem %s2405_s0, %s1643_s21  ;;  %s1910_s21 = smov 96   ;;  %v2080_v14 = vunpack.c.0.s8 %v559_v10  ;;  %vm1297_vm9 = vcmask 195584  }
  0x1d   : > { %v2064_v2 = vld [vmem:[%s487_s26] sm:$0xff]  ;;  %s1911_s26 = smov 112   ;;  %v2092_v26 = vunpack.c.0.s8 %v573_v19  ;;  %s490_s28 = scalar_lea.vmem %s2406_s1, %s2058_s24 }
  0x1e   : > { %v499_v3 = vpack.c.bf16 %v2064_v2, %v2064_v2  ;;  %s1916_s24 = smov 8  }
  0x1f   : > { %531 = vmatpush.bf16.msra.mxu0 %v1715_v1 }
  0x22   : > { %1652 = vmatmul.msk.bf16.vlgmr.msra.gmra.mxu0 %vm520_vm0, %v499_v3 }
  0x9f   : > { %v533_v5 = vpop.f32.mrf.mxu0 }
  0xa0   : > { %v534_v6 = vadd.f32 %v1796_v4, %v533_v5 }
  0xa2   : > { %v537_v7 = vpack.c.bf16 %v534_v6, %v534_v6 }
  0xa4   : > { %543 = vrot.lane.b32.xlu1 %v537_v7, %s1908_s19  ;;  %539 = vrot.lane.b32.xlu0 %v537_v7, %s1909_s17  ;;  %v548_v16 = vshrl.u32 %v537_v7, 16  ;;  %s1917_s19 = smov 16   ;;  %s1918_s17 = smov 24  }
  0xa7   : > { %v535_v8 = vpop.f32.mrf.mxu0 }
  0xac   : > { %669 = vrot.lane.b32.xlu1 %v537_v7, %s1910_s21  ;;  %541 = vrot.lane.b32.xlu0 %v537_v7, %s1911_s26 }
  0xb4   : > { %799 = vrot.lane.b32.xlu1 %v537_v7, %s1912_s20 }
 0x116   : > { %v2073_v11 = vpop.permute.xlu1 %543  ;;  %v2075_v12 = vpop.permute.xlu0 %539 }
 0x117   : > { %v549_v13 = vshrl.u32 %v2075_v12, 16  ;;  %675 = vrot.lane.b32.xlu0 %v2073_v11, %s1910_s21  ;;  %671 = vrot.lane.b32.xlu2 %v2075_v12, %s1910_s21  ;;  %v547_v15 = vpack.i.b16 %v2075_v12, %v537_v7  ;;  %v555_v22 = vshrl.u32 %v2073_v11, 16 }
 0x119   : > { %v550_v17 = vpack.i.b16 %v549_v13, %v548_v16  ;;  %v561_v20 = vperm.slane %v547_v15, %v2080_v14 }
 0x11b   : > { %v588_v23 = vperm.slane %v550_v17, %v2080_v14  ;;  %v570_v27 = vrot.slane %v561_v20, 4 }
 0x11d   : > { %v596_v30 = vrot.slane %v588_v23, 4 }
 0x11e   : > { %v2084_v21 = vpop.permute.xlu0 %541  ;;  %v670_v19 = vpop.permute.xlu1 %669 }
 0x11f   : > { %v553_v24 = vpack.i.b16 %v2073_v11, %v2084_v21  ;;  %v554_v25 = vshrl.u32 %v2084_v21, 16  ;;  %673 = vrot.lane.b32.xlu2 %v2084_v21, %s1910_s21 }
 0x121   : > { %v556_v28 = vpack.i.b16 %v555_v22, %v554_v25  ;;  %v566_v29 = vperm.slane %v553_v24, %v2080_v14  ;;  %v680_v22 = vshrl.u32 %v670_v19, 16 }
 0x123   : > { %v567_v31 = vrot.slane %v566_v29, 4  ;;  %v571_v32 = vsel %vm568_vm1, %v566_v29, %v570_v27  ;;  %v593_v33 = vperm.slane %v556_v28, %v2080_v14 }
 0x124   : > { %v579_v34 = vperm.slane %v571_v32, %v2092_v26 }
 0x125   : > { %v569_v35 = vsel %vm568_vm1, %v567_v31, %v561_v20  ;;  %v594_v36 = vrot.slane %v593_v33, 4  ;;  %v597_v37 = vsel %vm568_vm1, %v593_v33, %v596_v30 }
 0x126   : > { %v575_v38 = vperm.slane %v569_v35, %v2092_v26  ;;  %v582_v39 = vrot.slane %v579_v34, 4  ;;  %v605_v40 = vperm.slane %v597_v37, %v2092_v26 }
 0x127   : > { %v595_v41 = vsel %vm568_vm1, %v594_v36, %v588_v23 }
 0x128   : > { %v580_v42 = vrot.slane %v575_v38, 4  ;;  %v583_v43 = vsel %vm568_vm1, 0, %v582_v39  ;;  %v601_v44 = vperm.slane %v595_v41, %v2092_v26  ;;  %v608_v45 = vrot.slane %v605_v40, 4 }
 0x129   : > { %v615_v46 = vrot.slane %v583_v43, 4  ;;  %v610_v50 = vsel %vm568_vm1, %v582_v39, %v575_v38 }
 0x12a   : > { %v581_v47 = vsel %vm568_vm1, 0, %v580_v42  ;;  %v606_v48 = vrot.slane %v601_v44, 4  ;;  %v609_v49 = vsel %vm568_vm1, 0, %v608_v45  ;;  %v629_v55 = vsel %vm568_vm1, %v608_v45, %v601_v44 }
 0x12b   : > { %v616_v51 = vsel %vm568_vm1, %v615_v46, %v581_v47  ;;  %v634_v52 = vrot.slane %v609_v49, 4  ;;  %v614_v57 = vperm.slane %v610_v50, %v2080_v14  ;;  %v633_v61 = vperm.slane %v629_v55, %v2080_v14 }
 0x12c   : > { %v607_v53 = vsel %vm568_vm1, 0, %v606_v48  ;;  %v620_v54 = vperm.slane %v616_v51, %v2080_v14 }
 0x12d   : > { %v635_v56 = vsel %vm568_vm1, %v634_v52, %v607_v53 }
 0x12e   : > { %v621_v58 = vrot.slane %v620_v54, 4  ;;  %v639_v59 = vperm.slane %v635_v56, %v2080_v14 }
 0x130   : > { %v622_v60 = vsel %vm568_vm1, %v621_v58, %v614_v57  ;;  %v640_v62 = vrot.slane %v639_v59, 4 }
 0x131   : > { %v626_v63 = vperm.slane %v622_v60, %v2092_v26 }
 0x132   : > { %v641_v0 = vsel %vm568_vm1, %v640_v62, %v633_v61 }
 0x133   : > { %v627_v1 = vrot.slane %v626_v63, 4  ;;  %v645_v3 = vperm.slane %v641_v0, %v2092_v26  ;;  %v652_v4 = vshrl.u32 %v626_v63, 16 }
 0x135   : > { %v628_v5 = vsel %vm568_vm1, 0, %v627_v1  ;;  %v646_v6 = vrot.slane %v645_v3, 4  ;;  %v650_v7 = vpack.i.b16 %v645_v3, %v626_v63  ;;  %v653_v8 = vshrl.u32 %v645_v3, 16 }
 0x136   : > { %v660_v15 = vshrl.u32 %v628_v5, 16 }
 0x137   : > { %v647_v9 = vsel %vm568_vm1, 0, %v646_v6  ;;  %v654_v10 = vpack.i.b16 %v653_v8, %v652_v4  ;;  %665 = vst.msk [vmem:[#allocation2] sm:$0xf] %vm664_vm2, %v650_v7 }
 0x138   : > { %v658_v13 = vpack.i.b16 %v647_v9, %v628_v5  ;;  %v661_v16 = vshrl.u32 %v647_v9, 16 }
 0x139   : > { %666 = vst.msk [vmem:[#allocation2 + $0x4] sm:$0xf] %vm664_vm2, %v654_v10 }
 0x13a   : > { %v662_v17 = vpack.i.b16 %v661_v16, %v660_v15  ;;  %667 = vst.msk [vmem:[#allocation2 + $0x8] sm:$0xf] %vm664_vm2, %v658_v13 }
 0x13c   : > { %668 = vst.msk [vmem:[#allocation2 + $0xc] sm:$0xf] %vm664_vm2, %v662_v17 }
 0x171   : > { %v672_v18 = vpop.permute.xlu2 %671 }
 0x172   : > { %v681_v20 = vshrl.u32 %v672_v18, 16  ;;  %v679_v23 = vpack.i.b16 %v672_v18, %v670_v19 }
 0x174   : > { %v682_v24 = vpack.i.b16 %v681_v20, %v680_v22  ;;  %v693_v27 = vperm.slane %v679_v23, %v2080_v14 }
 0x176   : > { %v719_v29 = vperm.slane %v682_v24, %v2080_v14  ;;  %v701_v33 = vrot.slane %v693_v27, 4 }
 0x178   : > { %v727_v36 = vrot.slane %v719_v29, 4 }
 0x179   : > { %v674_v25 = vpop.permute.xlu2 %673 }
 0x17a   : > { %v686_v30 = vshrl.u32 %v674_v25, 16 }
 0x189   : > { %v676_v28 = vpop.permute.xlu0 %675 }
 0x18a   : > { %v685_v31 = vpack.i.b16 %v676_v28, %v674_v25  ;;  %v687_v32 = vshrl.u32 %v676_v28, 16 }
 0x18c   : > { %v688_v34 = vpack.i.b16 %v687_v32, %v686_v30  ;;  %v698_v35 = vperm.slane %v685_v31, %v2080_v14 }
 0x18e   : > { %v699_v37 = vrot.slane %v698_v35, 4  ;;  %v702_v38 = vsel %vm568_vm1, %v698_v35, %v701_v33  ;;  %v724_v39 = vperm.slane %v688_v34, %v2080_v14  ;;  %v934_v34 = vld [vmem:[#allocation2] sm:$0xf]  ;;  %v935_v35 = vld [vmem:[#allocation2 + $0x4] sm:$0xf] }
 0x18f   : > { %v710_v40 = vperm.slane %v702_v38, %v2092_v26  ;;  %v1023_v38 = vld [vmem:[%s490_s28] sm:$0x1]  ;;  %s481_s28 = sand.u32 1, %s1890_s30  }
 0x190   : > { %v700_v41 = vsel %vm568_vm1, %v699_v37, %v693_v27  ;;  %v725_v42 = vrot.slane %v724_v39, 4  ;;  %v728_v43 = vsel %vm568_vm1, %v724_v39, %v727_v36  ;;  %v936_v36 = vld [vmem:[#allocation2 + $0x8] sm:$0xf]  ;;  %v937_v37 = vld [vmem:[#allocation2 + $0xc] sm:$0xf]  ;;  %vm1024_vm4 = vnez %v1023_v38 }
 0x191   : > { %v706_v44 = vperm.slane %v700_v41, %v2092_v26  ;;  %v713_v45 = vrot.slane %v710_v40, 4  ;;  %v736_v46 = vperm.slane %v728_v43, %v2092_v26  ;;  %v1915_v39 = vmov 0  }
 0x192   : > { %v726_v47 = vsel %vm568_vm1, %v725_v42, %v719_v29  ;;  %v1025_v40 = vsel %vm1024_vm4, 16843009, %v1915_v39 }
 0x193   : > { %v711_v48 = vrot.slane %v706_v44, 4  ;;  %v714_v49 = vsel %vm568_vm1, 0, %v713_v45  ;;  %v732_v50 = vperm.slane %v726_v47, %v2092_v26  ;;  %v739_v51 = vrot.slane %v736_v46, 4 }
 0x194   : > { %v746_v52 = vrot.slane %v714_v49, 4  ;;  %v741_v56 = vsel %vm568_vm1, %v713_v45, %v706_v44  ;;  %v1026_v41 = vunpack.c.0.s8 %v1025_v40 }
 0x195   : > { %v712_v53 = vsel %vm568_vm1, 0, %v711_v48  ;;  %v737_v54 = vrot.slane %v732_v50, 4  ;;  %v740_v55 = vsel %vm568_vm1, 0, %v739_v51  ;;  %v760_v61 = vsel %vm568_vm1, %v739_v51, %v732_v50 }
 0x196   : > { %v747_v57 = vsel %vm568_vm1, %v746_v52, %v712_v53  ;;  %v765_v58 = vrot.slane %v740_v55, 4  ;;  %v745_v63 = vperm.slane %v741_v56, %v2080_v14  ;;  %v764_v4 = vperm.slane %v760_v61, %v2080_v14 }
 0x197   : > { %v738_v59 = vsel %vm568_vm1, 0, %v737_v54  ;;  %v751_v60 = vperm.slane %v747_v57, %v2080_v14  ;;  %vm1027_vm5 = vcmp.ne.s32.totalorder %v1026_v41, 0 }
 0x198   : > { %v766_v62 = vsel %vm568_vm1, %v765_v58, %v738_v59  ;;  %v1028_v42 = vsel %vm1027_vm5, 1, %v1915_v39 }
 0x199   : > { %v752_v0 = vrot.slane %v751_v60, 4  ;;  %v770_v1 = vperm.slane %v766_v62, %v2080_v14  ;;  %v1029_v43 = vperm.slane %v1028_v42, 0  ;;  %v800_v60 = vpop.permute.xlu1 %799 }
 0x19b   : > { %v753_v3 = vsel %vm568_vm1, %v752_v0, %v745_v63  ;;  %v771_v5 = vrot.slane %v770_v1, 4  ;;  %vm1030_vm6 = vcmp.eq.s32.totalorder %v1029_v43, 1 }
 0x19c   : > { %v757_v6 = vperm.slane %v753_v3, %v2092_v26 }
 0x19d   : > { %v772_v7 = vsel %vm568_vm1, %v771_v5, %v764_v4 }
 0x19e   : > { %v758_v8 = vrot.slane %v757_v6, 4  ;;  %v776_v9 = vperm.slane %v772_v7, %v2092_v26  ;;  %v783_v10 = vshrl.u32 %v757_v6, 16 }
 0x1a0   : > { %v759_v13 = vsel %vm568_vm1, 0, %v758_v8  ;;  %v777_v15 = vrot.slane %v776_v9, 4  ;;  %v781_v16 = vpack.i.b16 %v776_v9, %v757_v6  ;;  %v784_v17 = vshrl.u32 %v776_v9, 16 }
 0x1a1   : > { %v791_v22 = vshrl.u32 %v759_v13, 16 }
 0x1a2   : > { %v778_v18 = vsel %vm568_vm1, 0, %v777_v15  ;;  %v785_v19 = vpack.i.b16 %v784_v17, %v783_v10  ;;  %795 = vst.msk [vmem:[#allocation3] sm:$0xf] %vm664_vm2, %v781_v16 }
 0x1a3   : > { %v789_v20 = vpack.i.b16 %v778_v18, %v759_v13  ;;  %v792_v23 = vshrl.u32 %v778_v18, 16 }
 0x1a4   : > { %796 = vst.msk [vmem:[#allocation3 + $0x4] sm:$0xf] %vm664_vm2, %v785_v19  ;;  %v810_v19 = vshrl.u32 %v800_v60, 16 }
 0x1a5   : > { %v793_v24 = vpack.i.b16 %v792_v23, %v791_v22  ;;  %797 = vst.msk [vmem:[#allocation3 + $0x8] sm:$0xf] %vm664_vm2, %v789_v20 }
 0x1a7   : > { %798 = vst.msk [vmem:[#allocation3 + $0xc] sm:$0xf] %vm664_vm2, %v793_v24 }
 0x1a9   : > { %v938_v25 = vld [vmem:[#allocation3] sm:$0xf] }
 0x1aa   : > { %v951_v27 = vsel %vm946_vm3, %v938_v25, 0 }
 0x1ab   : > { %960 = vmatpush.bf16.xpose.msra.mxu1 %v951_v27  ;;  %v939_v28 = vld [vmem:[#allocation3 + $0x4] sm:$0xf] }
 0x1ac   : > { %v970_v29 = vsel %vm946_vm3, %v939_v28, 0  ;;  %v940_v30 = vld [vmem:[#allocation3 + $0x8] sm:$0xf] }
 0x1ad   : > { %979 = vmatpush.bf16.xpose.msra.mxu2 %v970_v29  ;;  %v989_v31 = vsel %vm946_vm3, %v940_v30, 0 }
 0x1ae   : > { %998 = vmatpush.bf16.xpose.msra.mxu3 %v989_v31  ;;  %v941_v32 = vld [vmem:[#allocation3 + $0xc] sm:$0xf] }
 0x1af   : > { %v1008_v33 = vsel %vm946_vm3, %v941_v32, 0 }
 0x1b0   : > { %1017 = vmatpush.bf16.xpose.msrb.mxu0 %v1008_v33 }
 0x1b2   : > { %1653 = vmatmul.msk.bf16.vlgmr.msra.gmra.mxu1 %vm946_vm3, %v934_v34 }
 0x1b4   : > { %1654 = vmatmul.msk.bf16.vlgmr.msra.gmra.mxu2 %vm946_vm3, %v935_v35 }
 0x1b5   : > { %1655 = vmatmul.msk.bf16.vlgmr.msra.gmra.mxu3 %vm946_vm3, %v936_v36 }
 0x1b7   : > { %1656 = vmatmul.msk.bf16.vlgmr.msrb.gmra.mxu0 %vm946_vm3, %v937_v37 }
 0x22f   : > { %v962_v44 = vpop.f32.mrf.mxu1 }
 0x230   : > { %v1031_v45 = vsel %vm1030_vm6, %v962_v44, -65504.0 }
 0x231   : > { %v1035_v46 = vsel %vm946_vm3, %v1031_v45, -inf }
 0x232   : > { %1036 = vmax.xlane.f32.xlu0 %v1035_v46 }
 0x234   : > { %v1019_v47 = vpop.f32.mrf.mxu0 }
 0x235   : > { %v1034_v48 = vsel %vm1030_vm6, %v1019_v47, -65504.0 }
 0x236   : > { %v1044_v49 = vsel %vm946_vm3, %v1034_v48, -inf }
 0x237   : > { %v964_v50 = vpop.f32.mrf.mxu1  ;;  %v981_v51 = vpop.f32.mrf.mxu2  ;;  %1045 = vmax.xlane.f32.xlu2 %v1044_v49 }
 0x238   : > { %v1032_v52 = vsel %vm1030_vm6, %v981_v51, -65504.0  ;;  %v1000_v53 = vpop.f32.mrf.mxu3 }
 0x239   : > { %v1038_v54 = vsel %vm946_vm3, %v1032_v52, -inf  ;;  %v1033_v55 = vsel %vm1030_vm6, %v1000_v53, -65504.0 }
 0x23a   : > { %1039 = vmax.xlane.f32.xlu1 %v1038_v54  ;;  %v1041_v57 = vsel %vm946_vm3, %v1033_v55, -inf }
 0x23c   : > { %v1021_v56 = vpop.f32.mrf.mxu0 }
 0x23f   : > { %v983_v58 = vpop.f32.mrf.mxu2  ;;  %1042 = vmax.xlane.f32.xlu2 %v1041_v57 }
 0x240   : > { %v1002_v59 = vpop.f32.mrf.mxu3 }
 0x246   : > { %803 = vrot.lane.b32.xlu0 %v2084_v21, %s1912_s20 }
 0x253   : > { %805 = vrot.lane.b32.xlu1 %v2073_v11, %s1912_s20 }
 0x257   : > { %801 = vrot.lane.b32.xlu2 %v2075_v12, %s1912_s20 }
 0x2a5   : > { %v1037_v61 = vpop.xlane.xlu0 %1036 }
 0x2a6   : > { %v1047_v62 = vsub.f32 %v1031_v45, %v1037_v61 }
 0x2a8   : > { %v1051_v63 = vmul.f32 1.442695, %v1047_v62 }
 0x2aa   : > { %1804 = vpow2.f32 %v1051_v63  ;;  %v1046_v0 = vpop.xlane.xlu2 %1045 }
 0x2ab   : > { %v1050_v5 = vsub.f32 %v1034_v48, %v1046_v0 }
 0x2ad   : > { %v1040_v1 = vpop.xlane.xlu1 %1039  ;;  %v1057_v12 = vmul.f32 1.442695, %v1050_v5 }
 0x2ae   : > { %v1048_v3 = vsub.f32 %v1032_v52, %v1040_v1 }
 0x2b0   : > { %v2182_v4 = vpop.eup %1804  ;;  %v1053_v6 = vmul.f32 1.442695, %v1048_v3 }
 0x2b1   : > { %v1059_v21 = vsel %vm946_vm3, %v2182_v4, 0.0 }
 0x2b2   : > { %1806 = vpow2.f32 %v1053_v6  ;;  %1060 = vadd.xlane.f32.xlu1 %v1059_v21  ;;  %v1043_v11 = vpop.xlane.xlu2 %1042 }
 0x2b3   : > { %v1049_v7 = vsub.f32 %v1033_v55, %v1043_v11 }
 0x2b5   : > { %v1055_v8 = vmul.f32 1.442695, %v1049_v7 }
 0x2b7   : > { %1808 = vpow2.f32 %v1055_v8 }
 0x2b8   : > { %v2186_v9 = vpop.eup %1806  ;;  %1810 = vpow2.f32 %v1057_v12  ;;  %v804_v24 = vpop.permute.xlu0 %803 }
 0x2b9   : > { %v1062_v10 = vsel %vm946_vm3, %v2186_v9, 0.0  ;;  %v816_v28 = vshrl.u32 %v804_v24, 16 }
 0x2ba   : > { %1063 = vadd.xlane.f32.xlu0 %v1062_v10  ;;  %v802_v13 = vpop.permute.xlu2 %801 }
 0x2bb   : > { %v811_v17 = vshrl.u32 %v802_v13, 16  ;;  %v809_v20 = vpack.i.b16 %v802_v13, %v800_v60 }
 0x2bd   : > { %v2190_v15 = vpop.eup %1808  ;;  %v812_v23 = vpack.i.b16 %v811_v17, %v810_v19  ;;  %v823_v25 = vperm.slane %v809_v20, %v2080_v14 }
 0x2be   : > { %v2192_v16 = vpop.eup %1810  ;;  %v1065_v18 = vsel %vm946_vm3, %v2190_v15, 0.0 }
 0x2bf   : > { %1066 = vadd.xlane.f32.xlu2 %v1065_v18  ;;  %v1068_v22 = vsel %vm946_vm3, %v2192_v16, 0.0  ;;  %v849_v29 = vperm.slane %v812_v23, %v2080_v14  ;;  %v831_v32 = vrot.slane %v823_v25, 4 }
 0x2c1   : > { %v857_v35 = vrot.slane %v849_v29, 4 }
 0x2c2   : > { %1069 = vadd.xlane.f32.xlu0 %v1068_v22 }
 0x2c5   : > { %v806_v27 = vpop.permute.xlu1 %805 }
 0x2c6   : > { %v815_v30 = vpack.i.b16 %v806_v27, %v804_v24  ;;  %v817_v31 = vshrl.u32 %v806_v27, 16 }
 0x2c8   : > { %v818_v33 = vpack.i.b16 %v817_v31, %v816_v28  ;;  %v828_v34 = vperm.slane %v815_v30, %v2080_v14 }
 0x2ca   : > { %v829_v36 = vrot.slane %v828_v34, 4  ;;  %v832_v37 = vsel %vm568_vm1, %v828_v34, %v831_v32  ;;  %v854_v38 = vperm.slane %v818_v33, %v2080_v14 }
 0x2cb   : > { %v840_v39 = vperm.slane %v832_v37, %v2092_v26 }
 0x2cc   : > { %v830_v40 = vsel %vm568_vm1, %v829_v36, %v823_v25  ;;  %v855_v41 = vrot.slane %v854_v38, 4  ;;  %v858_v42 = vsel %vm568_vm1, %v854_v38, %v857_v35 }
 0x2cd   : > { %v836_v43 = vperm.slane %v830_v40, %v2092_v26  ;;  %v843_v44 = vrot.slane %v840_v39, 4  ;;  %v866_v45 = vperm.slane %v858_v42, %v2092_v26 }
 0x2ce   : > { %v856_v46 = vsel %vm568_vm1, %v855_v41, %v849_v29 }
 0x2cf   : > { %v841_v47 = vrot.slane %v836_v43, 4  ;;  %v844_v48 = vsel %vm568_vm1, 0, %v843_v44  ;;  %v862_v49 = vperm.slane %v856_v46, %v2092_v26  ;;  %v869_v50 = vrot.slane %v866_v45, 4 }
 0x2d0   : > { %v876_v51 = vrot.slane %v844_v48, 4  ;;  %v871_v55 = vsel %vm568_vm1, %v843_v44, %v836_v43 }
 0x2d1   : > { %v842_v52 = vsel %vm568_vm1, 0, %v841_v47  ;;  %v867_v53 = vrot.slane %v862_v49, 4  ;;  %v870_v54 = vsel %vm568_vm1, 0, %v869_v50  ;;  %v890_v60 = vsel %vm568_vm1, %v869_v50, %v862_v49 }
 0x2d2   : > { %v877_v56 = vsel %vm568_vm1, %v876_v51, %v842_v52  ;;  %v895_v57 = vrot.slane %v870_v54, 4  ;;  %v875_v62 = vperm.slane %v871_v55, %v2080_v14  ;;  %v894_v3 = vperm.slane %v890_v60, %v2080_v14 }
 0x2d3   : > { %v868_v58 = vsel %vm568_vm1, 0, %v867_v53  ;;  %v881_v59 = vperm.slane %v877_v56, %v2080_v14 }
 0x2d4   : > { %v896_v61 = vsel %vm568_vm1, %v895_v57, %v868_v58 }
 0x2d5   : > { %v882_v63 = vrot.slane %v881_v59, 4  ;;  %v900_v0 = vperm.slane %v896_v61, %v2080_v14 }
 0x2d7   : > { %v883_v1 = vsel %vm568_vm1, %v882_v63, %v875_v62  ;;  %v901_v5 = vrot.slane %v900_v0, 4 }
 0x2d8   : > { %v887_v6 = vperm.slane %v883_v1, %v2092_v26 }
 0x2d9   : > { %v902_v21 = vsel %vm568_vm1, %v901_v5, %v894_v3 }
 0x2da   : > { %v888_v11 = vrot.slane %v887_v6, 4  ;;  %v906_v7 = vperm.slane %v902_v21, %v2092_v26  ;;  %v913_v12 = vshrl.u32 %v887_v6, 16 }
 0x2dc   : > { %v889_v8 = vsel %vm568_vm1, 0, %v888_v11  ;;  %v907_v10 = vrot.slane %v906_v7, 4  ;;  %v911_v13 = vpack.i.b16 %v906_v7, %v887_v6  ;;  %v914_v17 = vshrl.u32 %v906_v7, 16 }
 0x2dd   : > { %v921_v22 = vshrl.u32 %v889_v8, 16 }
 0x2de   : > { %v908_v18 = vsel %vm568_vm1, 0, %v907_v10  ;;  %v915_v19 = vpack.i.b16 %v914_v17, %v913_v12  ;;  %925 = vst.msk [vmem:[#allocation4] sm:$0xf] %vm664_vm2, %v911_v13 }
 0x2df   : > { %v919_v20 = vpack.i.b16 %v908_v18, %v889_v8  ;;  %v922_v23 = vshrl.u32 %v908_v18, 16 }
 0x2e0   : > { %926 = vst.msk [vmem:[#allocation4 + $0x4] sm:$0xf] %vm664_vm2, %v915_v19 }
 0x2e1   : > { %v923_v24 = vpack.i.b16 %v922_v23, %v921_v22  ;;  %927 = vst.msk [vmem:[#allocation4 + $0x8] sm:$0xf] %vm664_vm2, %v919_v20 }
 0x2e3   : > { %928 = vst.msk [vmem:[#allocation4 + $0xc] sm:$0xf] %vm664_vm2, %v923_v24 }
 0x2e5   : > { %v942_v25 = vld [vmem:[#allocation4] sm:$0xf] }
 0x2e6   : > { %v1088_v27 = vsel %vm1086_vm7, %v942_v25, 0 }
 0x2e7   : > { %1097 = vmatpush.bf16.msrb.mxu1 %v1088_v27  ;;  %v943_v28 = vld [vmem:[#allocation4 + $0x4] sm:$0xf] }
 0x2e8   : > { %v1107_v29 = vsel %vm1086_vm7, %v943_v28, 0  ;;  %v944_v30 = vld [vmem:[#allocation4 + $0x8] sm:$0xf] }
 0x2e9   : > { %1116 = vmatpush.bf16.msrb.mxu2 %v1107_v29  ;;  %v1126_v31 = vsel %vm1086_vm7, %v944_v30, 0 }
 0x2ea   : > { %1135 = vmatpush.bf16.msrb.mxu3 %v1126_v31  ;;  %v945_v32 = vld [vmem:[#allocation4 + $0xc] sm:$0xf] }
 0x2eb   : > { %v1145_v33 = vsel %vm1086_vm7, %v945_v32, 0 }
 0x2ec   : > { %1154 = vmatpush.bf16.msra.mxu0 %v1145_v33 }
 0x325   : > { %v1061_v34 = vpop.xlane.xlu1 %1060 }
 0x326   : > { %1812 = vrcp.f32 %v1061_v34 }
 0x32c   : > { %v1813_v35 = vpop.eup %1812 }
 0x32d   : > { %v1075_v36 = vmul.f32 %v1813_v35, %v2182_v4  ;;  %v1064_v37 = vpop.xlane.xlu0 %1063 }
 0x32e   : > { %1814 = vrcp.f32 %v1064_v37 }
 0x32f   : > { %v1079_v38 = vpack.c.bf16 %v1075_v36, %v1075_v36 }
 0x331   : > { %1657 = vmatmul.msk.bf16.vlgmr.msrb.gmra.mxu1 %vm946_vm3, %v1079_v38 }
 0x332   : > { %v1067_v39 = vpop.xlane.xlu2 %1066 }
 0x333   : > { %1816 = vrcp.f32 %v1067_v39 }
 0x334   : > { %v1815_v40 = vpop.eup %1814 }
 0x335   : > { %v1076_v41 = vmul.f32 %v1815_v40, %v2186_v9  ;;  %v1070_v42 = vpop.xlane.xlu0 %1069 }
 0x336   : > { %1818 = vrcp.f32 %v1070_v42 }
 0x337   : > { %v1080_v43 = vpack.c.bf16 %v1076_v41, %v1076_v41 }
 0x339   : > { %v1817_v44 = vpop.eup %1816  ;;  %1658 = vmatmul.msk.bf16.vlgmr.msrb.gmra.mxu2 %vm946_vm3, %v1080_v43 }
 0x33a   : > { %v1077_v45 = vmul.f32 %v1817_v44, %v2190_v15 }
 0x33c   : > { %v1819_v46 = vpop.eup %1818  ;;  %v1081_v4 = vpack.c.bf16 %v1077_v45, %v1077_v45 }
 0x33d   : > { %v1078_v47 = vmul.f32 %v1819_v46, %v2192_v16 }
 0x33e   : > { %1659 = vmatmul.msk.bf16.vlgmr.msrb.gmra.mxu3 %vm946_vm3, %v1081_v4 }
 0x33f   : > { %v1082_v48 = vpack.c.bf16 %v1078_v47, %v1078_v47 }
 0x341   : > { %1660 = vmatmul.msk.bf16.vlgmr.msra.gmra.mxu0 %vm946_vm3, %v1082_v48 }
 0x3ae   : > { %v1099_v49 = vpop.f32.mrf.mxu1 }
 0x3af   : > { %v1160_v9 = vpack.c.bf16 %v1099_v49, %v1099_v49 }
 0x3b1   : > { %v1167_v54 = vshrl.u32 %v1160_v9, 16 }
 0x3b6   : > { %v1101_v50 = vpop.f32.mrf.mxu1 }
 0x3bc   : > { %v1118_v51 = vpop.f32.mrf.mxu2 }
 0x3bd   : > { %v1161_v52 = vpack.c.bf16 %v1118_v51, %v1118_v51 }
 0x3be   : > { %v1156_v53 = vpop.f32.mrf.mxu0 }
 0x3bf   : > { %v1166_v55 = vpack.i.b16 %v1161_v52, %v1160_v9  ;;  %v1168_v56 = vshrl.u32 %v1161_v52, 16  ;;  %v1163_v57 = vpack.c.bf16 %v1156_v53, %v1156_v53 }
 0x3c1   : > { %v1169_v15 = vpack.i.b16 %v1168_v56, %v1167_v54  ;;  %v1137_v58 = vpop.f32.mrf.mxu3  ;;  %v1180_v59 = vperm.slane %v1166_v55, %v2080_v14  ;;  %v1174_v61 = vshrl.u32 %v1163_v57, 16 }
 0x3c2   : > { %v1162_v16 = vpack.c.bf16 %v1137_v58, %v1137_v58 }
 0x3c3   : > { %v1207_v60 = vperm.slane %v1169_v15, %v2080_v14  ;;  %v1189_v1 = vrot.slane %v1180_v59, 4 }
 0x3c4   : > { %v1172_v62 = vpack.i.b16 %v1163_v57, %v1162_v16  ;;  %v1173_v63 = vshrl.u32 %v1162_v16, 16  ;;  %v1120_v0 = vpop.f32.mrf.mxu2 }
 0x3c5   : > { %v1215_v21 = vrot.slane %v1207_v60, 4 }
 0x3c6   : > { %v1175_v3 = vpack.i.b16 %v1174_v61, %v1173_v63  ;;  %v1185_v5 = vperm.slane %v1172_v62, %v2080_v14  ;;  %v1158_v6 = vpop.f32.mrf.mxu0  ;;  %v1718_v61 = vld [vmem:[%s2383_s4 + $0x8] sm:$0xff]  ;;  %v1717_v62 = vld [vmem:[%s2383_s4] sm:$0xff] }
 0x3c7   : > { %1329 = vmatpush.bf16.msra.mxu1 %v1718_v61 }
 0x3c8   : > { %v1186_v11 = vrot.slane %v1185_v5, 4  ;;  %v1190_v7 = vsel %vm568_vm1, %v1185_v5, %v1189_v1  ;;  %v1212_v12 = vperm.slane %v1175_v3, %v2080_v14 }
 0x3c9   : > { %v1198_v8 = vperm.slane %v1190_v7, %v2092_v26  ;;  %v1139_v10 = vpop.f32.mrf.mxu3 }
 0x3ca   : > { %v1188_v13 = vsel %vm568_vm1, %v1186_v11, %v1180_v59  ;;  %v1213_v17 = vrot.slane %v1212_v12, 4  ;;  %v1216_v18 = vsel %vm568_vm1, %v1212_v12, %v1215_v21  ;;  %v1797_v21 = vld [vmem:[%s2384_s5] ss:$0 sm:$0xff] }
 0x3cb   : > { %v1194_v19 = vperm.slane %v1188_v13, %v2092_v26  ;;  %v1201_v20 = vrot.slane %v1198_v8, 4  ;;  %v1224_v22 = vperm.slane %v1216_v18, %v2092_v26  ;;  %1330 = vmatpush.bf16.msra.mxu1 %v1717_v62  ;;  %v1919_v13 = vmov 32.0  }
 0x3cc   : > { %v1214_v23 = vsel %vm568_vm1, %v1213_v17, %v1207_v60  ;;  %1820 = vrcp.f32 %v1919_v13 }
 0x3cd   : > { %v1199_v24 = vrot.slane %v1194_v19, 4  ;;  %v1202_v25 = vsel %vm568_vm1, 0, %v1201_v20  ;;  %v1220_v27 = vperm.slane %v1214_v23, %v2092_v26  ;;  %v1227_v28 = vrot.slane %v1224_v22, 4 }
 0x3ce   : > { %v1234_v29 = vrot.slane %v1202_v25, 4  ;;  %v1229_v33 = vsel %vm568_vm1, %v1201_v20, %v1194_v19 }
 0x3cf   : > { %v1200_v30 = vsel %vm568_vm1, 0, %v1199_v24  ;;  %v1225_v31 = vrot.slane %v1220_v27, 4  ;;  %v1228_v32 = vsel %vm568_vm1, 0, %v1227_v28  ;;  %v1248_v38 = vsel %vm568_vm1, %v1227_v28, %v1220_v27 }
 0x3d0   : > { %v1235_v34 = vsel %vm568_vm1, %v1234_v29, %v1200_v30  ;;  %v1253_v35 = vrot.slane %v1228_v32, 4  ;;  %v1233_v40 = vperm.slane %v1229_v33, %v2080_v14  ;;  %v1252_v44 = vperm.slane %v1248_v38, %v2080_v14  ;;  %v1720_v29 = vld [vmem:[%s2387_s8 + $0x8] sm:$0xff]  ;;  %v1719_v30 = vld [vmem:[%s2387_s8] sm:$0xff] }
 0x3d1   : > { %v1226_v36 = vsel %vm568_vm1, 0, %v1225_v31  ;;  %v1239_v37 = vperm.slane %v1235_v34, %v2080_v14  ;;  %1408 = vmatpush.bf16.msra.mxu2 %v1720_v29  ;;  %v1728_v31 = vld [vmem:[%s2389_s10 + $0x38] sm:$0xff]  ;;  %v1727_v34 = vld [vmem:[%s2389_s10 + $0x30] sm:$0xff] }
 0x3d2   : > { %v1254_v39 = vsel %vm568_vm1, %v1253_v35, %v1226_v36  ;;  %v1821_v17 = vpop.eup %1820  ;;  %1493 = vmatpush.bf16.msra.mxu3 %v1728_v31 }
 0x3d3   : > { %v1240_v41 = vrot.slane %v1239_v37, 4  ;;  %v1258_v42 = vperm.slane %v1254_v39, %v2080_v14  ;;  %v1345_v18 = vmul.f32 32.0, %v1821_v17  ;;  %vm1349_vm10 = vweird.f32 %v1821_v17 }
 0x3d5   : > { %v1241_v43 = vsel %vm568_vm1, %v1240_v41, %v1233_v40  ;;  %v1259_v45 = vrot.slane %v1258_v42, 4  ;;  %v1346_v19 = vsub.f32 1.0, %v1345_v18  ;;  %1409 = vmatpush.bf16.msra.mxu2 %v1719_v30  ;;  %v1798_v42 = vld [vmem:[%s2385_s6] ss:$0 sm:$0xff] }
 0x3d6   : > { %v1245_v46 = vperm.slane %v1241_v43, %v2092_v26  ;;  %1494 = vmatpush.bf16.msra.mxu3 %v1727_v34 }
 0x3d7   : > { %v1260_v4 = vsel %vm568_vm1, %v1259_v45, %v1252_v44  ;;  %v1347_v20 = vmul.f32 %v1821_v17, %v1346_v19  ;;  %v1799_v45 = vld [vmem:[%s2386_s7] ss:$0 sm:$0xff] }
 0x3d8   : > { %v1264_v47 = vperm.slane %v1260_v4, %v2092_v26  ;;  %v1246_v48 = vrot.slane %v1245_v46, 4  ;;  %v1270_v49 = vshrl.u32 %v1245_v46, 16 }
 0x3d9   : > { %v1348_v22 = vadd.f32 %v1821_v17, %v1347_v20 }
 0x3da   : > { %v1271_v50 = vshrl.u32 %v1264_v47, 16  ;;  %v1247_v9 = vsel %vm568_vm1, 0, %v1246_v48  ;;  %v1265_v51 = vrot.slane %v1264_v47, 4  ;;  %v1269_v52 = vpack.i.b16 %v1264_v47, %v1245_v46  ;;  %v1726_v48 = vld [vmem:[%s2389_s10 + $0x28] sm:$0xff] }
 0x3db   : > { %v1276_v56 = vshrl.u32 %v1247_v9, 16  ;;  %v2283_v23 = vsel %vm1349_vm10, %v1821_v17, %v1348_v22  ;;  %1495 = vmatpush.bf16.msra.mxu3 %v1726_v48 }
 0x3dc   : > { %v1272_v53 = vpack.i.b16 %v1271_v50, %v1270_v49  ;;  %v1266_v54 = vsel %vm568_vm1, 0, %v1265_v51  ;;  %v1725_v49 = vld [vmem:[%s2389_s10 + $0x20] sm:$0xff]  ;;  %v1724_v50 = vld [vmem:[%s2389_s10 + $0x18] sm:$0xff]  ;;  %v1722_v51 = vld [vmem:[%s2389_s10 + $0x8] sm:$0xff] }
 0x3dd   : > { %v1275_v55 = vpack.i.b16 %v1266_v54, %v1247_v9  ;;  %v1277_v14 = vshrl.u32 %v1266_v54, 16  ;;  %v1723_v9 = vld [vmem:[%s2389_s10 + $0x10] sm:$0xff] }
 0x3de   : > { %v1279_v57 = vunpack.c.l.b16 %v1272_v53  ;;  %v1800_v53 = vld [vmem:[%s2388_s9] ss:$0 sm:$0xff] }
 0x3df   : > { %v1283_v15 = vunpack.c.l.b16 %v1275_v55  ;;  %v1278_v58 = vpack.i.b16 %v1277_v14, %v1276_v56  ;;  %1496 = vmatpush.bf16.msra.mxu3 %v1725_v49 }
 0x3e0   : > { %v1280_v59 = vpack.c.b16 %v1279_v57, %v1279_v57 }
 0x3e1   : > { %v1284_v16 = vpack.c.b16 %v1283_v15, %v1283_v15  ;;  %v1287_v60 = vunpack.c.l.b16 %v1278_v58 }
 0x3e2   : > { %1281 = vrot.lane.b32.xlu2 %v1280_v59, %s1916_s24  ;;  %s1642_s24 = sshll.u32 %s481_s28, 3 }
 0x3e3   : > { %1285 = vrot.lane.b32.xlu1 %v1284_v16, %s1917_s19  ;;  %v1288_v26 = vpack.c.b16 %v1287_v60, %v1287_v60  ;;  %1497 = vmatpush.bf16.msra.mxu3 %v1724_v50  ;;  %s1712_s19 = sshll.u32 %s1898_s16, 3  ;;  %s483_s1 = scalar_lea.vmem [#allocation5], %s1642_s24 }
 0x3e4   : > { %s1551_s22 = scalar_lea.hbm %s2393_s14, %s1712_s19  ;;  %s1553_s16 = sshll.u32 %s483_s1, 4  ;;  %s1554_s16 = int_to_ptr.vmem [resolvable:$true] %s1553_s16 }
 0x3e5   : > { %1289 = vrot.lane.b32.xlu0 %v1288_v26, %s1918_s17  ;;  %s1555_s2 = sshll.u32 %s1551_s22, 4  ;;  %s1540_s17 = scalar_lea.sflag [#allocation6], %s481_s28  ;;  %s1556_s2 = int_to_ptr.hbm [resolvable:$true] %s1555_s2 }
 0x3e6   : > { %s1842_s21 = sshra.s32 %s1556_s2, 4  ;;  %s1848_s24 = scalar_lea.hbm %s2393_s14, 16  ;;  %s1843_s21 = int_to_ptr.hbm [resolvable:$true] %s1842_s21 }
 0x3e7   : > { %1498 = vmatpush.bf16.msra.mxu3 %v1723_v9  ;;  %s1844_s19 = scalar_lea.hbm %s1843_s21, 8  ;;  %p1849_p1 = scmp.lt.s32.totalorder %s1843_s21, %s2393_s14 }
 0x3e8   : > { %p1845_p12 = scmp.ne.s32.totalorder %s1843_s21, %s1844_s19  ;;  %p1850_p2 = scmp.lt.s32.totalorder %s1848_s24, %s1844_s19 }
 0x3ea   : > { %p1846_p13 = pnand %p1845_p12, %p2035_p4  ;;  %p1851_p3 = por %p1850_p2, %p1849_p1 }
 0x3eb   : > { %1499 = vmatpush.bf16.msra.mxu3 %v1722_v51 }
 0x3ec   : > { %p1847_p0 = pneg %p1846_p13 }
 0x3ee   : > { %p1852_p5 = pnand %p1851_p3, %p1847_p0 }
 0x43c   : > { %v1282_v63 = vpop.permute.xlu2 %1281 }
 0x43d   : > { %v1293_v0 = vsel %vm946_vm3, %v1269_v52, %v1282_v63  ;;  %v1721_v52 = vld [vmem:[%s2389_s10] sm:$0xff] }
 0x43e   : > { %1500 = vmatpush.bf16.msra.mxu3 %v1721_v52  ;;  %v1801_v63 = vld [vmem:[%s2390_s11] ss:$0 sm:$0xff] }
 0x455   : > { %v1286_v1 = vpop.permute.xlu1 %1285 }
 0x456   : > { %v1296_v3 = vsel %vm1294_vm8, %v1293_v0, %v1286_v1 }
 0x457   : > { %v1290_v5 = vpop.permute.xlu0 %1289 }
 0x458   : > { %v1299_v6 = vsel %vm1297_vm9, %v1296_v3, %v1290_v5 }
 0x459   : > { %1669 = vmatmul.msk.bf16.vlgmr.msra.gmra.mxu1 %vm520_vm0, %v1299_v6 }
 0x4d6   : > { %v1332_v11 = vpop.f32.mrf.mxu1 }
 0x4d7   : > { %v1333_v7 = vadd.f32 %v1797_v21, %v1332_v11 }
 0x4d9   : > { %v1338_v12 = vadd.f32 %v1333_v7, %v2064_v2 }
 0x4db   : > { %v1341_v8 = vsel %vm520_vm0, %v1338_v12, 0.0 }
 0x4dc   : > { %1342 = vadd.xlane.f32.xlu2 %v1341_v8 }
 0x4de   : > { %v1334_v10 = vpop.f32.mrf.mxu1 }
 0x54f   : > { %v1343_v24 = vpop.xlane.xlu2 %1342 }
 0x550   : > { %v1351_v25 = vmul.f32 %v2283_v23, %v1343_v24 }
 0x552   : > { %v1352_v27 = vsub.f32 %v1338_v12, %v1351_v25  ;;  %v1802_v25 = vld [vmem:[%s2391_s12] ss:$0 sm:$0xff] }
 0x554   : > { %v1353_v28 = vmul.f32 %v1352_v27, %v1352_v27 }
 0x556   : > { %v1354_v2 = vsel %vm520_vm0, %v1353_v28, 0.0  ;;  %v1803_v28 = vld [vmem:[%s2392_s13] ss:$0 sm:$0xff] }
 0x557   : > { %1355 = vadd.xlane.f32.xlu0 %v1354_v2 }
 0x5ca   : > { %v1356_v32 = vpop.xlane.xlu0 %1355 }
 0x5cb   : > { %v1357_v33 = vmul.f32 %v1356_v32, %v2283_v23 }
 0x5cd   : > { %v1358_v35 = vadd.f32 1e-05, %v1357_v33 }
 0x5cf   : > { %1822 = vrsqrt.f32 %v1358_v35  ;;  %vm1365_vm12 = vweird.f32 %v1358_v35 }
 0x5d5   : > { %v1823_v36 = vpop.eup %1822 }
 0x5d6   : > { %v1360_v37 = vmul.f32 %v1823_v36, %v1358_v35  ;;  %vm1366_vm11 = vweird.f32 %v1823_v36 }
 0x5d7   : > { %vm1367_vm13 = vmor %vm1365_vm12, %vm1366_vm11 }
 0x5d8   : > { %v1361_v38 = vmul.f32 %v1823_v36, %v1360_v37 }
 0x5da   : > { %v1362_v39 = vmul.f32 0.5, %v1361_v38 }
 0x5dc   : > { %v1363_v40 = vsub.f32 1.5, %v1362_v39 }
 0x5de   : > { %v1364_v41 = vmul.f32 %v1823_v36, %v1363_v40 }
 0x5e0   : > { %v1368_v43 = vsel %vm1367_vm13, %v1823_v36, %v1364_v41 }
 0x5e1   : > { %v1369_v44 = vmul.f32 %v1368_v43, %v1352_v27 }
 0x5e3   : > { %v1373_v46 = vmul.f32 %v1798_v42, %v1369_v44 }
 0x5e5   : > { %v1377_v4 = vadd.f32 %v1799_v45, %v1373_v46 }
 0x5e7   : > { %v1378_v47 = vpack.c.bf16 %v1377_v4, %v1377_v4 }
 0x5e9   : > { %1678 = vmatmul.msk.bf16.vlgmr.msra.gmra.mxu2 %vm520_vm0, %v1378_v47 }
 0x66c   : > { %v1411_v54 = vpop.f32.mrf.mxu2 }
 0x66d   : > { %v1412_v55 = vadd.f32 %v1800_v53, %v1411_v54 }
 0x66f   : > { %v1416_v56 = vmul.f32 0.044715, %v1412_v55  ;;  %v1415_v60 = vmul.f32 0.5, %v1412_v55 }
 0x671   : > { %v1417_v14 = vmul.f32 %v1416_v56, %v1412_v55 }
 0x673   : > { %v1418_v57 = vmul.f32 %v1417_v14, %v1412_v55 }
 0x674   : > { %v1413_v15 = vpop.f32.mrf.mxu2 }
 0x675   : > { %v1419_v58 = vadd.f32 %v1418_v57, %v1412_v55 }
 0x677   : > { %v1420_v59 = vmul.f32 0.7978846, %v1419_v58 }
 0x679   : > { %1824 = vtanh.f32 %v1420_v59 }
 0x67f   : > { %v1825_v16 = vpop.eup %1824 }
 0x680   : > { %v1422_v26 = vadd.f32 1.0, %v1825_v16 }
 0x682   : > { %v1423_v61 = vmul.f32 %v1422_v26, %v1415_v60 }
 0x684   : > { %v1424_v62 = vpack.c.bf16 %v1423_v61, %v1423_v61 }
 0x686   : > { %1501 = vmatmul.bf16.vlgmr.msra.gmra.mxu3 %v1424_v62 }
 0x709   : > { %v1502_v0 = vpop.f32.mrf.mxu3 }
 0x70a   : > { %v1503_v1 = vadd.f32 %v1801_v63, %v1502_v0 }
 0x70c   : > { %v1508_v3 = vsel %vm520_vm0, %v1503_v1, 0.0 }
 0x70d   : > { %1509 = vadd.xlane.f32.xlu1 %v1508_v3 }
 0x711   : > { %v1504_v5 = vpop.f32.mrf.mxu3 }
 0x780   : > { %v1510_v6 = vpop.xlane.xlu1 %1509 }
 0x781   : > { %v1511_v21 = vmul.f32 %v1510_v6, %v2283_v23 }
 0x783   : > { %v1512_v11 = vsub.f32 %v1503_v1, %v1511_v21 }
 0x785   : > { %v1513_v7 = vmul.f32 %v1512_v11, %v1512_v11 }
 0x787   : > { %v1514_v12 = vsel %vm520_vm0, %v1513_v7, 0.0 }
 0x788   : > { %1515 = vadd.xlane.f32.xlu2 %v1514_v12 }
 0x7fb   : > { %v1516_v8 = vpop.xlane.xlu2 %1515 }
 0x7fc   : > { %v1517_v10 = vmul.f32 %v1516_v8, %v2283_v23 }
 0x7fe   : > { %v1518_v13 = vadd.f32 2.5e-06, %v1517_v10 }
 0x800   : > { %1826 = vrsqrt.f32 %v1518_v13  ;;  %vm1525_vm15 = vweird.f32 %v1518_v13 }
 0x806   : > { %v1827_v17 = vpop.eup %1826 }
 0x807   : > { %v1520_v18 = vmul.f32 %v1827_v17, %v1518_v13  ;;  %vm1526_vm14 = vweird.f32 %v1827_v17 }
 0x808   : > { %vm1527_vm1 = vmor %vm1525_vm15, %vm1526_vm14 }
 0x809   : > { %v1521_v19 = vmul.f32 %v1827_v17, %v1520_v18 }
 0x80b   : > { %v1522_v20 = vmul.f32 0.5, %v1521_v19 }
 0x80d   : > { %v1523_v22 = vsub.f32 1.5, %v1522_v20 }
 0x80f   : > { %v1524_v24 = vmul.f32 %v1827_v17, %v1523_v22 }
 0x811   : > { %v1528_v23 = vsel %vm1527_vm1, %v1827_v17, %v1524_v24 }
 0x812   : > { %v1529_v27 = vmul.f32 %v1528_v23, %v1512_v11 }
 0x814   : > { %v1533_v2 = vmul.f32 %v1802_v25, %v1529_v27 }
 0x816   : > { %v1537_v29 = vadd.f32 %v1803_v28, %v1533_v2 }
 0x818   : > { %1538 = vst.msk [vmem:[%s483_s1] sm:$0xff] %vm520_vm0, %v1537_v29 }
 0x819   : > { %1855 = shalt.err (!%p1852_p5)
}
 0x81a   : > { %1729 = dma.vmem_to_hbm [thread:$0]  (%p2035_p4), %s1554_s16, 128, %s1556_s2, %s1540_s17  }
 0x81b PF: > { %p1735_p6 = scmp.ge.s32.totalorder %s1906_s18, 2  ;;  %s1567_s1 = sand.u32 1, %s1886_s29  }
 0x81c   : > { %s1568_s28 = scalar_lea.sflag [#allocation6], %s1567_s1 }
 0x81d   : > { %p1732_p7 = pnand %p1735_p6, %p2042_p8 }
 0x81f   : > { %p1733_p9 = pneg %p1732_p7 }
 0x821   : > { %1881 = dma.done.wait (%p1733_p9), %s1568_s28, 128  }
 0x822   : > { %1883 = vsyncadd (%p1733_p9), %s1568_s28, 4294967168  ;;  %s27_s18 = sadd.s32 1, %s1906_s18   ;;  %s2407_s27 = sld [smem:[#allocation10_spill]] }
 0x823   : > { %p24_p10 = scmp.ge.s32.totalorder %s27_s18, 4   ;;  %s2408_s16 = sld [smem:[#allocation8_spill]] }
 0x824   : > { %s2409_s17 = sld [smem:[#allocation9_spill]]  ;;  %s2410_s29 = smov %s1890_s30 }
 0x825   : > { %s2411_s30 = smov %s1894_s15  ;;  %26 = sbr.rel (!%p24_p10) target bundleno = 8 (0x8), region = 120 }
 0x828   : > { %s2412_s15 = smov %s2407_s27 }
 0x82a   :  { %1574 = vsyncpa [#allocation6], 1 }
 0x82b   :  { %1576 = vsyncpa [#allocation6 + $0x1], 1 }

// kernel: tpu_custom_call.1
= control target key start
LH: loop header
LB: loop body
LE: loop exit
PB: predicated region body
PF: predicated region fallthrough
CT: control target
= control target key end

     0   :  { %s1788_s0 = inlined_call_operand.vmem [shape: f32[2,8,32], index: 0, kind: input, shape index: {}]   ;;  %s1789_s1 = inlined_call_operand.vmem [shape: s8[2,1,8], index: 1, kind: input, shape index: {}]   ;;  %s1790_s2 = inlined_call_operand.vmem [shape: bf16[32,96], index: 2, kind: input, shape index: {}]   ;;  %s1791_s3 = inlined_call_operand.vmem [shape: f32[1,96], index: 3, kind: input, shape index: {}]   ;;  %s1792_s4 = inlined_call_operand.vmem [shape: bf16[32,32], index: 4, kind: input, shape index: {}]   ;;  %s1793_s5 = inlined_call_operand.vmem [shape: f32[1,32], index: 5, kind: input, shape index: {}]   ;;  %s1794_s6 = inlined_call_operand.vmem [shape: f32[1,32], index: 6, kind: input, shape index: {}]   ;;  %s1795_s7 = inlined_call_operand.vmem [shape: f32[1,32], index: 7, kind: input, shape index: {}]   ;;  %s1796_s8 = inlined_call_operand.vmem [shape: bf16[32,128], index: 8, kind: input, shape index: {}]   ;;  %s1797_s9 = inlined_call_operand.vmem [shape: f32[1,128], index: 9, kind: input, shape index: {}]   ;;  %s1798_s10 = inlined_call_operand.vmem [shape: bf16[128,32], index: 10, kind: input, shape index: {}]   ;;  %s1799_s11 = inlined_call_operand.vmem [shape: f32[1,32], index: 11, kind: input, shape index: {}]   ;;  %s1800_s12 = inlined_call_operand.vmem [shape: f32[1,32], index: 12, kind: input, shape index: {}]   ;;  %s1801_s13 = inlined_call_operand.vmem [shape: f32[1,32], index: 13, kind: input, shape index: {}]   ;;  %s1802_s14 = inlined_call_operand.hbm [shape: f32[2,8,32], index: 14, kind: output, shape index: {}]  }
   0x1   :  { %1805 = sst [smem:[#allocation11_spill]] %s1788_s0 }
   0x2   :  { %1806 = sst [smem:[#allocation12_spill]] %s1789_s1 }
   0x3   :  { %1807 = sst [smem:[#allocation13_spill]] %s1790_s2 }
   0x4   :  { %19 = vsyncpa [#allocation6], 0 }
   0x5   :  { %21 = vsyncpa [#allocation6 + $0x1], 0  ;;  %s1535_s29 = smov 0   ;;  %s1537_s30 = smov 0  }
   0x6   :  { %s1539_s15 = smov 0   ;;  %s1541_s16 = smov 0  }
   0x7   :  { %s1543_s17 = smov 0   ;;  %s1545_s18 = smov 0  }
   0x8 LB: > { %1808 = sst [smem:[#allocation8_spill]] %s1444_s17  ;;  %s1181_s19 = sadd.s32 4294967295, %s1448_s18   ;;  %s1448_s18 = sphi %s1545_s18, %s27_s18   ;;  %s1444_s17 = sphi %s1543_s17, %s1818_s17   ;;  %s1440_s16 = sphi %s1541_s16, %s1817_s16   ;;  %s1436_s15 = sphi %s1539_s15, %s1821_s15   ;;  %s1432_s30 = sphi %s1537_s30, %s1820_s30   ;;  %s1428_s29 = sphi %s1535_s29, %s1819_s29  }
   0x9   : > { %s1182_s20 = sadd.s32 4294967294, %s1448_s18   ;;  %s39_s21 = sadd.s32 1, %s1444_s17 }
   0xa   : > { %s352_s22 = sadd.s32 1, %s1436_s15  ;;  %p41_p0 = scmp.ge.s32.totalorder %s39_s21, 2 }
   0xb   : > { %p362_p1 = scmp.ne.s32.totalorder %s1436_s15, %s1432_s30  ;;  %p363_p2 = scmp.eq.s32.totalorder %s1181_s19, 1 }
   0xc   : > { %p368_p3 = scmp.ne.s32.totalorder %s1432_s30, %s1428_s29  ;;  %s1823_s21 = smov (%p41_p0, %s39_s21), 0 }
   0xd   : > { %1809 = sst [smem:[#allocation9_spill]] %s1823_s21  ;;  %p1575_p4 = por %p363_p2, %p362_p1 }
   0xe   : > { %p369_p5 = scmp.eq.s32.totalorder %s1182_s20, 1  ;;  %s347_s24 = ssub.s32 %s1444_s17, %s1823_s21 }
   0xf   : > { %p1185_p6 = scmp.ge.s32.totalorder %s1448_s18, 1  ;;  %p350_p7 = scmp.eq.s32.totalorder %s347_s24, 0 }
  0x10   : > { %p1582_p8 = por %p369_p5, %p368_p3  ;;  %p436_p9 = scmp.lt.s32.totalorder %s1448_s18, 3 }
  0x11   : > { %s1588_s26 = scalar_select %p350_p7, %s1436_s15, %s352_s22  }
  0x12   : > { %p437_p10 = pnand %p1185_p6, %p436_p9 }
  0x13   : > { %1812 = sst [smem:[#allocation10_spill]] %s1588_s26  ;;  %p484_p11 = scmp.lt.s32.totalorder (!%p437_p10), %s1440_s16, 1 }
  0x14   : > { %440 = sbr.rel (%p437_p10) target bundleno = 2007 (0x7d7), region = 76  ;;  %s1813_s2 = sld [smem:[#allocation13_spill]] (!%p437_p10) }
  0x15   : > { %s1814_s0 = sld [smem:[#allocation11_spill]] (!%p437_p10)  ;;  %s1450_s17 = smov (!%p437_p10), 104  }
  0x16   : > { %s1453_s19 = smov (!%p437_p10), 96   ;;  %s1815_s1 = sld [smem:[#allocation12_spill]] (!%p437_p10) }
  0x17   : > { %s1456_s28 = smov (!%p437_p10), 8  }
  0x19   : > { %s1598_s24 = scalar_select %p484_p11, %s1440_s16, 1  ;;  %vm520_vm0 = vcmask 261120   ;;  %v1338_v4 = vld [vmem:[%s1791_s3] ss:$0 sm:$0xff]  ;;  %vm548_vm1 = vcmask 60416   ;;  %vm602_vm2 = vcmask 64512  }
  0x1a   : > { %v1260_v0 = vld [vmem:[%s1813_s2 + $0x8] sm:$0xff]  ;;  %v1259_v1 = vld [vmem:[%s1813_s2] sm:$0xff]  ;;  %v1454_v31 = vmov 0   ;;  %vm742_vm6 = vcmask 1043456   ;;  %vm838_vm7 = vcmask 130048   ;;  %vm841_vm8 = vcmask 195584  }
  0x1b   : > { %530 = vmatpush.bf16.msra.mxu0 %v1260_v0  ;;  %s1187_s21 = sshll.u32 %s1598_s24, 3 }
  0x1c   : > { %s487_s26 = scalar_lea.vmem %s1814_s0, %s1187_s21  ;;  %s1451_s21 = smov 120  }
  0x1d   : > { %v1604_v2 = vld [vmem:[%s487_s26] sm:$0xff]  ;;  %s1452_s26 = smov 112   ;;  %s490_s27 = scalar_lea.vmem %s1815_s1, %s1598_s24 }
  0x1e   : > { %v499_v3 = vpack.c.bf16 %v1604_v2, %v1604_v2  ;;  %v679_v30 = vld [vmem:[%s490_s27] sm:$0x1]  ;;  %s1455_s24 = smov 64  }
  0x1f   : > { %531 = vmatpush.bf16.msra.mxu0 %v1259_v1  ;;  %vm680_vm3 = vnez %v679_v30 }
  0x20   : > { %v681_v32 = vsel %vm680_vm3, 16843009, %v1454_v31 }
  0x21   : > { %v682_v33 = vunpack.c.0.s8 %v681_v32 }
  0x22   : > { %1196 = vmatmul.msk.bf16.vlgmr.msra.gmra.mxu0 %vm520_vm0, %v499_v3 }
  0x23   : > { %vm683_vm4 = vcmp.ne.s32.totalorder %v682_v33, 0 }
  0x24   : > { %v684_v34 = vsel %vm683_vm4, 1, %v1454_v31 }
  0x25   : > { %v685_v35 = vperm.slane %v684_v34, 0 }
  0x27   : > { %vm686_vm5 = vcmp.eq.s32.totalorder %v685_v35, 1 }
  0x9f   : > { %v533_v5 = vpop.f32.mrf.mxu0 }
  0xa0   : > { %v534_v6 = vadd.f32 %v1338_v4, %v533_v5 }
  0xa2   : > { %v1612_v7 = vpack.c.bf16 %v534_v6, %v534_v6 }
  0xa4   : > { %549 = vst.msk [vmem:[#allocation2] sm:$0xf] %vm548_vm1, %v1612_v7  ;;  %545 = vrot.lane.b32.xlu1 %v1612_v7, %s1450_s17  ;;  %539 = vrot.lane.b32.xlu0 %v1612_v7, %s1451_s21  ;;  %s1457_s17 = smov 16   ;;  %s1458_s21 = smov 24  }
  0xa7   : > { %v535_v8 = vpop.f32.mrf.mxu0 }
  0xab   : > { %v590_v15 = vld [vmem:[#allocation2] sm:$0xf] }
  0xac   : > { %542 = vrot.lane.b32.xlu0 %v1612_v7, %s1452_s26 }
  0xb4   : > { %553 = vrot.lane.b32.xlu0 %v1612_v7, %s1453_s19 }
 0x116   : > { %v1620_v9 = vpop.permute.xlu1 %545  ;;  %v1622_v10 = vpop.permute.xlu0 %539 }
 0x117   : > { %552 = vst.msk [vmem:[#allocation2 + $0xc] sm:$0xf] %vm548_vm1, %v1620_v9  ;;  %555 = vrot.lane.b32.xlu1 %v1622_v10, %s1453_s19 }
 0x118   : > { %550 = vst.msk [vmem:[#allocation2 + $0x4] sm:$0xf] %vm548_vm1, %v1622_v10 }
 0x11e   : > { %v1629_v11 = vpop.permute.xlu0 %542  ;;  %v593_v24 = vld [vmem:[#allocation2 + $0xc] sm:$0xf] }
 0x11f   : > { %551 = vst.msk [vmem:[#allocation2 + $0x8] sm:$0xf] %vm548_vm1, %v1629_v11  ;;  %557 = vrot.lane.b32.xlu2 %v1629_v11, %s1453_s19  ;;  %v591_v27 = vld [vmem:[#allocation2 + $0x4] sm:$0xf] }
 0x126   : > { %v554_v12 = vpop.permute.xlu0 %553  ;;  %v592_v21 = vld [vmem:[#allocation2 + $0x8] sm:$0xf] }
 0x127   : > { %565 = vst.msk [vmem:[#allocation3] sm:$0xf] %vm548_vm1, %v554_v12  ;;  %559 = vrot.lane.b32.xlu2 %v1620_v9, %s1453_s19 }
 0x12e   : > { %v594_v13 = vld [vmem:[#allocation3] sm:$0xf] }
 0x12f   : > { %v607_v14 = vsel %vm602_vm2, %v594_v13, 0 }
 0x130   : > { %616 = vmatpush.bf16.xpose.msra.mxu1 %v607_v14 }
 0x137   : > { %1197 = vmatmul.msk.bf16.vlgmr.msra.gmra.mxu1 %vm602_vm2, %v590_v15 }
 0x179   : > { %v558_v16 = vpop.permute.xlu2 %557 }
 0x17a   : > { %567 = vst.msk [vmem:[#allocation3 + $0x8] sm:$0xf] %vm548_vm1, %v558_v16 }
 0x181   : > { %v560_v17 = vpop.permute.xlu2 %559  ;;  %v596_v18 = vld [vmem:[#allocation3 + $0x8] sm:$0xf] }
 0x182   : > { %568 = vst.msk [vmem:[#allocation3 + $0xc] sm:$0xf] %vm548_vm1, %v560_v17  ;;  %v645_v19 = vsel %vm602_vm2, %v596_v18, 0 }
 0x183   : > { %654 = vmatpush.bf16.xpose.msra.mxu3 %v645_v19 }
 0x189   : > { %v556_v20 = vpop.permute.xlu1 %555  ;;  %v597_v22 = vld [vmem:[#allocation3 + $0xc] sm:$0xf] }
 0x18a   : > { %566 = vst.msk [vmem:[#allocation3 + $0x4] sm:$0xf] %vm548_vm1, %v556_v20  ;;  %1199 = vmatmul.msk.bf16.vlgmr.msra.gmra.mxu3 %vm602_vm2, %v592_v21  ;;  %v664_v23 = vsel %vm602_vm2, %v597_v22, 0 }
 0x18b   : > { %673 = vmatpush.bf16.xpose.msrb.mxu0 %v664_v23 }
 0x191   : > { %v595_v25 = vld [vmem:[#allocation3 + $0x4] sm:$0xf] }
 0x192   : > { %1200 = vmatmul.msk.bf16.vlgmr.msrb.gmra.mxu0 %vm602_vm2, %v593_v24  ;;  %v626_v26 = vsel %vm602_vm2, %v595_v25, 0 }
 0x193   : > { %635 = vmatpush.bf16.xpose.msra.mxu2 %v626_v26 }
 0x19a   : > { %1198 = vmatmul.msk.bf16.vlgmr.msra.gmra.mxu2 %vm602_vm2, %v591_v27 }
 0x1b4   : > { %v618_v28 = vpop.f32.mrf.mxu1 }
 0x1b5   : > { %v687_v42 = vsel %vm686_vm5, %v618_v28, -65504.0 }
 0x1b6   : > { %v691_v45 = vsel %vm602_vm2, %v687_v42, -inf }
 0x1bc   : > { %v620_v29 = vpop.f32.mrf.mxu1 }
 0x20d   : > { %v656_v36 = vpop.f32.mrf.mxu3 }
 0x20e   : > { %v689_v37 = vsel %vm686_vm5, %v656_v36, -65504.0 }
 0x20f   : > { %v675_v38 = vpop.f32.mrf.mxu0  ;;  %v697_v39 = vsel %vm602_vm2, %v689_v37, -inf }
 0x210   : > { %v690_v40 = vsel %vm686_vm5, %v675_v38, -65504.0  ;;  %698 = vmax.xlane.f32.xlu2 %v697_v39 }
 0x211   : > { %v700_v41 = vsel %vm602_vm2, %v690_v40, -inf }
 0x212   : > { %701 = vmax.xlane.f32.xlu0 %v700_v41 }
 0x215   : > { %v658_v43 = vpop.f32.mrf.mxu3 }
 0x217   : > { %v677_v44 = vpop.f32.mrf.mxu0 }
 0x218   : > { %692 = vmax.xlane.f32.xlu2 %v691_v45 }
 0x21d   : > { %v637_v46 = vpop.f32.mrf.mxu2 }
 0x21e   : > { %v688_v47 = vsel %vm686_vm5, %v637_v46, -65504.0 }
 0x21f   : > { %v694_v48 = vsel %vm602_vm2, %v688_v47, -inf }
 0x220   : > { %695 = vmax.xlane.f32.xlu1 %v694_v48 }
 0x225   : > { %v639_v49 = vpop.f32.mrf.mxu2 }
 0x226   : > { %573 = vrot.lane.b32.xlu0 %v1629_v11, %s1455_s24 }
 0x22e   : > { %569 = vrot.lane.b32.xlu0 %v1612_v7, %s1455_s24 }
 0x239   : > { %571 = vrot.lane.b32.xlu1 %v1622_v10, %s1455_s24 }
 0x283   : > { %v699_v50 = vpop.xlane.xlu2 %698 }
 0x284   : > { %v705_v62 = vsub.f32 %v689_v37, %v699_v50 }
 0x285   : > { %v702_v51 = vpop.xlane.xlu0 %701 }
 0x286   : > { %v706_v52 = vsub.f32 %v690_v40, %v702_v51  ;;  %v711_v3 = vmul.f32 1.442695, %v705_v62 }
 0x288   : > { %v713_v53 = vmul.f32 1.442695, %v706_v52  ;;  %v1262_v52 = vld [vmem:[%s1792_s4 + $0x8] sm:$0xff] }
 0x28a   : > { %1346 = vpow2.f32 %v713_v53  ;;  %v1261_v53 = vld [vmem:[%s1792_s4] sm:$0xff] }
 0x28b   : > { %v693_v54 = vpop.xlane.xlu2 %692 }
 0x28c   : > { %v703_v55 = vsub.f32 %v687_v42, %v693_v54 }
 0x28e   : > { %v707_v56 = vmul.f32 1.442695, %v703_v55 }
 0x290   : > { %v1347_v57 = vpop.eup %1346  ;;  %1348 = vpow2.f32 %v707_v56 }
 0x291   : > { %v724_v58 = vsel %vm602_vm2, %v1347_v57, 0.0 }
 0x292   : > { %725 = vadd.xlane.f32.xlu1 %v724_v58 }
 0x293   : > { %v696_v59 = vpop.xlane.xlu1 %695 }
 0x294   : > { %v704_v60 = vsub.f32 %v688_v47, %v696_v59 }
 0x296   : > { %v1349_v61 = vpop.eup %1348  ;;  %v709_v63 = vmul.f32 1.442695, %v704_v60 }
 0x297   : > { %v715_v0 = vsel %vm602_vm2, %v1349_v61, 0.0 }
 0x298   : > { %1350 = vpow2.f32 %v709_v63  ;;  %v574_v1 = vpop.permute.xlu0 %573  ;;  %716 = vadd.xlane.f32.xlu0 %v715_v0 }
 0x299   : > { %583 = vst.msk [vmem:[#allocation4 + $0x8] sm:$0xf] %vm548_vm1, %v574_v1  ;;  %1352 = vpow2.f32 %v711_v3 }
 0x29e   : > { %v1351_v4 = vpop.eup %1350 }
 0x29f   : > { %v718_v5 = vsel %vm602_vm2, %v1351_v4, 0.0  ;;  %v1353_v10 = vpop.eup %1352 }
 0x2a0   : > { %v570_v6 = vpop.permute.xlu0 %569  ;;  %719 = vadd.xlane.f32.xlu2 %v718_v5  ;;  %v600_v7 = vld [vmem:[#allocation4 + $0x8] sm:$0xf]  ;;  %v721_v11 = vsel %vm602_vm2, %v1353_v10, 0.0 }
 0x2a1   : > { %581 = vst.msk [vmem:[#allocation4] sm:$0xf] %vm548_vm1, %v570_v6  ;;  %v782_v8 = vsel %vm742_vm6, %v600_v7, 0 }
 0x2a2   : > { %791 = vmatpush.bf16.msrb.mxu3 %v782_v8 }
 0x2a8   : > { %722 = vadd.xlane.f32.xlu2 %v721_v11  ;;  %v598_v12 = vld [vmem:[#allocation4] sm:$0xf] }
 0x2a9   : > { %v744_v13 = vsel %vm742_vm6, %v598_v12, 0 }
 0x2aa   : > { %753 = vmatpush.bf16.msrb.mxu1 %v744_v13 }
 0x2ab   : > { %v572_v14 = vpop.permute.xlu1 %571 }
 0x2ac   : > { %582 = vst.msk [vmem:[#allocation4 + $0x4] sm:$0xf] %vm548_vm1, %v572_v14 }
 0x2ae   : > { %873 = vmatpush.bf16.msra.mxu1 %v1262_v52 }
 0x2b2   : > { %874 = vmatpush.bf16.msra.mxu1 %v1261_v53 }
 0x2b3   : > { %v599_v15 = vld [vmem:[#allocation4 + $0x4] sm:$0xf] }
 0x2b4   : > { %v763_v16 = vsel %vm742_vm6, %v599_v15, 0 }
 0x2b5   : > { %772 = vmatpush.bf16.msrb.mxu2 %v763_v16  ;;  %v1264_v16 = vld [vmem:[%s1796_s8 + $0x8] sm:$0xff] }
 0x2b9   : > { %952 = vmatpush.bf16.msra.mxu2 %v1264_v16 }
 0x2c0   : > { %575 = vrot.lane.b32.xlu2 %v1620_v9, %s1455_s24  ;;  %s481_s24 = sand.u32 1, %s1432_s30  }
 0x305   : > { %v726_v26 = vpop.xlane.xlu1 %725 }
 0x30b   : > { %v717_v17 = vpop.xlane.xlu0 %716 }
 0x30c   : > { %1354 = vrcp.f32 %v717_v17  ;;  %v1263_v17 = vld [vmem:[%s1796_s8] sm:$0xff] }
 0x30d   : > { %953 = vmatpush.bf16.msra.mxu2 %v1263_v17 }
 0x312   : > { %v1355_v18 = vpop.eup %1354 }
 0x313   : > { %v731_v19 = vmul.f32 %v1355_v18, %v1349_v61  ;;  %v720_v20 = vpop.xlane.xlu2 %719  ;;  %v1339_v61 = vld [vmem:[%s1793_s5] ss:$0 sm:$0xff]  ;;  %v1272_v18 = vld [vmem:[%s1798_s10 + $0x38] sm:$0xff] }
 0x314   : > { %1356 = vrcp.f32 %v720_v20  ;;  %1037 = vmatpush.bf16.msra.mxu3 %v1272_v18 }
 0x315   : > { %v735_v21 = vpack.c.bf16 %v731_v19, %v731_v19 }
 0x317   : > { %1201 = vmatmul.msk.bf16.vlgmr.msrb.gmra.mxu1 %vm602_vm2, %v735_v21  ;;  %v1271_v21 = vld [vmem:[%s1798_s10 + $0x30] sm:$0xff] }
 0x318   : > { %1038 = vmatpush.bf16.msra.mxu3 %v1271_v21 }
 0x31a   : > { %v1357_v22 = vpop.eup %1356 }
 0x31b   : > { %v732_v23 = vmul.f32 %v1357_v22, %v1351_v4  ;;  %v723_v24 = vpop.xlane.xlu2 %722  ;;  %v1459_v4 = vmov 32.0  }
 0x31c   : > { %1358 = vrcp.f32 %v723_v24 }
 0x31d   : > { %v736_v25 = vpack.c.bf16 %v732_v23, %v732_v23  ;;  %1360 = vrcp.f32 %v726_v26 }
 0x31e   : > { %1362 = vrcp.f32 %v1459_v4 }
 0x31f   : > { %1202 = vmatmul.msk.bf16.vlgmr.msrb.gmra.mxu2 %vm602_vm2, %v736_v25 }
 0x322   : > { %v1359_v27 = vpop.eup %1358 }
 0x323   : > { %v733_v9 = vmul.f32 %v1359_v27, %v1353_v10  ;;  %v576_v28 = vpop.permute.xlu2 %575  ;;  %v1361_v30 = vpop.eup %1360 }
 0x324   : > { %584 = vst.msk [vmem:[#allocation4 + $0xc] sm:$0xf] %vm548_vm1, %v576_v28  ;;  %v734_v31 = vmul.f32 %v1361_v30, %v1347_v57  ;;  %v1363_v5 = vpop.eup %1362  ;;  %v1340_v28 = vld [vmem:[%s1794_s6] ss:$0 sm:$0xff] }
 0x325   : > { %v737_v29 = vpack.c.bf16 %v733_v9, %v733_v9  ;;  %v889_v6 = vmul.f32 32.0, %v1363_v5  ;;  %vm893_vm9 = vweird.f32 %v1363_v5 }
 0x326   : > { %v738_v34 = vpack.c.bf16 %v734_v31, %v734_v31  ;;  %v1341_v31 = vld [vmem:[%s1795_s7] ss:$0 sm:$0xff] }
 0x327   : > { %1203 = vmatmul.msk.bf16.vlgmr.msrb.gmra.mxu3 %vm602_vm2, %v737_v29  ;;  %v890_v7 = vsub.f32 1.0, %v889_v6 }
 0x329   : > { %v891_v8 = vmul.f32 %v1363_v5, %v890_v7 }
 0x32b   : > { %v601_v32 = vld [vmem:[#allocation4 + $0xc] sm:$0xf]  ;;  %v892_v10 = vadd.f32 %v1363_v5, %v891_v8 }
 0x32c   : > { %v801_v33 = vsel %vm742_vm6, %v601_v32, 0 }
 0x32d   : > { %810 = vmatpush.bf16.msra.mxu0 %v801_v33  ;;  %v1692_v11 = vsel %vm893_vm9, %v1363_v5, %v892_v10 }
 0x330   : > { %1204 = vmatmul.msk.bf16.vlgmr.msra.gmra.mxu0 %vm602_vm2, %v738_v34 }
 0x394   : > { %v755_v35 = vpop.f32.mrf.mxu1 }
 0x395   : > { %v816_v56 = vpack.c.bf16 %v755_v35, %v755_v35  ;;  %v1270_v35 = vld [vmem:[%s1798_s10 + $0x28] sm:$0xff] }
 0x396   : > { %1039 = vmatpush.bf16.msra.mxu3 %v1270_v35 }
 0x39c   : > { %v757_v36 = vpop.f32.mrf.mxu1 }
 0x39d   : > { %v1269_v36 = vld [vmem:[%s1798_s10 + $0x20] sm:$0xff] }
 0x39e   : > { %1040 = vmatpush.bf16.msra.mxu3 %v1269_v36 }
 0x3a2   : > { %v774_v37 = vpop.f32.mrf.mxu2 }
 0x3a3   : > { %v817_v38 = vpack.c.bf16 %v774_v37, %v774_v37  ;;  %v1268_v37 = vld [vmem:[%s1798_s10 + $0x18] sm:$0xff] }
 0x3a4   : > { %1041 = vmatpush.bf16.msra.mxu3 %v1268_v37 }
 0x3a5   : > { %v821_v39 = vunpack.c.l.b16 %v817_v38  ;;  %v1267_v38 = vld [vmem:[%s1798_s10 + $0x10] sm:$0xff] }
 0x3a7   : > { %v822_v40 = vpack.c.b16 %v821_v39, %v821_v39  ;;  %v1266_v39 = vld [vmem:[%s1798_s10 + $0x8] sm:$0xff] }
 0x3a8   : > { %1042 = vmatpush.bf16.msra.mxu3 %v1267_v38 }
 0x3a9   : > { %823 = vrot.lane.b32.xlu2 %v822_v40, %s1456_s28  ;;  %v1265_v40 = vld [vmem:[%s1798_s10] sm:$0xff]  ;;  %s1186_s28 = sshll.u32 %s481_s24, 3 }
 0x3aa   : > { %v776_v41 = vpop.f32.mrf.mxu2  ;;  %v793_v42 = vpop.f32.mrf.mxu3  ;;  %s483_s1 = scalar_lea.vmem [#allocation5], %s1186_s28  ;;  %s1390_s28 = scalar_lea.hbm %s1802_s14, 16 }
 0x3ab   : > { %v818_v43 = vpack.c.bf16 %v793_v42, %v793_v42  ;;  %v1342_v41 = vld [vmem:[%s1797_s9] ss:$0 sm:$0xff] }
 0x3ac   : > { %1043 = vmatpush.bf16.msra.mxu3 %v1266_v39 }
 0x3ad   : > { %v826_v44 = vunpack.c.l.b16 %v818_v43  ;;  %v812_v45 = vpop.f32.mrf.mxu0 }
 0x3ae   : > { %v819_v47 = vpack.c.bf16 %v812_v45, %v812_v45 }
 0x3af   : > { %v827_v46 = vpack.c.b16 %v826_v44, %v826_v44 }
 0x3b0   : > { %v831_v49 = vunpack.c.l.b16 %v819_v47  ;;  %1044 = vmatpush.bf16.msra.mxu3 %v1265_v40 }
 0x3b1   : > { %828 = vrot.lane.b32.xlu2 %v827_v46, %s1457_s17  ;;  %s1256_s17 = sshll.u32 %s1440_s16, 3  ;;  %s1097_s16 = sshll.u32 %s483_s1, 4  ;;  %s1098_s16 = int_to_ptr.vmem [resolvable:$true] %s1097_s16 }
 0x3b2   : > { %v795_v48 = vpop.f32.mrf.mxu3  ;;  %v832_v51 = vpack.c.b16 %v831_v49, %v831_v49  ;;  %s1095_s22 = scalar_lea.hbm %s1802_s14, %s1256_s17 }
 0x3b3   : > { %s1099_s2 = sshll.u32 %s1095_s22, 4  ;;  %s1100_s2 = int_to_ptr.hbm [resolvable:$true] %s1099_s2 }
 0x3b4   : > { %s1384_s26 = sshra.s32 %s1100_s2, 4  ;;  %s1385_s26 = int_to_ptr.hbm [resolvable:$true] %s1384_s26 }
 0x3b5   : > { %v814_v50 = vpop.f32.mrf.mxu0  ;;  %s1386_s17 = scalar_lea.hbm %s1385_s26, 8  ;;  %p1391_p1 = scmp.lt.s32.totalorder %s1385_s26, %s1802_s14 }
 0x3b6   : > { %p1387_p12 = scmp.ne.s32.totalorder %s1385_s26, %s1386_s17  ;;  %p1392_p2 = scmp.lt.s32.totalorder %s1390_s28, %s1386_s17 }
 0x3b8   : > { %p1388_p13 = pnand %p1387_p12, %p1575_p4  ;;  %p1393_p3 = por %p1392_p2, %p1391_p1 }
 0x3b9   : > { %833 = vrot.lane.b32.xlu2 %v832_v51, %s1458_s21  ;;  %s1084_s21 = scalar_lea.sflag [#allocation6], %s481_s24 }
 0x3ba   : > { %p1389_p0 = pneg %p1388_p13 }
 0x3bc   : > { %p1394_p5 = pnand %p1393_p3, %p1389_p0 }
 0x403   : > { %v824_v54 = vpop.permute.xlu2 %823 }
 0x404   : > { %v837_v57 = vsel %vm602_vm2, %v816_v56, %v824_v54 }
 0x40b   : > { %v829_v55 = vpop.permute.xlu2 %828 }
 0x40c   : > { %v840_v58 = vsel %vm838_vm7, %v837_v57, %v829_v55  ;;  %v1343_v55 = vld [vmem:[%s1799_s11] ss:$0 sm:$0xff] }
 0x413   : > { %v834_v59 = vpop.permute.xlu2 %833 }
 0x414   : > { %v843_v60 = vsel %vm841_vm8, %v840_v58, %v834_v59 }
 0x415   : > { %1213 = vmatmul.msk.bf16.vlgmr.msra.gmra.mxu1 %vm520_vm0, %v843_v60 }
 0x492   : > { %v876_v62 = vpop.f32.mrf.mxu1 }
 0x493   : > { %v877_v63 = vadd.f32 %v1339_v61, %v876_v62 }
 0x495   : > { %v882_v0 = vadd.f32 %v877_v63, %v1604_v2 }
 0x497   : > { %v885_v1 = vsel %vm520_vm0, %v882_v0, 0.0 }
 0x498   : > { %886 = vadd.xlane.f32.xlu1 %v885_v1 }
 0x49a   : > { %v878_v3 = vpop.f32.mrf.mxu1 }
 0x50b   : > { %v887_v12 = vpop.xlane.xlu1 %886 }
 0x50c   : > { %v895_v13 = vmul.f32 %v1692_v11, %v887_v12 }
 0x50e   : > { %v896_v14 = vsub.f32 %v882_v0, %v895_v13  ;;  %v1344_v13 = vld [vmem:[%s1800_s12] ss:$0 sm:$0xff] }
 0x510   : > { %v897_v15 = vmul.f32 %v896_v14, %v896_v14 }
 0x512   : > { %v898_v2 = vsel %vm520_vm0, %v897_v15, 0.0  ;;  %v1345_v15 = vld [vmem:[%s1801_s13] ss:$0 sm:$0xff] }
 0x513   : > { %899 = vadd.xlane.f32.xlu2 %v898_v2 }
 0x586   : > { %v900_v19 = vpop.xlane.xlu2 %899 }
 0x587   : > { %v901_v20 = vmul.f32 %v900_v19, %v1692_v11 }
 0x589   : > { %v902_v22 = vadd.f32 1e-05, %v901_v20 }
 0x58b   : > { %1364 = vrsqrt.f32 %v902_v22  ;;  %vm909_vm11 = vweird.f32 %v902_v22 }
 0x591   : > { %v1365_v23 = vpop.eup %1364 }
 0x592   : > { %v904_v24 = vmul.f32 %v1365_v23, %v902_v22  ;;  %vm910_vm10 = vweird.f32 %v1365_v23 }
 0x593   : > { %vm911_vm12 = vmor %vm909_vm11, %vm910_vm10 }
 0x594   : > { %v905_v25 = vmul.f32 %v1365_v23, %v904_v24 }
 0x596   : > { %v906_v26 = vmul.f32 0.5, %v905_v25 }
 0x598   : > { %v907_v27 = vsub.f32 1.5, %v906_v26 }
 0x59a   : > { %v908_v9 = vmul.f32 %v1365_v23, %v907_v27 }
 0x59c   : > { %v912_v29 = vsel %vm911_vm12, %v1365_v23, %v908_v9 }
 0x59d   : > { %v913_v30 = vmul.f32 %v912_v29, %v896_v14 }
 0x59f   : > { %v917_v32 = vmul.f32 %v1340_v28, %v913_v30 }
 0x5a1   : > { %v921_v33 = vadd.f32 %v1341_v31, %v917_v32 }
 0x5a3   : > { %v922_v34 = vpack.c.bf16 %v921_v33, %v921_v33 }
 0x5a5   : > { %1222 = vmatmul.msk.bf16.vlgmr.msra.gmra.mxu2 %vm520_vm0, %v922_v34 }
 0x628   : > { %v955_v42 = vpop.f32.mrf.mxu2 }
 0x629   : > { %v956_v43 = vadd.f32 %v1342_v41, %v955_v42 }
 0x62b   : > { %v960_v44 = vmul.f32 0.044715, %v956_v43  ;;  %v959_v51 = vmul.f32 0.5, %v956_v43 }
 0x62d   : > { %v961_v45 = vmul.f32 %v960_v44, %v956_v43 }
 0x62f   : > { %v962_v46 = vmul.f32 %v961_v45, %v956_v43 }
 0x630   : > { %v957_v47 = vpop.f32.mrf.mxu2 }
 0x631   : > { %v963_v48 = vadd.f32 %v962_v46, %v956_v43 }
 0x633   : > { %v964_v49 = vmul.f32 0.7978846, %v963_v48 }
 0x635   : > { %1366 = vtanh.f32 %v964_v49 }
 0x63b   : > { %v1367_v50 = vpop.eup %1366 }
 0x63c   : > { %v966_v52 = vadd.f32 1.0, %v1367_v50 }
 0x63e   : > { %v967_v53 = vmul.f32 %v966_v52, %v959_v51 }
 0x640   : > { %v968_v54 = vpack.c.bf16 %v967_v53, %v967_v53 }
 0x642   : > { %1045 = vmatmul.bf16.vlgmr.msra.gmra.mxu3 %v968_v54 }
 0x6c5   : > { %v1046_v56 = vpop.f32.mrf.mxu3 }
 0x6c6   : > { %v1047_v57 = vadd.f32 %v1343_v55, %v1046_v56 }
 0x6c8   : > { %v1052_v58 = vsel %vm520_vm0, %v1047_v57, 0.0 }
 0x6c9   : > { %1053 = vadd.xlane.f32.xlu1 %v1052_v58 }
 0x6cd   : > { %v1048_v59 = vpop.f32.mrf.mxu3 }
 0x73c   : > { %v1054_v60 = vpop.xlane.xlu1 %1053 }
 0x73d   : > { %v1055_v61 = vmul.f32 %v1054_v60, %v1692_v11 }
 0x73f   : > { %v1056_v62 = vsub.f32 %v1047_v57, %v1055_v61 }
 0x741   : > { %v1057_v63 = vmul.f32 %v1056_v62, %v1056_v62 }
 0x743   : > { %v1058_v0 = vsel %vm520_vm0, %v1057_v63, 0.0 }
 0x744   : > { %1059 = vadd.xlane.f32.xlu0 %v1058_v0 }
 0x7b7   : > { %v1060_v1 = vpop.xlane.xlu0 %1059 }
 0x7b8   : > { %v1061_v3 = vmul.f32 %v1060_v1, %v1692_v11 }
 0x7ba   : > { %v1062_v4 = vadd.f32 2.5e-06, %v1061_v3 }
 0x7bc   : > { %1368 = vrsqrt.f32 %v1062_v4  ;;  %vm1069_vm14 = vweird.f32 %v1062_v4 }
 0x7c2   : > { %v1369_v5 = vpop.eup %1368 }
 0x7c3   : > { %v1064_v6 = vmul.f32 %v1369_v5, %v1062_v4  ;;  %vm1070_vm13 = vweird.f32 %v1369_v5 }
 0x7c4   : > { %vm1071_vm15 = vmor %vm1069_vm14, %vm1070_vm13 }
 0x7c5   : > { %v1065_v7 = vmul.f32 %v1369_v5, %v1064_v6 }
 0x7c7   : > { %v1066_v8 = vmul.f32 0.5, %v1065_v7 }
 0x7c9   : > { %v1067_v10 = vsub.f32 1.5, %v1066_v8 }
 0x7cb   : > { %v1068_v12 = vmul.f32 %v1369_v5, %v1067_v10 }
 0x7cd   : > { %v1072_v11 = vsel %vm1071_vm15, %v1369_v5, %v1068_v12 }
 0x7ce   : > { %v1073_v14 = vmul.f32 %v1072_v11, %v1056_v62 }
 0x7d0   : > { %v1077_v2 = vmul.f32 %v1344_v13, %v1073_v14 }
 0x7d2   : > { %v1081_v16 = vadd.f32 %v1345_v15, %v1077_v2 }
 0x7d4   : > { %1082 = vst.msk [vmem:[%s483_s1] sm:$0xff] %vm520_vm0, %v1081_v16 }
 0x7d5   : > { %1397 = shalt.err (!%p1394_p5)
}
 0x7d6   : > { %1273 = dma.vmem_to_hbm [thread:$0]  (%p1575_p4), %s1098_s16, 128, %s1100_s2, %s1084_s21  }
 0x7d7 PF: > { %p1279_p6 = scmp.ge.s32.totalorder %s1448_s18, 2  ;;  %s1111_s1 = sand.u32 1, %s1428_s29  }
 0x7d8   : > { %s1112_s24 = scalar_lea.sflag [#allocation6], %s1111_s1 }
 0x7d9   : > { %p1276_p7 = pnand %p1279_p6, %p1582_p8 }
 0x7db   : > { %p1277_p9 = pneg %p1276_p7 }
 0x7dd   : > { %1423 = dma.done.wait (%p1277_p9), %s1112_s24, 128  }
 0x7de   : > { %1425 = vsyncadd (%p1277_p9), %s1112_s24, 4294967168  ;;  %s27_s18 = sadd.s32 1, %s1448_s18   ;;  %s1816_s27 = sld [smem:[#allocation10_spill]] }
 0x7df   : > { %p24_p10 = scmp.ge.s32.totalorder %s27_s18, 4   ;;  %s1817_s16 = sld [smem:[#allocation8_spill]] }
 0x7e0   : > { %s1818_s17 = sld [smem:[#allocation9_spill]]  ;;  %s1819_s29 = smov %s1432_s30 }
 0x7e1   : > { %s1820_s30 = smov %s1436_s15  ;;  %26 = sbr.rel (!%p24_p10) target bundleno = 8 (0x8), region = 120 }
 0x7e4   : > { %s1821_s15 = smov %s1816_s27 }
 0x7e6   :  { %1118 = vsyncpa [#allocation6], 1 }
 0x7e7   :  { %1120 = vsyncpa [#allocation6 + $0x1], 1 }

</bundles_post_ra>
